<compile_context>
chip_gen: v6e
topology: v6e:2x2x1
jax: 0.10.0
libtpu: 0.0.40
codegen_flags: <defaults>
</compile_context>

<pallas_src>
import jax
import jax.numpy as jnp
from jax.experimental import pallas as pl
from jax.experimental.pallas import tpu as pltpu


NEG_SLOPE = 0.1   # matches F.leaky_relu(..., negative_slope=0.1) in the PyTorch reference


def _leaky(z):
    return jnp.where(z >= 0, z, NEG_SLOPE * z)


# ----------------------------- Pallas kernels ------------------------------

def mm_bias_bnact_kernel(w_ref, x_ref, b_ref, s_ref, t_ref, o_ref):
    # conv (as W @ patches) + bias, fused BatchNorm (scale/shift) + leaky_relu epilogue.
    # Output block is (Co, tm) with tm a multiple of 128 -> lane-dense store & epilogue.
    y = jnp.dot(w_ref[...], x_ref[...], preferred_element_type=jnp.float32) + b_ref[...]
    o_ref[...] = _leaky(y * s_ref[...] + t_ref[...]).astype(o_ref.dtype)


def mm_bias_dual_kernel(w_ref, x_ref, b_ref, s_ref, t_ref, y_ref, a_ref):
    # conv + bias; emits the raw residual stream (bf16) AND the consumer's BN+leaky
    # activation in one pass (no separate elementwise kernel / extra HBM round trip).
    y = jnp.dot(w_ref[...], x_ref[...], preferred_element_type=jnp.float32) + b_ref[...]
    y_ref[...] = y.astype(y_ref.dtype)
    a_ref[...] = _leaky(y * s_ref[...] + t_ref[...]).astype(a_ref.dtype)


def mm_bias_add_dual_kernel(w_ref, x_ref, b_ref, sc_ref, s_ref, t_ref, y_ref, a_ref):
    # conv + bias + identity-shortcut residual add, fused next-BN+leaky epilogue.
    y = (jnp.dot(w_ref[...], x_ref[...], preferred_element_type=jnp.float32)
         + b_ref[...] + sc_ref[...].astype(jnp.float32))
    y_ref[...] = y.astype(y_ref.dtype)
    a_ref[...] = _leaky(y * s_ref[...] + t_ref[...]).astype(a_ref.dtype)


def head_kernel(x_ref, w_ref, b_ref, o_ref):
    # F.avg_pool2d(., 8) over the full 8x8 map + Linear (class dim pre-padded to 128).
    xs = x_ref[...].astype(jnp.float32)                    # (C, N, H*W)
    pooled = jnp.sum(xs, axis=2) * (1.0 / xs.shape[2])     # (C, N)
    o_ref[...] = (jnp.dot(w_ref[...], pooled, preferred_element_type=jnp.float32)
                  + b_ref[...])                            # (ncp, N)


# ----------------------------- Pallas wrappers ------------------------------

def _col_tile(m):
    # Single grid step for small M (per-step overhead dominates this tiny model);
    # cap at 512 so M=2048 keeps 4 steps -> 2 pipelined steps per v7x TensorCore,
    # and 512-wide tiles already reach ~85% of the HBM roofline on v6e/v5e.
    if m <= 512:
        return m
    for t in (512, 256, 128):
        if m % t == 0:
            return t
    return m


def _round_up(v, m):
    return ((v + m - 1) // m) * m


def _chan_spec(c):
    return pl.BlockSpec((c, 1), lambda i: (0, 0))


def _prep_conv3x3(x, w, stride):
    """Channel-major im2col for a 3x3, pad=1, bias conv.
    x: (Ci, N, H, W); w: (Co, Ci, 3, 3) torch layout.
    Returns X (Kp, M) bf16, Wm (Co, Kp) bf16, (N, Ho, Wo)."""
    Ci, N, H, W = x.shape
    Co = w.shape[0]
    xp = jnp.pad(x, ((0, 0), (0, 0), (1, 1), (1, 1)))
    Ho = (H + 2 - 3) // stride + 1
    Wo = (W + 2 - 3) // stride + 1
    rows = []
    for dy in range(3):
        for dx in range(3):
            rows.append(xp[:, :, dy:dy + stride * (Ho - 1) + 1:stride,
                              dx:dx + stride * (Wo - 1) + 1:stride])
    X = jnp.stack(rows, axis=0).reshape(9 * Ci, N * Ho * Wo)
    Wm = jnp.transpose(w, (0, 2, 3, 1)).reshape(Co, 9 * Ci)
    K = 9 * Ci
    Kp = _round_up(K, 8)                 # stem: K=27 -> 32 (sublane-friendly)
    if Kp != K:
        X = jnp.pad(X, ((0, Kp - K), (0, 0)))
        Wm = jnp.pad(Wm, ((0, 0), (0, Kp - K)))
    # TODO(synk): patches are still materialized in HBM (bf16); a direct-conv kernel folding
    # the 9 taps as a reduction grid axis over a VMEM-resident input tile would remove the
    # ~9x activation read amplification and the extra XLA copies entirely.
    return X.astype(jnp.bfloat16), Wm.astype(jnp.bfloat16), (N, Ho, Wo)


def conv3x3_bn_act(x, w, b, scale, shift, stride=1):
    """leaky_relu(bn(conv3x3(x))) with BN+act fused as the matmul epilogue.
    Returns bf16 activation in channel-major (Co, N, Ho, Wo) layout."""
    X, Wm, (N, Ho, Wo) = _prep_conv3x3(x, w, stride)
    K, M = X.shape
    Co = Wm.shape[0]
    tm = _col_tile(M)
    out = pl.pallas_call(
        mm_bias_bnact_kernel,
        out_shape=jax.ShapeDtypeStruct((Co, M), jnp.bfloat16),
        grid=(M // tm,),
        in_specs=[pl.BlockSpec((Co, K), lambda i: (0, 0)),
                  pl.BlockSpec((K, tm), lambda i: (0, i)),
                  _chan_spec(Co), _chan_spec(Co), _chan_spec(Co)],
        out_specs=pl.BlockSpec((Co, tm), lambda i: (0, i)),
        compiler_params=pltpu.CompilerParams(dimension_semantics=("parallel",)),
    )(Wm, X, b.reshape(Co, 1), scale, shift)
    return out.reshape(Co, N, Ho, Wo)


def _mm_dual(Wm, X, bb, next_scale, next_shift):
    """Shared dual-output matmul call: y = Wm @ X + bb (raw bf16 residual stream) and
    a = leaky(y * next_scale + next_shift) (the consumer's BN1 / bn_final activation)."""
    K, M = X.shape
    Co = Wm.shape[0]
    tm = _col_tile(M)
    y, a = pl.pallas_call(
        mm_bias_dual_kernel,
        out_shape=(jax.ShapeDtypeStruct((Co, M), jnp.bfloat16),
                   jax.ShapeDtypeStruct((Co, M), jnp.bfloat16)),
        grid=(M // tm,),
        in_specs=[pl.BlockSpec((Co, K), lambda i: (0, 0)),
                  pl.BlockSpec((K, tm), lambda i: (0, i)),
                  _chan_spec(Co), _chan_spec(Co), _chan_spec(Co)],
        out_specs=(pl.BlockSpec((Co, tm), lambda i: (0, i)),
                   pl.BlockSpec((Co, tm), lambda i: (0, i))),
        compiler_params=pltpu.CompilerParams(dimension_semantics=("parallel",)),
    )(Wm, X, bb, next_scale, next_shift)
    return y, a


def conv3x3_dual(x, w, b, next_scale, next_shift, stride=1):
    """conv3x3 emitting (raw bf16, leaky(next_bn(raw)) bf16) in one pass (stem)."""
    X, Wm, (N, Ho, Wo) = _prep_conv3x3(x, w, stride)
    Co = Wm.shape[0]
    y, a = _mm_dual(Wm, X, b.reshape(Co, 1), next_scale, next_shift)
    return y.reshape(Co, N, Ho, Wo), a.reshape(Co, N, Ho, Wo)


def conv3x3_add_dual(x, w, b, sc, next_scale, next_shift, stride=1):
    """conv3x3 + identity-shortcut residual add, emitting (raw bf16, activated bf16)."""
    X, Wm, (N, Ho, Wo) = _prep_conv3x3(x, w, stride)
    K, M = X.shape
    Co = Wm.shape[0]
    tm = _col_tile(M)
    SC = sc.reshape(Co, M)                      # already bf16, lane-dense layout
    y, a = pl.pallas_call(
        mm_bias_add_dual_kernel,
        out_shape=(jax.ShapeDtypeStruct((Co, M), jnp.bfloat16),
                   jax.ShapeDtypeStruct((Co, M), jnp.bfloat16)),
        grid=(M // tm,),
        in_specs=[pl.BlockSpec((Co, K), lambda i: (0, 0)),
                  pl.BlockSpec((K, tm), lambda i: (0, i)),
                  _chan_spec(Co),
                  pl.BlockSpec((Co, tm), lambda i: (0, i)),
                  _chan_spec(Co), _chan_spec(Co)],
        out_specs=(pl.BlockSpec((Co, tm), lambda i: (0, i)),
                   pl.BlockSpec((Co, tm), lambda i: (0, i))),
        compiler_params=pltpu.CompilerParams(dimension_semantics=("parallel",)),
    )(Wm, X, b.reshape(Co, 1), SC, next_scale, next_shift)
    return y.reshape(Co, N, Ho, Wo), a.reshape(Co, N, Ho, Wo)


def conv3x3_scconv_dual(x, w, b, x_raw, ws, bs, next_scale, next_shift, stride):
    """conv3x3 + strided 1x1 projection shortcut folded into ONE MXU pass: the strided
    shortcut input is concatenated onto the patch matrix along K and the 1x1 weight is
    stacked onto the conv weight, so conv + shortcut + residual add is a single matmul."""
    X1, Wm, (N, Ho, Wo) = _prep_conv3x3(x, w, stride)
    Co, Ci_s = ws.shape[0], ws.shape[1]
    XS = x_raw[:, :, ::stride, ::stride].reshape(Ci_s, N * Ho * Wo).astype(jnp.bfloat16)
    X = jnp.concatenate([X1, XS], axis=0)                       # (9*Ci + Ci_s, M)
    WS = ws.reshape(Co, Ci_s).astype(jnp.bfloat16)
    Wfull = jnp.concatenate([Wm, WS], axis=1)                   # (Co, 9*Ci + Ci_s)
    bb = (b + bs).reshape(Co, 1)
    y, a = _mm_dual(Wfull, X, bb, next_scale, next_shift)
    return y.reshape(Co, N, Ho, Wo), a.reshape(Co, N, Ho, Wo)


def avgpool_linear_head(a, w, b, num_classes):
    """avg_pool2d(., 8) + view + Linear fused; class dim padded to 128."""
    C, N, H, Wd = a.shape
    X = a.reshape(C, N, H * Wd)
    ncp = 128
    Wm = jnp.zeros((ncp, C), jnp.float32).at[:num_classes, :].set(w)
    bm = jnp.zeros((ncp, 1), jnp.float32).at[:num_classes, 0].set(b)
    out = pl.pallas_call(
        head_kernel,
        out_shape=jax.ShapeDtypeStruct((ncp, N), jnp.float32),
    )(X, Wm, bm)
    return jnp.transpose(out[:num_classes, :])                  # (N, num_classes)


# ----------------------------- model definition -----------------------------

def _conv_params(key, co, ci, k):
    k1, k2 = jax.random.split(key)
    w = jax.random.normal(k1, (co, ci, k, k), jnp.float32) * 0.05
    b = jax.random.normal(k2, (co,), jnp.float32) * 0.05
    return w, b


def _bn_params(key, c):
    k1, k2, k3, k4 = jax.random.split(key, 4)
    gamma = 1.0 + 0.1 * jax.random.normal(k1, (c,), jnp.float32)
    beta = 0.1 * jax.random.normal(k2, (c,), jnp.float32)
    mean = 0.1 * jax.random.normal(k3, (c,), jnp.float32)
    var = jnp.abs(1.0 + 0.1 * jax.random.normal(k4, (c,), jnp.float32))
    return gamma, beta, mean, var


def _fold_bn(bn, eps=1e-5):
    gamma, beta, mean, var = bn
    scale = gamma / jnp.sqrt(var + eps)
    shift = beta - mean * scale
    c = gamma.shape[0]
    return (scale.reshape(c, 1).astype(jnp.float32),
            shift.reshape(c, 1).astype(jnp.float32))


def _block_params(key, ci, co, stride):
    keys = jax.random.split(key, 5)
    p = {"stride": stride,
         "bn1": _bn_params(keys[0], ci),
         "bn2": _bn_params(keys[2], co)}
    p["conv1_w"], p["conv1_b"] = _conv_params(keys[1], co, ci, 3)
    p["conv2_w"], p["conv2_b"] = _conv_params(keys[3], co, co, 3)
    if stride != 1 or ci != co:
        p["short_w"], p["short_b"] = _conv_params(keys[4], co, ci, 1)
    return p


def init_wrn_params(key, depth=10, widen_factor=1, num_classes=10):
    assert (depth - 4) % 6 == 0
    n = (depth - 4) // 6
    k = widen_factor
    stages = [16, 16 * k, 32 * k, 64 * k]
    keys = jax.random.split(key, 8)
    params = {}
    params["conv1_w"], params["conv1_b"] = _conv_params(keys[0], stages[0], 3, 3)

    in_planes = stages[0]

    def make_layer(lkey, planes, num_blocks, stride):
        nonlocal in_planes
        strides = [stride] + [1] * (num_blocks - 1)
        blocks = []
        bkeys = jax.random.split(lkey, num_blocks)
        for bk, s in zip(bkeys, strides):
            blocks.append(_block_params(bk, in_planes, planes, s))
            in_planes = planes
        return blocks

    params["layer1"] = make_layer(keys[1], stages[1], n, 1)
    params["layer2"] = make_layer(keys[2], stages[2], n, 2)
    params["layer3"] = make_layer(keys[3], stages[3], n, 2)
    params["bn_final"] = _bn_params(keys[4], stages[3])
    kw, kb = jax.random.split(keys[5])
    params["lin_w"] = jax.random.normal(kw, (num_classes, stages[3]), jnp.float32) * 0.05
    params["lin_b"] = jax.random.normal(kb, (num_classes,), jnp.float32) * 0.05
    return params


def wide_basic_fused(y_raw, a_in, p, next_scale, next_shift):
    # a_in == leaky_relu(bn1(y_raw)) was already produced (fused) by the upstream kernel.
    s2, t2 = _fold_bn(p["bn2"])
    a2 = conv3x3_bn_act(a_in, p["conv1_w"], p["conv1_b"], s2, t2, stride=1)
    # TODO(synk): nn.Dropout is identity in eval mode; training-mode dropout not implemented.
    if "short_w" in p:
        return conv3x3_scconv_dual(a2, p["conv2_w"], p["conv2_b"],
                                   y_raw, p["short_w"], p["short_b"],
                                   next_scale, next_shift, stride=p["stride"])
    return conv3x3_add_dual(a2, p["conv2_w"], p["conv2_b"], y_raw,
                            next_scale, next_shift, stride=p["stride"])


def wide_resnet_forward(x_nchw, params, num_classes=10):
    x = jnp.transpose(x_nchw, (1, 0, 2, 3))          # NCHW -> channel-major (C, N, H, W)
    blocks = params["layer1"] + params["layer2"] + params["layer3"]
    # Producer kernel k also emits leaky_relu(bn(.)) of consumer k+1 (bn1 of the next
    # block, or bn_final after the last block), so BN+act never runs standalone.
    next_bns = [blk["bn1"] for blk in blocks] + [params["bn_final"]]
    s0, t0 = _fold_bn(next_bns[0])
    y, a = conv3x3_dual(x, params["conv1_w"], params["conv1_b"], s0, t0, stride=1)
    for k, blk in enumerate(blocks):
        ns, nt = _fold_bn(next_bns[k + 1])
        y, a = wide_basic_fused(y, a, blk, ns, nt)
    # a == leaky_relu(bn_final(y)) already; only pooling + linear remain.
    # TODO(synk): deeper fusion (conv1+conv2 per block with VMEM-resident intermediate, or
    # whole-network VMEM residency) would remove remaining per-call overhead; left out to
    # keep lowering robust.
    return avgpool_linear_head(a, params["lin_w"], params["lin_b"], num_classes)


# --------------------------------- main --------------------------------------

if __name__ == "__main__":
    key = jax.random.PRNGKey(0)
    kx, kp = jax.random.split(key)
    # Standard WRN input geometry (32x32) so the final F.avg_pool2d(., 8) sees an 8x8 map.
    x = jax.random.normal(kx, (2, 3, 32, 32), jnp.float32)
    params = init_wrn_params(kp, depth=10, widen_factor=1, num_classes=10)

    fwd = jax.jit(lambda inp: wide_resnet_forward(inp, params, num_classes=10))
    logits = fwd(x)
    jax.block_until_ready(logits)
    assert logits.shape == (2, 10)
    print("KERNEL_OK")
</pallas_src>

<mosaic_0001>
module attributes {stable_mosaic.version = 11 : i64} {
  func.func @mm_bias_dual_kernel(%arg0: i32, %arg1: memref<16x32xbf16, #tpu.memory_space<vmem>>, %arg2: memref<32x512xbf16, #tpu.memory_space<vmem>>, %arg3: memref<16x1xf32, #tpu.memory_space<vmem>>, %arg4: memref<16x1xf32, #tpu.memory_space<vmem>>, %arg5: memref<16x1xf32, #tpu.memory_space<vmem>>, %arg6: memref<16x512xbf16, #tpu.memory_space<vmem>>, %arg7: memref<16x512xbf16, #tpu.memory_space<vmem>>) attributes {dimension_semantics = [#tpu.dimension_semantics<parallel>], iteration_bounds = array<i64: 4>, scalar_prefetch = 0 : i64, scratch_operands = 0 : i64, tpu.core_type = #tpu.core_type<tc>, window_params = [{pipeline_mode = #tpu.pipeline_mode<synchronous>, transform_indices = @transform_0, window_bounds = array<i64: 16, 32>}, {transform_indices = @transform_1, window_bounds = array<i64: 32, 512>}, {pipeline_mode = #tpu.pipeline_mode<synchronous>, transform_indices = @transform_2, window_bounds = array<i64: 16, 1>}, {pipeline_mode = #tpu.pipeline_mode<synchronous>, transform_indices = @transform_3, window_bounds = array<i64: 16, 1>}, {pipeline_mode = #tpu.pipeline_mode<synchronous>, transform_indices = @transform_4, window_bounds = array<i64: 16, 1>}, {transform_indices = @transform_5, window_bounds = array<i64: 16, 512>}, {transform_indices = @transform_6, window_bounds = array<i64: 16, 512>}]} {
    %c0 = arith.constant 0 : index
    %c0_0 = arith.constant 0 : index
    %0 = vector.load %arg1[%c0, %c0_0] : memref<16x32xbf16, #tpu.memory_space<vmem>>, vector<16x32xbf16>
    %c0_1 = arith.constant 0 : index
    %c0_2 = arith.constant 0 : index
    %1 = vector.load %arg2[%c0_1, %c0_2] : memref<32x512xbf16, #tpu.memory_space<vmem>>, vector<32x512xbf16>
    %cst = arith.constant dense<0.000000e+00> : vector<16x512xf32>
    %2 = tpu.matmul %0, %1, %cst {dimension_numbers = #tpu.dot_dimension_numbers<[1], [0], [0], [1], [0, 0, 1, 1], [], []>} : vector<16x32xbf16>, vector<32x512xbf16>, vector<16x512xf32> -> vector<16x512xf32>
    %c0_3 = arith.constant 0 : index
    %c0_4 = arith.constant 0 : index
    %3 = vector.load %arg3[%c0_3, %c0_4] : memref<16x1xf32, #tpu.memory_space<vmem>>, vector<16x1xf32>
    %4 = vector.broadcast %3 : vector<16x1xf32> to vector<16x512xf32>
    %5 = arith.addf %2, %4 : vector<16x512xf32>
    %6 = arith.truncf %5 : vector<16x512xf32> to vector<16x512xbf16>
    %c0_5 = arith.constant 0 : index
    %c0_6 = arith.constant 0 : index
    %7 = vector.load %arg6[%c0_5, %c0_6] : memref<16x512xbf16, #tpu.memory_space<vmem>>, vector<16x512xbf16>
    tpu.vector_store %arg6[%c0_5, %c0_6], %6 {strides = array<i32>} : memref<16x512xbf16, #tpu.memory_space<vmem>>, vector<16x512xbf16>,
    %c0_7 = arith.constant 0 : index
    %c0_8 = arith.constant 0 : index
    %8 = vector.load %arg4[%c0_7, %c0_8] : memref<16x1xf32, #tpu.memory_space<vmem>>, vector<16x1xf32>
    %9 = vector.broadcast %8 : vector<16x1xf32> to vector<16x512xf32>
    %10 = arith.mulf %5, %9 : vector<16x512xf32>
    %c0_9 = arith.constant 0 : index
    %c0_10 = arith.constant 0 : index
    %11 = vector.load %arg5[%c0_9, %c0_10] : memref<16x1xf32, #tpu.memory_space<vmem>>, vector<16x1xf32>
    %12 = vector.broadcast %11 : vector<16x1xf32> to vector<16x512xf32>
    %13 = arith.addf %10, %12 : vector<16x512xf32>
    %cst_11 = arith.constant 0.000000e+00 : f32
    %14 = vector.broadcast %cst_11 : f32 to vector<16x512xf32>
    %15 = arith.cmpf oge, %13, %14 : vector<16x512xf32>
    %cst_12 = arith.constant 1.000000e-01 : f32
    %16 = vector.broadcast %cst_12 : f32 to vector<16x512xf32>
    %17 = arith.mulf %16, %13 : vector<16x512xf32>
    %18 = arith.select %15, %13, %17 : vector<16x512xi1>, vector<16x512xf32>
    %19 = arith.truncf %18 : vector<16x512xf32> to vector<16x512xbf16>
    %c0_13 = arith.constant 0 : index
    %c0_14 = arith.constant 0 : index
    %20 = vector.load %arg7[%c0_13, %c0_14] : memref<16x512xbf16, #tpu.memory_space<vmem>>, vector<16x512xbf16>
    tpu.vector_store %arg7[%c0_13, %c0_14], %19 {strides = array<i32>} : memref<16x512xbf16, #tpu.memory_space<vmem>>, vector<16x512xbf16>,
    return
  }
  func.func @transform_0(%arg0: i32) -> (i32, i32) {
    %c0_i32 = arith.constant 0 : i32
    %c0_i32_0 = arith.constant 0 : i32
    %c0_i32_1 = arith.constant 0 : i32
    return %c0_i32, %c0_i32_0 : i32, i32
  }
  func.func @transform_1(%arg0: i32) -> (i32, i32) {
    %c0_i32 = arith.constant 0 : i32
    %c0_i32_0 = arith.constant 0 : i32
    return %c0_i32, %arg0 : i32, i32
  }
  func.func @transform_2(%arg0: i32) -> (i32, i32) {
    %c0_i32 = arith.constant 0 : i32
    %c0_i32_0 = arith.constant 0 : i32
    %c0_i32_1 = arith.constant 0 : i32
    return %c0_i32, %c0_i32_0 : i32, i32
  }
  func.func @transform_3(%arg0: i32) -> (i32, i32) {
    %c0_i32 = arith.constant 0 : i32
    %c0_i32_0 = arith.constant 0 : i32
    %c0_i32_1 = arith.constant 0 : i32
    return %c0_i32, %c0_i32_0 : i32, i32
  }
  func.func @transform_4(%arg0: i32) -> (i32, i32) {
    %c0_i32 = arith.constant 0 : i32
    %c0_i32_0 = arith.constant 0 : i32
    %c0_i32_1 = arith.constant 0 : i32
    return %c0_i32, %c0_i32_0 : i32, i32
  }
  func.func @transform_5(%arg0: i32) -> (i32, i32) {
    %c0_i32 = arith.constant 0 : i32
    %c0_i32_0 = arith.constant 0 : i32
    return %c0_i32, %arg0 : i32, i32
  }
  func.func @transform_6(%arg0: i32) -> (i32, i32) {
    %c0_i32 = arith.constant 0 : i32
    %c0_i32_0 = arith.constant 0 : i32
    return %c0_i32, %arg0 : i32, i32
  }
}

module attributes {stable_mosaic.version = 11 : i64} {
  func.func @mm_bias_add_dual_kernel(%arg0: i32, %arg1: memref<16x144xbf16, #tpu.memory_space<vmem>>, %arg2: memref<144x512xbf16, #tpu.memory_space<vmem>>, %arg3: memref<16x1xf32, #tpu.memory_space<vmem>>, %arg4: memref<16x512xbf16, #tpu.memory_space<vmem>>, %arg5: memref<16x1xf32, #tpu.memory_space<vmem>>, %arg6: memref<16x1xf32, #tpu.memory_space<vmem>>, %arg7: memref<16x512xbf16, #tpu.memory_space<vmem>>, %arg8: memref<16x512xbf16, #tpu.memory_space<vmem>>) attributes {dimension_semantics = [#tpu.dimension_semantics<parallel>], iteration_bounds = array<i64: 4>, scalar_prefetch = 0 : i64, scratch_operands = 0 : i64, tpu.core_type = #tpu.core_type<tc>, window_params = [{pipeline_mode = #tpu.pipeline_mode<synchronous>, transform_indices = @transform_0, window_bounds = array<i64: 16, 144>}, {transform_indices = @transform_1, window_bounds = array<i64: 144, 512>}, {pipeline_mode = #tpu.pipeline_mode<synchronous>, transform_indices = @transform_2, window_bounds = array<i64: 16, 1>}, {transform_indices = @transform_3, window_bounds = array<i64: 16, 512>}, {pipeline_mode = #tpu.pipeline_mode<synchronous>, transform_indices = @transform_4, window_bounds = array<i64: 16, 1>}, {pipeline_mode = #tpu.pipeline_mode<synchronous>, transform_indices = @transform_5, window_bounds = array<i64: 16, 1>}, {transform_indices = @transform_6, window_bounds = array<i64: 16, 512>}, {transform_indices = @transform_7, window_bounds = array<i64: 16, 512>}]} {
    %c0 = arith.constant 0 : index
    %c0_0 = arith.constant 0 : index
    %0 = vector.load %arg1[%c0, %c0_0] : memref<16x144xbf16, #tpu.memory_space<vmem>>, vector<16x144xbf16>
    %c0_1 = arith.constant 0 : index
    %c0_2 = arith.constant 0 : index
    %1 = vector.load %arg2[%c0_1, %c0_2] : memref<144x512xbf16, #tpu.memory_space<vmem>>, vector<144x512xbf16>
    %cst = arith.constant dense<0.000000e+00> : vector<16x512xf32>
    %2 = tpu.matmul %0, %1, %cst {dimension_numbers = #tpu.dot_dimension_numbers<[1], [0], [0], [1], [0, 0, 1, 1], [], []>} : vector<16x144xbf16>, vector<144x512xbf16>, vector<16x512xf32> -> vector<16x512xf32>
    %c0_3 = arith.constant 0 : index
    %c0_4 = arith.constant 0 : index
    %3 = vector.load %arg3[%c0_3, %c0_4] : memref<16x1xf32, #tpu.memory_space<vmem>>, vector<16x1xf32>
    %4 = vector.broadcast %3 : vector<16x1xf32> to vector<16x512xf32>
    %5 = arith.addf %2, %4 : vector<16x512xf32>
    %c0_5 = arith.constant 0 : index
    %c0_6 = arith.constant 0 : index
    %6 = vector.load %arg4[%c0_5, %c0_6] : memref<16x512xbf16, #tpu.memory_space<vmem>>, vector<16x512xbf16>
    %7 = arith.extf %6 : vector<16x512xbf16> to vector<16x512xf32>
    %8 = arith.addf %5, %7 : vector<16x512xf32>
    %9 = arith.truncf %8 : vector<16x512xf32> to vector<16x512xbf16>
    %c0_7 = arith.constant 0 : index
    %c0_8 = arith.constant 0 : index
    %10 = vector.load %arg7[%c0_7, %c0_8] : memref<16x512xbf16, #tpu.memory_space<vmem>>, vector<16x512xbf16>
    tpu.vector_store %arg7[%c0_7, %c0_8], %9 {strides = array<i32>} : memref<16x512xbf16, #tpu.memory_space<vmem>>, vector<16x512xbf16>,
    %c0_9 = arith.constant 0 : index
    %c0_10 = arith.constant 0 : index
    %11 = vector.load %arg5[%c0_9, %c0_10] : memref<16x1xf32, #tpu.memory_space<vmem>>, vector<16x1xf32>
    %12 = vector.broadcast %11 : vector<16x1xf32> to vector<16x512xf32>
    %13 = arith.mulf %8, %12 : vector<16x512xf32>
    %c0_11 = arith.constant 0 : index
    %c0_12 = arith.constant 0 : index
    %14 = vector.load %arg6[%c0_11, %c0_12] : memref<16x1xf32, #tpu.memory_space<vmem>>, vector<16x1xf32>
    %15 = vector.broadcast %14 : vector<16x1xf32> to vector<16x512xf32>
    %16 = arith.addf %13, %15 : vector<16x512xf32>
    %cst_13 = arith.constant 0.000000e+00 : f32
    %17 = vector.broadcast %cst_13 : f32 to vector<16x512xf32>
    %18 = arith.cmpf oge, %16, %17 : vector<16x512xf32>
    %cst_14 = arith.constant 1.000000e-01 : f32
    %19 = vector.broadcast %cst_14 : f32 to vector<16x512xf32>
    %20 = arith.mulf %19, %16 : vector<16x512xf32>
    %21 = arith.select %18, %16, %20 : vector<16x512xi1>, vector<16x512xf32>
    %22 = arith.truncf %21 : vector<16x512xf32> to vector<16x512xbf16>
    %c0_15 = arith.constant 0 : index
    %c0_16 = arith.constant 0 : index
    %23 = vector.load %arg8[%c0_15, %c0_16] : memref<16x512xbf16, #tpu.memory_space<vmem>>, vector<16x512xbf16>
    tpu.vector_store %arg8[%c0_15, %c0_16], %22 {strides = array<i32>} : memref<16x512xbf16, #tpu.memory_space<vmem>>, vector<16x512xbf16>,
    return
  }
  func.func @transform_0(%arg0: i32) -> (i32, i32) {
    %c0_i32 = arith.constant 0 : i32
    %c0_i32_0 = arith.constant 0 : i32
    %c0_i32_1 = arith.constant 0 : i32
    return %c0_i32, %c0_i32_0 : i32, i32
  }
  func.func @transform_1(%arg0: i32) -> (i32, i32) {
    %c0_i32 = arith.constant 0 : i32
    %c0_i32_0 = arith.constant 0 : i32
    return %c0_i32, %arg0 : i32, i32
  }
  func.func @transform_2(%arg0: i32) -> (i32, i32) {
    %c0_i32 = arith.constant 0 : i32
    %c0_i32_0 = arith.constant 0 : i32
    %c0_i32_1 = arith.constant 0 : i32
    return %c0_i32, %c0_i32_0 : i32, i32
  }
  func.func @transform_3(%arg0: i32) -> (i32, i32) {
    %c0_i32 = arith.constant 0 : i32
    %c0_i32_0 = arith.constant 0 : i32
    return %c0_i32, %arg0 : i32, i32
  }
  func.func @transform_4(%arg0: i32) -> (i32, i32) {
    %c0_i32 = arith.constant 0 : i32
    %c0_i32_0 = arith.constant 0 : i32
    %c0_i32_1 = arith.constant 0 : i32
    return %c0_i32, %c0_i32_0 : i32, i32
  }
  func.func @transform_5(%arg0: i32) -> (i32, i32) {
    %c0_i32 = arith.constant 0 : i32
    %c0_i32_0 = arith.constant 0 : i32
    %c0_i32_1 = arith.constant 0 : i32
    return %c0_i32, %c0_i32_0 : i32, i32
  }
  func.func @transform_6(%arg0: i32) -> (i32, i32) {
    %c0_i32 = arith.constant 0 : i32
    %c0_i32_0 = arith.constant 0 : i32
    return %c0_i32, %arg0 : i32, i32
  }
  func.func @transform_7(%arg0: i32) -> (i32, i32) {
    %c0_i32 = arith.constant 0 : i32
    %c0_i32_0 = arith.constant 0 : i32
    return %c0_i32, %arg0 : i32, i32
  }
}

module attributes {stable_mosaic.version = 11 : i64} {
  func.func @mm_bias_bnact_kernel(%arg0: i32, %arg1: memref<16x144xbf16, #tpu.memory_space<vmem>>, %arg2: memref<144x512xbf16, #tpu.memory_space<vmem>>, %arg3: memref<16x1xf32, #tpu.memory_space<vmem>>, %arg4: memref<16x1xf32, #tpu.memory_space<vmem>>, %arg5: memref<16x1xf32, #tpu.memory_space<vmem>>, %arg6: memref<16x512xbf16, #tpu.memory_space<vmem>>) attributes {dimension_semantics = [#tpu.dimension_semantics<parallel>], iteration_bounds = array<i64: 4>, scalar_prefetch = 0 : i64, scratch_operands = 0 : i64, tpu.core_type = #tpu.core_type<tc>, window_params = [{pipeline_mode = #tpu.pipeline_mode<synchronous>, transform_indices = @transform_0, window_bounds = array<i64: 16, 144>}, {transform_indices = @transform_1, window_bounds = array<i64: 144, 512>}, {pipeline_mode = #tpu.pipeline_mode<synchronous>, transform_indices = @transform_2, window_bounds = array<i64: 16, 1>}, {pipeline_mode = #tpu.pipeline_mode<synchronous>, transform_indices = @transform_3, window_bounds = array<i64: 16, 1>}, {pipeline_mode = #tpu.pipeline_mode<synchronous>, transform_indices = @transform_4, window_bounds = array<i64: 16, 1>}, {transform_indices = @transform_5, window_bounds = array<i64: 16, 512>}]} {
    %c0 = arith.constant 0 : index
    %c0_0 = arith.constant 0 : index
    %0 = vector.load %arg1[%c0, %c0_0] : memref<16x144xbf16, #tpu.memory_space<vmem>>, vector<16x144xbf16>
    %c0_1 = arith.constant 0 : index
    %c0_2 = arith.constant 0 : index
    %1 = vector.load %arg2[%c0_1, %c0_2] : memref<144x512xbf16, #tpu.memory_space<vmem>>, vector<144x512xbf16>
    %cst = arith.constant dense<0.000000e+00> : vector<16x512xf32>
    %2 = tpu.matmul %0, %1, %cst {dimension_numbers = #tpu.dot_dimension_numbers<[1], [0], [0], [1], [0, 0, 1, 1], [], []>} : vector<16x144xbf16>, vector<144x512xbf16>, vector<16x512xf32> -> vector<16x512xf32>
    %c0_3 = arith.constant 0 : index
    %c0_4 = arith.constant 0 : index
    %3 = vector.load %arg3[%c0_3, %c0_4] : memref<16x1xf32, #tpu.memory_space<vmem>>, vector<16x1xf32>
    %4 = vector.broadcast %3 : vector<16x1xf32> to vector<16x512xf32>
    %5 = arith.addf %2, %4 : vector<16x512xf32>
    %c0_5 = arith.constant 0 : index
    %c0_6 = arith.constant 0 : index
    %6 = vector.load %arg4[%c0_5, %c0_6] : memref<16x1xf32, #tpu.memory_space<vmem>>, vector<16x1xf32>
    %7 = vector.broadcast %6 : vector<16x1xf32> to vector<16x512xf32>
    %8 = arith.mulf %5, %7 : vector<16x512xf32>
    %c0_7 = arith.constant 0 : index
    %c0_8 = arith.constant 0 : index
    %9 = vector.load %arg5[%c0_7, %c0_8] : memref<16x1xf32, #tpu.memory_space<vmem>>, vector<16x1xf32>
    %10 = vector.broadcast %9 : vector<16x1xf32> to vector<16x512xf32>
    %11 = arith.addf %8, %10 : vector<16x512xf32>
    %cst_9 = arith.constant 0.000000e+00 : f32
    %12 = vector.broadcast %cst_9 : f32 to vector<16x512xf32>
    %13 = arith.cmpf oge, %11, %12 : vector<16x512xf32>
    %cst_10 = arith.constant 1.000000e-01 : f32
    %14 = vector.broadcast %cst_10 : f32 to vector<16x512xf32>
    %15 = arith.mulf %14, %11 : vector<16x512xf32>
    %16 = arith.select %13, %11, %15 : vector<16x512xi1>, vector<16x512xf32>
    %17 = arith.truncf %16 : vector<16x512xf32> to vector<16x512xbf16>
    %c0_11 = arith.constant 0 : index
    %c0_12 = arith.constant 0 : index
    %18 = vector.load %arg6[%c0_11, %c0_12] : memref<16x512xbf16, #tpu.memory_space<vmem>>, vector<16x512xbf16>
    tpu.vector_store %arg6[%c0_11, %c0_12], %17 {strides = array<i32>} : memref<16x512xbf16, #tpu.memory_space<vmem>>, vector<16x512xbf16>,
    return
  }
  func.func @transform_0(%arg0: i32) -> (i32, i32) {
    %c0_i32 = arith.constant 0 : i32
    %c0_i32_0 = arith.constant 0 : i32
    %c0_i32_1 = arith.constant 0 : i32
    return %c0_i32, %c0_i32_0 : i32, i32
  }
  func.func @transform_1(%arg0: i32) -> (i32, i32) {
    %c0_i32 = arith.constant 0 : i32
    %c0_i32_0 = arith.constant 0 : i32
    return %c0_i32, %arg0 : i32, i32
  }
  func.func @transform_2(%arg0: i32) -> (i32, i32) {
    %c0_i32 = arith.constant 0 : i32
    %c0_i32_0 = arith.constant 0 : i32
    %c0_i32_1 = arith.constant 0 : i32
    return %c0_i32, %c0_i32_0 : i32, i32
  }
  func.func @transform_3(%arg0: i32) -> (i32, i32) {
    %c0_i32 = arith.constant 0 : i32
    %c0_i32_0 = arith.constant 0 : i32
    %c0_i32_1 = arith.constant 0 : i32
    return %c0_i32, %c0_i32_0 : i32, i32
  }
  func.func @transform_4(%arg0: i32) -> (i32, i32) {
    %c0_i32 = arith.constant 0 : i32
    %c0_i32_0 = arith.constant 0 : i32
    %c0_i32_1 = arith.constant 0 : i32
    return %c0_i32, %c0_i32_0 : i32, i32
  }
  func.func @transform_5(%arg0: i32) -> (i32, i32) {
    %c0_i32 = arith.constant 0 : i32
    %c0_i32_0 = arith.constant 0 : i32
    return %c0_i32, %arg0 : i32, i32
  }
}

module attributes {stable_mosaic.version = 11 : i64} {
  func.func @mm_bias_bnact_kernel(%arg0: i32, %arg1: memref<32x144xbf16, #tpu.memory_space<vmem>>, %arg2: memref<144x512xbf16, #tpu.memory_space<vmem>>, %arg3: memref<32x1xf32, #tpu.memory_space<vmem>>, %arg4: memref<32x1xf32, #tpu.memory_space<vmem>>, %arg5: memref<32x1xf32, #tpu.memory_space<vmem>>, %arg6: memref<32x512xbf16, #tpu.memory_space<vmem>>) attributes {dimension_semantics = [#tpu.dimension_semantics<parallel>], iteration_bounds = array<i64: 4>, scalar_prefetch = 0 : i64, scratch_operands = 0 : i64, tpu.core_type = #tpu.core_type<tc>, window_params = [{pipeline_mode = #tpu.pipeline_mode<synchronous>, transform_indices = @transform_0, window_bounds = array<i64: 32, 144>}, {transform_indices = @transform_1, window_bounds = array<i64: 144, 512>}, {pipeline_mode = #tpu.pipeline_mode<synchronous>, transform_indices = @transform_2, window_bounds = array<i64: 32, 1>}, {pipeline_mode = #tpu.pipeline_mode<synchronous>, transform_indices = @transform_3, window_bounds = array<i64: 32, 1>}, {pipeline_mode = #tpu.pipeline_mode<synchronous>, transform_indices = @transform_4, window_bounds = array<i64: 32, 1>}, {transform_indices = @transform_5, window_bounds = array<i64: 32, 512>}]} {
    %c0 = arith.constant 0 : index
    %c0_0 = arith.constant 0 : index
    %0 = vector.load %arg1[%c0, %c0_0] : memref<32x144xbf16, #tpu.memory_space<vmem>>, vector<32x144xbf16>
    %c0_1 = arith.constant 0 : index
    %c0_2 = arith.constant 0 : index
    %1 = vector.load %arg2[%c0_1, %c0_2] : memref<144x512xbf16, #tpu.memory_space<vmem>>, vector<144x512xbf16>
    %cst = arith.constant dense<0.000000e+00> : vector<32x512xf32>
    %2 = tpu.matmul %0, %1, %cst {dimension_numbers = #tpu.dot_dimension_numbers<[1], [0], [0], [1], [0, 0, 1, 1], [], []>} : vector<32x144xbf16>, vector<144x512xbf16>, vector<32x512xf32> -> vector<32x512xf32>
    %c0_3 = arith.constant 0 : index
    %c0_4 = arith.constant 0 : index
    %3 = vector.load %arg3[%c0_3, %c0_4] : memref<32x1xf32, #tpu.memory_space<vmem>>, vector<32x1xf32>
    %4 = vector.broadcast %3 : vector<32x1xf32> to vector<32x512xf32>
    %5 = arith.addf %2, %4 : vector<32x512xf32>
    %c0_5 = arith.constant 0 : index
    %c0_6 = arith.constant 0 : index
    %6 = vector.load %arg4[%c0_5, %c0_6] : memref<32x1xf32, #tpu.memory_space<vmem>>, vector<32x1xf32>
    %7 = vector.broadcast %6 : vector<32x1xf32> to vector<32x512xf32>
    %8 = arith.mulf %5, %7 : vector<32x512xf32>
    %c0_7 = arith.constant 0 : index
    %c0_8 = arith.constant 0 : index
    %9 = vector.load %arg5[%c0_7, %c0_8] : memref<32x1xf32, #tpu.memory_space<vmem>>, vector<32x1xf32>
    %10 = vector.broadcast %9 : vector<32x1xf32> to vector<32x512xf32>
    %11 = arith.addf %8, %10 : vector<32x512xf32>
    %cst_9 = arith.constant 0.000000e+00 : f32
    %12 = vector.broadcast %cst_9 : f32 to vector<32x512xf32>
    %13 = arith.cmpf oge, %11, %12 : vector<32x512xf32>
    %cst_10 = arith.constant 1.000000e-01 : f32
    %14 = vector.broadcast %cst_10 : f32 to vector<32x512xf32>
    %15 = arith.mulf %14, %11 : vector<32x512xf32>
    %16 = arith.select %13, %11, %15 : vector<32x512xi1>, vector<32x512xf32>
    %17 = arith.truncf %16 : vector<32x512xf32> to vector<32x512xbf16>
    %c0_11 = arith.constant 0 : index
    %c0_12 = arith.constant 0 : index
    %18 = vector.load %arg6[%c0_11, %c0_12] : memref<32x512xbf16, #tpu.memory_space<vmem>>, vector<32x512xbf16>
    tpu.vector_store %arg6[%c0_11, %c0_12], %17 {strides = array<i32>} : memref<32x512xbf16, #tpu.memory_space<vmem>>, vector<32x512xbf16>,
    return
  }
  func.func @transform_0(%arg0: i32) -> (i32, i32) {
    %c0_i32 = arith.constant 0 : i32
    %c0_i32_0 = arith.constant 0 : i32
    %c0_i32_1 = arith.constant 0 : i32
    return %c0_i32, %c0_i32_0 : i32, i32
  }
  func.func @transform_1(%arg0: i32) -> (i32, i32) {
    %c0_i32 = arith.constant 0 : i32
    %c0_i32_0 = arith.constant 0 : i32
    return %c0_i32, %arg0 : i32, i32
  }
  func.func @transform_2(%arg0: i32) -> (i32, i32) {
    %c0_i32 = arith.constant 0 : i32
    %c0_i32_0 = arith.constant 0 : i32
    %c0_i32_1 = arith.constant 0 : i32
    return %c0_i32, %c0_i32_0 : i32, i32
  }
  func.func @transform_3(%arg0: i32) -> (i32, i32) {
    %c0_i32 = arith.constant 0 : i32
    %c0_i32_0 = arith.constant 0 : i32
    %c0_i32_1 = arith.constant 0 : i32
    return %c0_i32, %c0_i32_0 : i32, i32
  }
  func.func @transform_4(%arg0: i32) -> (i32, i32) {
    %c0_i32 = arith.constant 0 : i32
    %c0_i32_0 = arith.constant 0 : i32
    %c0_i32_1 = arith.constant 0 : i32
    return %c0_i32, %c0_i32_0 : i32, i32
  }
  func.func @transform_5(%arg0: i32) -> (i32, i32) {
    %c0_i32 = arith.constant 0 : i32
    %c0_i32_0 = arith.constant 0 : i32
    return %c0_i32, %arg0 : i32, i32
  }
}

module attributes {stable_mosaic.version = 11 : i64} {
  func.func @mm_bias_dual_kernel(%arg0: i32, %arg1: memref<32x304xbf16, #tpu.memory_space<vmem>>, %arg2: memref<304x512xbf16, #tpu.memory_space<vmem>>, %arg3: memref<32x1xf32, #tpu.memory_space<vmem>>, %arg4: memref<32x1xf32, #tpu.memory_space<vmem>>, %arg5: memref<32x1xf32, #tpu.memory_space<vmem>>, %arg6: memref<32x512xbf16, #tpu.memory_space<vmem>>, %arg7: memref<32x512xbf16, #tpu.memory_space<vmem>>) attributes {dimension_semantics = [#tpu.dimension_semantics<parallel>], iteration_bounds = array<i64: 1>, scalar_prefetch = 0 : i64, scratch_operands = 0 : i64, tpu.core_type = #tpu.core_type<tc>, window_params = [{pipeline_mode = #tpu.pipeline_mode<synchronous>, transform_indices = @transform_0, window_bounds = array<i64: 32, 304>}, {transform_indices = @transform_1, window_bounds = array<i64: 304, 512>}, {pipeline_mode = #tpu.pipeline_mode<synchronous>, transform_indices = @transform_2, window_bounds = array<i64: 32, 1>}, {pipeline_mode = #tpu.pipeline_mode<synchronous>, transform_indices = @transform_3, window_bounds = array<i64: 32, 1>}, {pipeline_mode = #tpu.pipeline_mode<synchronous>, transform_indices = @transform_4, window_bounds = array<i64: 32, 1>}, {transform_indices = @transform_5, window_bounds = array<i64: 32, 512>}, {transform_indices = @transform_6, window_bounds = array<i64: 32, 512>}]} {
    %c0 = arith.constant 0 : index
    %c0_0 = arith.constant 0 : index
    %0 = vector.load %arg1[%c0, %c0_0] : memref<32x304xbf16, #tpu.memory_space<vmem>>, vector<32x304xbf16>
    %c0_1 = arith.constant 0 : index
    %c0_2 = arith.constant 0 : index
    %1 = vector.load %arg2[%c0_1, %c0_2] : memref<304x512xbf16, #tpu.memory_space<vmem>>, vector<304x512xbf16>
    %cst = arith.constant dense<0.000000e+00> : vector<32x512xf32>
    %2 = tpu.matmul %0, %1, %cst {dimension_numbers = #tpu.dot_dimension_numbers<[1], [0], [0], [1], [0, 0, 1, 1], [], []>} : vector<32x304xbf16>, vector<304x512xbf16>, vector<32x512xf32> -> vector<32x512xf32>
    %c0_3 = arith.constant 0 : index
    %c0_4 = arith.constant 0 : index
    %3 = vector.load %arg3[%c0_3, %c0_4] : memref<32x1xf32, #tpu.memory_space<vmem>>, vector<32x1xf32>
    %4 = vector.broadcast %3 : vector<32x1xf32> to vector<32x512xf32>
    %5 = arith.addf %2, %4 : vector<32x512xf32>
    %6 = arith.truncf %5 : vector<32x512xf32> to vector<32x512xbf16>
    %c0_5 = arith.constant 0 : index
    %c0_6 = arith.constant 0 : index
    %7 = vector.load %arg6[%c0_5, %c0_6] : memref<32x512xbf16, #tpu.memory_space<vmem>>, vector<32x512xbf16>
    tpu.vector_store %arg6[%c0_5, %c0_6], %6 {strides = array<i32>} : memref<32x512xbf16, #tpu.memory_space<vmem>>, vector<32x512xbf16>,
    %c0_7 = arith.constant 0 : index
    %c0_8 = arith.constant 0 : index
    %8 = vector.load %arg4[%c0_7, %c0_8] : memref<32x1xf32, #tpu.memory_space<vmem>>, vector<32x1xf32>
    %9 = vector.broadcast %8 : vector<32x1xf32> to vector<32x512xf32>
    %10 = arith.mulf %5, %9 : vector<32x512xf32>
    %c0_9 = arith.constant 0 : index
    %c0_10 = arith.constant 0 : index
    %11 = vector.load %arg5[%c0_9, %c0_10] : memref<32x1xf32, #tpu.memory_space<vmem>>, vector<32x1xf32>
    %12 = vector.broadcast %11 : vector<32x1xf32> to vector<32x512xf32>
    %13 = arith.addf %10, %12 : vector<32x512xf32>
    %cst_11 = arith.constant 0.000000e+00 : f32
    %14 = vector.broadcast %cst_11 : f32 to vector<32x512xf32>
    %15 = arith.cmpf oge, %13, %14 : vector<32x512xf32>
    %cst_12 = arith.constant 1.000000e-01 : f32
    %16 = vector.broadcast %cst_12 : f32 to vector<32x512xf32>
    %17 = arith.mulf %16, %13 : vector<32x512xf32>
    %18 = arith.select %15, %13, %17 : vector<32x512xi1>, vector<32x512xf32>
    %19 = arith.truncf %18 : vector<32x512xf32> to vector<32x512xbf16>
    %c0_13 = arith.constant 0 : index
    %c0_14 = arith.constant 0 : index
    %20 = vector.load %arg7[%c0_13, %c0_14] : memref<32x512xbf16, #tpu.memory_space<vmem>>, vector<32x512xbf16>
    tpu.vector_store %arg7[%c0_13, %c0_14], %19 {strides = array<i32>} : memref<32x512xbf16, #tpu.memory_space<vmem>>, vector<32x512xbf16>,
    return
  }
  func.func @transform_0(%arg0: i32) -> (i32, i32) {
    %c0_i32 = arith.constant 0 : i32
    %c0_i32_0 = arith.constant 0 : i32
    %c0_i32_1 = arith.constant 0 : i32
    return %c0_i32, %c0_i32_0 : i32, i32
  }
  func.func @transform_1(%arg0: i32) -> (i32, i32) {
    %c0_i32 = arith.constant 0 : i32
    %c0_i32_0 = arith.constant 0 : i32
    return %c0_i32, %arg0 : i32, i32
  }
  func.func @transform_2(%arg0: i32) -> (i32, i32) {
    %c0_i32 = arith.constant 0 : i32
    %c0_i32_0 = arith.constant 0 : i32
    %c0_i32_1 = arith.constant 0 : i32
    return %c0_i32, %c0_i32_0 : i32, i32
  }
  func.func @transform_3(%arg0: i32) -> (i32, i32) {
    %c0_i32 = arith.constant 0 : i32
    %c0_i32_0 = arith.constant 0 : i32
    %c0_i32_1 = arith.constant 0 : i32
    return %c0_i32, %c0_i32_0 : i32, i32
  }
  func.func @transform_4(%arg0: i32) -> (i32, i32) {
    %c0_i32 = arith.constant 0 : i32
    %c0_i32_0 = arith.constant 0 : i32
    %c0_i32_1 = arith.constant 0 : i32
    return %c0_i32, %c0_i32_0 : i32, i32
  }
  func.func @transform_5(%arg0: i32) -> (i32, i32) {
    %c0_i32 = arith.constant 0 : i32
    %c0_i32_0 = arith.constant 0 : i32
    return %c0_i32, %arg0 : i32, i32
  }
  func.func @transform_6(%arg0: i32) -> (i32, i32) {
    %c0_i32 = arith.constant 0 : i32
    %c0_i32_0 = arith.constant 0 : i32
    return %c0_i32, %arg0 : i32, i32
  }
}

module attributes {stable_mosaic.version = 11 : i64} {
  func.func @mm_bias_bnact_kernel(%arg0: i32, %arg1: memref<64x288xbf16, #tpu.memory_space<vmem>>, %arg2: memref<288x512xbf16, #tpu.memory_space<vmem>>, %arg3: memref<64x1xf32, #tpu.memory_space<vmem>>, %arg4: memref<64x1xf32, #tpu.memory_space<vmem>>, %arg5: memref<64x1xf32, #tpu.memory_space<vmem>>, %arg6: memref<64x512xbf16, #tpu.memory_space<vmem>>) attributes {dimension_semantics = [#tpu.dimension_semantics<parallel>], iteration_bounds = array<i64: 1>, scalar_prefetch = 0 : i64, scratch_operands = 0 : i64, tpu.core_type = #tpu.core_type<tc>, window_params = [{pipeline_mode = #tpu.pipeline_mode<synchronous>, transform_indices = @transform_0, window_bounds = array<i64: 64, 288>}, {transform_indices = @transform_1, window_bounds = array<i64: 288, 512>}, {pipeline_mode = #tpu.pipeline_mode<synchronous>, transform_indices = @transform_2, window_bounds = array<i64: 64, 1>}, {pipeline_mode = #tpu.pipeline_mode<synchronous>, transform_indices = @transform_3, window_bounds = array<i64: 64, 1>}, {pipeline_mode = #tpu.pipeline_mode<synchronous>, transform_indices = @transform_4, window_bounds = array<i64: 64, 1>}, {transform_indices = @transform_5, window_bounds = array<i64: 64, 512>}]} {
    %c0 = arith.constant 0 : index
    %c0_0 = arith.constant 0 : index
    %0 = vector.load %arg1[%c0, %c0_0] : memref<64x288xbf16, #tpu.memory_space<vmem>>, vector<64x288xbf16>
    %c0_1 = arith.constant 0 : index
    %c0_2 = arith.constant 0 : index
    %1 = vector.load %arg2[%c0_1, %c0_2] : memref<288x512xbf16, #tpu.memory_space<vmem>>, vector<288x512xbf16>
    %cst = arith.constant dense<0.000000e+00> : vector<64x512xf32>
    %2 = tpu.matmul %0, %1, %cst {dimension_numbers = #tpu.dot_dimension_numbers<[1], [0], [0], [1], [0, 0, 1, 1], [], []>} : vector<64x288xbf16>, vector<288x512xbf16>, vector<64x512xf32> -> vector<64x512xf32>
    %c0_3 = arith.constant 0 : index
    %c0_4 = arith.constant 0 : index
    %3 = vector.load %arg3[%c0_3, %c0_4] : memref<64x1xf32, #tpu.memory_space<vmem>>, vector<64x1xf32>
    %4 = vector.broadcast %3 : vector<64x1xf32> to vector<64x512xf32>
    %5 = arith.addf %2, %4 : vector<64x512xf32>
    %c0_5 = arith.constant 0 : index
    %c0_6 = arith.constant 0 : index
    %6 = vector.load %arg4[%c0_5, %c0_6] : memref<64x1xf32, #tpu.memory_space<vmem>>, vector<64x1xf32>
    %7 = vector.broadcast %6 : vector<64x1xf32> to vector<64x512xf32>
    %8 = arith.mulf %5, %7 : vector<64x512xf32>
    %c0_7 = arith.constant 0 : index
    %c0_8 = arith.constant 0 : index
    %9 = vector.load %arg5[%c0_7, %c0_8] : memref<64x1xf32, #tpu.memory_space<vmem>>, vector<64x1xf32>
    %10 = vector.broadcast %9 : vector<64x1xf32> to vector<64x512xf32>
    %11 = arith.addf %8, %10 : vector<64x512xf32>
    %cst_9 = arith.constant 0.000000e+00 : f32
    %12 = vector.broadcast %cst_9 : f32 to vector<64x512xf32>
    %13 = arith.cmpf oge, %11, %12 : vector<64x512xf32>
    %cst_10 = arith.constant 1.000000e-01 : f32
    %14 = vector.broadcast %cst_10 : f32 to vector<64x512xf32>
    %15 = arith.mulf %14, %11 : vector<64x512xf32>
    %16 = arith.select %13, %11, %15 : vector<64x512xi1>, vector<64x512xf32>
    %17 = arith.truncf %16 : vector<64x512xf32> to vector<64x512xbf16>
    %c0_11 = arith.constant 0 : index
    %c0_12 = arith.constant 0 : index
    %18 = vector.load %arg6[%c0_11, %c0_12] : memref<64x512xbf16, #tpu.memory_space<vmem>>, vector<64x512xbf16>
    tpu.vector_store %arg6[%c0_11, %c0_12], %17 {strides = array<i32>} : memref<64x512xbf16, #tpu.memory_space<vmem>>, vector<64x512xbf16>,
    return
  }
  func.func @transform_0(%arg0: i32) -> (i32, i32) {
    %c0_i32 = arith.constant 0 : i32
    %c0_i32_0 = arith.constant 0 : i32
    %c0_i32_1 = arith.constant 0 : i32
    return %c0_i32, %c0_i32_0 : i32, i32
  }
  func.func @transform_1(%arg0: i32) -> (i32, i32) {
    %c0_i32 = arith.constant 0 : i32
    %c0_i32_0 = arith.constant 0 : i32
    return %c0_i32, %arg0 : i32, i32
  }
  func.func @transform_2(%arg0: i32) -> (i32, i32) {
    %c0_i32 = arith.constant 0 : i32
    %c0_i32_0 = arith.constant 0 : i32
    %c0_i32_1 = arith.constant 0 : i32
    return %c0_i32, %c0_i32_0 : i32, i32
  }
  func.func @transform_3(%arg0: i32) -> (i32, i32) {
    %c0_i32 = arith.constant 0 : i32
    %c0_i32_0 = arith.constant 0 : i32
    %c0_i32_1 = arith.constant 0 : i32
    return %c0_i32, %c0_i32_0 : i32, i32
  }
  func.func @transform_4(%arg0: i32) -> (i32, i32) {
    %c0_i32 = arith.constant 0 : i32
    %c0_i32_0 = arith.constant 0 : i32
    %c0_i32_1 = arith.constant 0 : i32
    return %c0_i32, %c0_i32_0 : i32, i32
  }
  func.func @transform_5(%arg0: i32) -> (i32, i32) {
    %c0_i32 = arith.constant 0 : i32
    %c0_i32_0 = arith.constant 0 : i32
    return %c0_i32, %arg0 : i32, i32
  }
}

module attributes {stable_mosaic.version = 11 : i64} {
  func.func @mm_bias_dual_kernel(%arg0: i32, %arg1: memref<64x608xbf16, #tpu.memory_space<vmem>>, %arg2: memref<608x128xbf16, #tpu.memory_space<vmem>>, %arg3: memref<64x1xf32, #tpu.memory_space<vmem>>, %arg4: memref<64x1xf32, #tpu.memory_space<vmem>>, %arg5: memref<64x1xf32, #tpu.memory_space<vmem>>, %arg6: memref<64x128xbf16, #tpu.memory_space<vmem>>, %arg7: memref<64x128xbf16, #tpu.memory_space<vmem>>) attributes {dimension_semantics = [#tpu.dimension_semantics<parallel>], iteration_bounds = array<i64: 1>, scalar_prefetch = 0 : i64, scratch_operands = 0 : i64, tpu.core_type = #tpu.core_type<tc>, window_params = [{pipeline_mode = #tpu.pipeline_mode<synchronous>, transform_indices = @transform_0, window_bounds = array<i64: 64, 608>}, {transform_indices = @transform_1, window_bounds = array<i64: 608, 128>}, {pipeline_mode = #tpu.pipeline_mode<synchronous>, transform_indices = @transform_2, window_bounds = array<i64: 64, 1>}, {pipeline_mode = #tpu.pipeline_mode<synchronous>, transform_indices = @transform_3, window_bounds = array<i64: 64, 1>}, {pipeline_mode = #tpu.pipeline_mode<synchronous>, transform_indices = @transform_4, window_bounds = array<i64: 64, 1>}, {transform_indices = @transform_5, window_bounds = array<i64: 64, 128>}, {transform_indices = @transform_6, window_bounds = array<i64: 64, 128>}]} {
    %c0 = arith.constant 0 : index
    %c0_0 = arith.constant 0 : index
    %0 = vector.load %arg1[%c0, %c0_0] : memref<64x608xbf16, #tpu.memory_space<vmem>>, vector<64x608xbf16>
    %c0_1 = arith.constant 0 : index
    %c0_2 = arith.constant 0 : index
    %1 = vector.load %arg2[%c0_1, %c0_2] : memref<608x128xbf16, #tpu.memory_space<vmem>>, vector<608x128xbf16>
    %cst = arith.constant dense<0.000000e+00> : vector<64x128xf32>
    %2 = tpu.matmul %0, %1, %cst {dimension_numbers = #tpu.dot_dimension_numbers<[1], [0], [0], [1], [0, 0, 1, 1], [], []>} : vector<64x608xbf16>, vector<608x128xbf16>, vector<64x128xf32> -> vector<64x128xf32>
    %c0_3 = arith.constant 0 : index
    %c0_4 = arith.constant 0 : index
    %3 = vector.load %arg3[%c0_3, %c0_4] : memref<64x1xf32, #tpu.memory_space<vmem>>, vector<64x1xf32>
    %4 = vector.broadcast %3 : vector<64x1xf32> to vector<64x128xf32>
    %5 = arith.addf %2, %4 : vector<64x128xf32>
    %6 = arith.truncf %5 : vector<64x128xf32> to vector<64x128xbf16>
    %c0_5 = arith.constant 0 : index
    %c0_6 = arith.constant 0 : index
    %7 = vector.load %arg6[%c0_5, %c0_6] : memref<64x128xbf16, #tpu.memory_space<vmem>>, vector<64x128xbf16>
    tpu.vector_store %arg6[%c0_5, %c0_6], %6 {strides = array<i32>} : memref<64x128xbf16, #tpu.memory_space<vmem>>, vector<64x128xbf16>,
    %c0_7 = arith.constant 0 : index
    %c0_8 = arith.constant 0 : index
    %8 = vector.load %arg4[%c0_7, %c0_8] : memref<64x1xf32, #tpu.memory_space<vmem>>, vector<64x1xf32>
    %9 = vector.broadcast %8 : vector<64x1xf32> to vector<64x128xf32>
    %10 = arith.mulf %5, %9 : vector<64x128xf32>
    %c0_9 = arith.constant 0 : index
    %c0_10 = arith.constant 0 : index
    %11 = vector.load %arg5[%c0_9, %c0_10] : memref<64x1xf32, #tpu.memory_space<vmem>>, vector<64x1xf32>
    %12 = vector.broadcast %11 : vector<64x1xf32> to vector<64x128xf32>
    %13 = arith.addf %10, %12 : vector<64x128xf32>
    %cst_11 = arith.constant 0.000000e+00 : f32
    %14 = vector.broadcast %cst_11 : f32 to vector<64x128xf32>
    %15 = arith.cmpf oge, %13, %14 : vector<64x128xf32>
    %cst_12 = arith.constant 1.000000e-01 : f32
    %16 = vector.broadcast %cst_12 : f32 to vector<64x128xf32>
    %17 = arith.mulf %16, %13 : vector<64x128xf32>
    %18 = arith.select %15, %13, %17 : vector<64x128xi1>, vector<64x128xf32>
    %19 = arith.truncf %18 : vector<64x128xf32> to vector<64x128xbf16>
    %c0_13 = arith.constant 0 : index
    %c0_14 = arith.constant 0 : index
    %20 = vector.load %arg7[%c0_13, %c0_14] : memref<64x128xbf16, #tpu.memory_space<vmem>>, vector<64x128xbf16>
    tpu.vector_store %arg7[%c0_13, %c0_14], %19 {strides = array<i32>} : memref<64x128xbf16, #tpu.memory_space<vmem>>, vector<64x128xbf16>,
    return
  }
  func.func @transform_0(%arg0: i32) -> (i32, i32) {
    %c0_i32 = arith.constant 0 : i32
    %c0_i32_0 = arith.constant 0 : i32
    %c0_i32_1 = arith.constant 0 : i32
    return %c0_i32, %c0_i32_0 : i32, i32
  }
  func.func @transform_1(%arg0: i32) -> (i32, i32) {
    %c0_i32 = arith.constant 0 : i32
    %c0_i32_0 = arith.constant 0 : i32
    return %c0_i32, %arg0 : i32, i32
  }
  func.func @transform_2(%arg0: i32) -> (i32, i32) {
    %c0_i32 = arith.constant 0 : i32
    %c0_i32_0 = arith.constant 0 : i32
    %c0_i32_1 = arith.constant 0 : i32
    return %c0_i32, %c0_i32_0 : i32, i32
  }
  func.func @transform_3(%arg0: i32) -> (i32, i32) {
    %c0_i32 = arith.constant 0 : i32
    %c0_i32_0 = arith.constant 0 : i32
    %c0_i32_1 = arith.constant 0 : i32
    return %c0_i32, %c0_i32_0 : i32, i32
  }
  func.func @transform_4(%arg0: i32) -> (i32, i32) {
    %c0_i32 = arith.constant 0 : i32
    %c0_i32_0 = arith.constant 0 : i32
    %c0_i32_1 = arith.constant 0 : i32
    return %c0_i32, %c0_i32_0 : i32, i32
  }
  func.func @transform_5(%arg0: i32) -> (i32, i32) {
    %c0_i32 = arith.constant 0 : i32
    %c0_i32_0 = arith.constant 0 : i32
    return %c0_i32, %arg0 : i32, i32
  }
  func.func @transform_6(%arg0: i32) -> (i32, i32) {
    %c0_i32 = arith.constant 0 : i32
    %c0_i32_0 = arith.constant 0 : i32
    return %c0_i32, %arg0 : i32, i32
  }
}

module attributes {stable_mosaic.version = 11 : i64} {
  func.func @head_kernel(%arg0: memref<64x2x64xbf16, #tpu.memory_space<vmem>>, %arg1: memref<128x64xf32, #tpu.memory_space<vmem>>, %arg2: memref<128x1xf32, #tpu.memory_space<vmem>>, %arg3: memref<128x2xf32, #tpu.memory_space<vmem>>) attributes {dimension_semantics = [], scalar_prefetch = 0 : i64, scratch_operands = 0 : i64, tpu.core_type = #tpu.core_type<tc>} {
    %c0 = arith.constant 0 : index
    %c0_0 = arith.constant 0 : index
    %c0_1 = arith.constant 0 : index
    %0 = vector.load %arg0[%c0, %c0_0, %c0_1] : memref<64x2x64xbf16, #tpu.memory_space<vmem>>, vector<64x2x64xbf16>
    %1 = arith.extf %0 : vector<64x2x64xbf16> to vector<64x2x64xf32>
    %cst = arith.constant dense<0.000000e+00> : vector<64x2xf32>
    %2 = vector.multi_reduction <add>, %1, %cst [2] : vector<64x2x64xf32> to vector<64x2xf32>
    %cst_2 = arith.constant 1.562500e-02 : f32
    %3 = vector.broadcast %cst_2 : f32 to vector<64x2xf32>
    %4 = arith.mulf %2, %3 : vector<64x2xf32>
    %c0_3 = arith.constant 0 : index
    %c0_4 = arith.constant 0 : index
    %5 = vector.load %arg1[%c0_3, %c0_4] : memref<128x64xf32, #tpu.memory_space<vmem>>, vector<128x64xf32>
    %cst_5 = arith.constant dense<0.000000e+00> : vector<128x2xf32>
    %6 = tpu.matmul %5, %4, %cst_5 {dimension_numbers = #tpu.dot_dimension_numbers<[1], [0], [0], [1], [0, 0, 1, 1], [], []>} : vector<128x64xf32>, vector<64x2xf32>, vector<128x2xf32> -> vector<128x2xf32>
    %c0_6 = arith.constant 0 : index
    %c0_7 = arith.constant 0 : index
    %7 = vector.load %arg2[%c0_6, %c0_7] : memref<128x1xf32, #tpu.memory_space<vmem>>, vector<128x1xf32>
    %8 = vector.broadcast %7 : vector<128x1xf32> to vector<128x2xf32>
    %9 = arith.addf %6, %8 : vector<128x2xf32>
    %c0_8 = arith.constant 0 : index
    %c0_9 = arith.constant 0 : index
    %10 = vector.load %arg3[%c0_8, %c0_9] : memref<128x2xf32, #tpu.memory_space<vmem>>, vector<128x2xf32>
    tpu.vector_store %arg3[%c0_8, %c0_9], %9 {strides = array<i32>} : memref<128x2xf32, #tpu.memory_space<vmem>>, vector<128x2xf32>,
    return
  }
}

</mosaic_0001>

<bundles_post_ra>
// kernel: _lambda_.8
= control target key start
LH: loop header
LB: loop body
LE: loop exit
PB: predicated region body
PF: predicated region fallthrough
CT: control target
= control target key end

     0   :  { %s867_s21 = smov 0   ;;  %s869_s22 = smov 0   ;;  %s982_s0 = inlined_call_operand.vmem [shape: bf16[16,32], index: 0, kind: input, shape index: {}]   ;;  %s983_s1 = inlined_call_operand.vmem [shape: bf16[32,2048], index: 1, kind: input, shape index: {}]   ;;  %s984_s2 = inlined_call_operand.vmem [shape: f32[16,1], index: 2, kind: input, shape index: {}]   ;;  %s985_s3 = inlined_call_operand.vmem [shape: f32[16,1], index: 3, kind: input, shape index: {}]   ;;  %s986_s4 = inlined_call_operand.vmem [shape: f32[16,1], index: 4, kind: input, shape index: {}]   ;;  %s987_s5 = inlined_call_operand.vmem [shape: bf16[16,2048], index: 5, kind: output, shape index: {0}]   ;;  %s988_s6 = inlined_call_operand.vmem [shape: bf16[16,2048], index: 6, kind: output, shape index: {1}]  }
   0x1   :  { %s871_s23 = smov 0  }
   0x2 LB: > { %s883_s24 = sadd.s32 4294967295, %s829_s23   ;;  %s886_s25 = sadd.s32 1, %s829_s23   ;;  %s829_s23 = sphi %s871_s23, %s992_s23   ;;  %s825_s22 = sphi %s869_s22, %s991_s22   ;;  %s821_s21 = sphi %s867_s21, %s990_s21  }
   0x3   : > { %s42_s26 = ssub.s32 %s829_s23, %s886_s25  ;;  %s45_s27 = sadd.s32 1, %s825_s22 }
   0x4   : > { %p43_p0 = scmp.eq.s32.totalorder %s42_s26, 0  ;;  %p52_p1 = scmp.ne.s32.totalorder %s825_s22, %s821_s21 }
   0x5   : > { %p53_p2 = scmp.eq.s32.totalorder %s829_s23, 0  ;;  %p145_p3 = scmp.eq.s32.totalorder %s883_s24, 3 }
   0x6   : > { %s896_s28 = scalar_select %p43_p0, %s825_s22, %s45_s27  }
   0x7   : > { %p54_p4 = por %p53_p2, %p52_p1  ;;  %p898_p5 = por %p145_p3, %p52_p1 }
   0x8   : > { %p721_p6 = scmp.ge.s32.totalorder %s829_s23, 4 }
   0xa   : > { %205 = sbr.rel (%p721_p6) target bundleno = 23 (0x17), region = 32 }
   0xf   : > { %208 = sbr.rel (!%p54_p4) target bundleno = 23 (0x17), region = 36  ;;  %s210_s30 = sand.u32 (%p54_p4), 1, %s825_s22  }
  0x10   : > { %s756_s7 = sshll.u32 (%p54_p4), %s829_s23, 4  ;;  %s722_s8 = sshll.u32 (%p54_p4), %s210_s30, 6 }
  0x11   : > { %s215_s11 = scalar_lea.vmem (%p54_p4), %s983_s1, %s756_s7  ;;  %s212_s12 = scalar_lea.vmem (%p54_p4), [#allocation2], %s722_s8 }
  0x12   : > { %v228_v0 = vld [vmem:[%s215_s11] sm:$0xff] (%p54_p4)  ;;  %v230_v1 = vld [vmem:[%s215_s11 + $0x8] sm:$0xff] (%p54_p4) }
  0x13   : > { %v232_v2 = vld [vmem:[%s215_s11 + $0x40] sm:$0xff] (%p54_p4)  ;;  %229 = vst [vmem:[%s212_s12] sm:$0xff] (%p54_p4), %v228_v0  ;;  %231 = vst [vmem:[%s212_s12 + $0x8] sm:$0xff] (%p54_p4), %v230_v1  ;;  %v234_v3 = vld [vmem:[%s215_s11 + $0x48] sm:$0xff] (%p54_p4) }
  0x14   : > { %233 = vst [vmem:[%s212_s12 + $0x10] sm:$0xff] %v232_v2  ;;  %v236_v4 = vld [vmem:[%s215_s11 + $0x80] sm:$0xff]  ;;  %v238_v5 = vld [vmem:[%s215_s11 + $0x88] sm:$0xff]  ;;  %235 = vst [vmem:[%s212_s12 + $0x18] sm:$0xff] %v234_v3 }
  0x15   : > { %237 = vst [vmem:[%s212_s12 + $0x20] sm:$0xff] %v236_v4  ;;  %239 = vst [vmem:[%s212_s12 + $0x28] sm:$0xff] %v238_v5  ;;  %v240_v6 = vld [vmem:[%s215_s11 + $0xc0] sm:$0xff]  ;;  %v242_v7 = vld [vmem:[%s215_s11 + $0xc8] sm:$0xff] }
  0x16   : > { %241 = vst [vmem:[%s212_s12 + $0x30] sm:$0xff] %v240_v6  ;;  %243 = vst [vmem:[%s212_s12 + $0x38] sm:$0xff] %v242_v7 }
  0x17 PF: > { %p725_p7 = scmp.ge.s32.totalorder %s829_s23, 1  ;;  %p248_p8 = scmp.lt.s32.totalorder %s829_s23, 5 }
  0x19   : > { %p249_p9 = pnand %p725_p7, %p248_p8 }
  0x1a   : > { %s255_s13 = sand.u32 (!%p249_p9), 1, %s821_s21  }
  0x1b   : > { %252 = sbr.rel (%p249_p9) target bundleno = 267 (0x10b), region = 59  ;;  %s726_s14 = sshll.u32 (!%p249_p9), %s255_s13, 6 }
  0x1c   : > { %s257_s19 = scalar_lea.vmem (!%p249_p9), [#allocation2], %s726_s14  ;;  %s936_s12 = sshll.u32 (!%p249_p9), %s255_s13, 5 }
  0x1d   : > { %s939_s21 = scalar_lea.vmem (!%p249_p9), [#allocation3], %s936_s12  ;;  %s946_s13 = scalar_lea.vmem (!%p249_p9), [#allocation4], %s936_s12 }
  0x20   : > { %v831_v8 = vmov 0   ;;  %v476_v9 = vld [vmem:[%s985_s3] sm:$0xff]  ;;  %v477_v12 = vld [vmem:[%s985_s3 + $0x8] sm:$0xff]  ;;  %vm358_vm0 = vcmask 261120   ;;  %s765_s14 = sshll.u32 (%p898_p5), %s883_s24, 4 }
  0x21   : > { %394 = vmatprep.mubr.bf16.mxu0 %v831_v8  ;;  %437 = vmatprep.mubr.bf16.mxu1 %v831_v8  ;;  %v301_v10 = vld [vmem:[%s984_s2] sm:$0xff]  ;;  %v796_v13 = vld [vmem:[%s257_s19 + $0x2c] ss:$16 sps:$4 sm:$0xff]   ;;  %v799_v16 = vld [vmem:[%s257_s19 + $0x28] ss:$16 sps:$4 sm:$0xff]   ;;  %s581_s17 = scalar_lea.vmem (%p898_p5), %s987_s5, %s765_s14 }
  0x22   : > { %793 = vset.pattern.permute.xlu1 %v831_v8  ;;  %792 = vset.pattern.permute.xlu0 %v831_v8  ;;  %v794_v11 = vld [vmem:[%s257_s19 + $0x24] ss:$16 sps:$4 sm:$0xff]   ;;  %v302_v14 = vld [vmem:[%s984_s2 + $0x8] sm:$0xff]  ;;  %v798_v15 = vld [vmem:[%s257_s19 + $0x20] ss:$16 sps:$4 sm:$0xff]  }
  0x23   : > { %480 = vperm.xlu1 %793, %v476_v9   ;;  %305 = vperm.xlu0 %792, %v301_v10   ;;  %v800_v17 = vld [vmem:[%s257_s19 + $0x4] ss:$16 sps:$4 sm:$0xff]   ;;  %v802_v18 = vld [vmem:[%s257_s19 + $0xc] ss:$16 sps:$4 sm:$0xff]   ;;  %v804_v19 = vld [vmem:[%s257_s19] ss:$16 sps:$4 sm:$0xff]  }
  0x24   : > { %374 = vmatprep.subr.bf16.mxu0 %v794_v11  ;;  %417 = vmatprep.subr.bf16.mxu1 %v796_v13  ;;  %v805_v20 = vld [vmem:[%s257_s19 + $0x8] ss:$16 sps:$4 sm:$0xff]   ;;  %v806_v22 = vld [vmem:[%s982_s0] sm:$0xff]  }
  0x25   : > { %375 = vmatpush1.bf16.msra.mxu0 %v798_v15  ;;  %418 = vmatpush1.bf16.msra.mxu1 %v799_v16  ;;  %v497_v21 = vld [vmem:[%s986_s4 + $0x8] sm:$0xff]  ;;  %v496_v23 = vld [vmem:[%s986_s4] sm:$0xff] }
  0x26   : > { %376 = vmatprep.subr.bf16.mxu0 %v800_v17  ;;  %419 = vmatprep.subr.bf16.mxu1 %v802_v18 }
  0x27   : > { %485 = vperm.xlu1 %793, %v477_v12   ;;  %310 = vperm.xlu0 %792, %v302_v14  }
  0x29   : > { %377 = vmatpush1.bf16.msra.mxu0 %v804_v19  ;;  %420 = vmatpush1.bf16.msra.mxu1 %v805_v20 }
  0x2b   : > { %505 = vperm.xlu1 %793, %v497_v21   ;;  %500 = vperm.xlu0 %792, %v496_v23  }
  0x2c   : > { %738 = vmatmul.mubr.msk.bf16.vlgmr.msra.gmra.mxu0 %vm358_vm0, %v806_v22  ;;  %739 = vmatmul.mubr.msk.bf16.vlgmr.msra.gmra.mxu1 %vm358_vm0, %v806_v22 }
  0x9e   : > { %v306_v24 = vpop.permute.xlu0 %305  ;;  %v481_v25 = vpop.permute.xlu1 %480 }
  0xa2   : > { %v311_v26 = vpop.permute.xlu0 %310  ;;  %v486_v33 = vpop.permute.xlu1 %485 }
  0xa6   : > { %v501_v36 = vpop.permute.xlu0 %500  ;;  %v506_v61 = vpop.permute.xlu1 %505 }
  0xec   : > { %v396_v27 = vpop.f32.mrf.mxu0  ;;  %v439_v28 = vpop.f32.mrf.mxu1 }
  0xed   : > { %v397_v29 = vadd.f32 %v396_v27, %v306_v24  ;;  %v440_v30 = vadd.f32 %v439_v28, %v306_v24 }
  0xee   : > { %v398_v31 = vpop.f32.mrf.mxu0  ;;  %v441_v32 = vpop.f32.mrf.mxu1 }
  0xef   : > { %v488_v34 = vmul.f32 %v481_v25, %v397_v29  ;;  %v490_v35 = vmul.f32 %v481_v25, %v440_v30  ;;  %v399_v37 = vadd.f32 %v398_v31, %v306_v24  ;;  %v442_v38 = vadd.f32 %v441_v32, %v306_v24 }
  0xf0   : > { %v400_v39 = vpop.f32.mrf.mxu0  ;;  %v443_v40 = vpop.f32.mrf.mxu1 }
  0xf1   : > { %v508_v41 = vadd.f32 %v501_v36, %v488_v34  ;;  %v510_v42 = vadd.f32 %v501_v36, %v490_v35  ;;  %v757_v43 = vpack.c.bf16 %v399_v37, %v397_v29  ;;  %v489_v44 = vmul.f32 %v481_v25, %v399_v37 }
  0xf2   : > { %v758_v45 = vpack.c.bf16 %v442_v38, %v440_v30  ;;  %v491_v46 = vmul.f32 %v481_v25, %v442_v38  ;;  %v401_v47 = vadd.f32 %v400_v39, %v311_v26  ;;  %v444_v48 = vadd.f32 %v443_v40, %v311_v26  ;;  %v402_v49 = vpop.f32.mrf.mxu0  ;;  %v445_v50 = vpop.f32.mrf.mxu1 }
  0xf3   : > { %vm516_vm1 = vcmp.ge.f32.partialorder %v508_v41, 0.0  ;;  %vm518_vm2 = vcmp.ge.f32.partialorder %v510_v42, 0.0  ;;  %v524_v51 = vmul.f32 0.1, %v508_v41  ;;  %v526_v52 = vmul.f32 0.1, %v510_v42  ;;  %472 = vst [vmem:[%s939_s21] sm:$0xff] %v757_v43 }
  0xf4   : > { %v509_v53 = vadd.f32 %v501_v36, %v489_v44  ;;  %473 = vst [vmem:[%s939_s21 + $0x8] sm:$0xff] %v758_v45  ;;  %v511_v54 = vadd.f32 %v501_v36, %v491_v46  ;;  %v492_v55 = vmul.f32 %v486_v33, %v401_v47  ;;  %v494_v56 = vmul.f32 %v486_v33, %v444_v48 }
  0xf5   : > { %v532_v57 = vsel %vm516_vm1, %v508_v41, %v524_v51  ;;  %v534_v58 = vsel %vm518_vm2, %v510_v42, %v526_v52  ;;  %v403_v59 = vadd.f32 %v402_v49, %v311_v26  ;;  %v446_v60 = vadd.f32 %v445_v50, %v311_v26 }
  0xf6   : > { %vm517_vm3 = vcmp.ge.f32.partialorder %v509_v53, 0.0  ;;  %v525_v62 = vmul.f32 0.1, %v509_v53  ;;  %vm519_vm4 = vcmp.ge.f32.partialorder %v511_v54, 0.0  ;;  %v527_v63 = vmul.f32 0.1, %v511_v54 }
  0xf7   : > { %v512_v0 = vadd.f32 %v506_v61, %v492_v55  ;;  %v514_v1 = vadd.f32 %v506_v61, %v494_v56  ;;  %v759_v2 = vpack.c.bf16 %v403_v59, %v401_v47  ;;  %v493_v3 = vmul.f32 %v486_v33, %v403_v59 }
  0xf8   : > { %v533_v4 = vsel %vm517_vm3, %v509_v53, %v525_v62  ;;  %v535_v5 = vsel %vm519_vm4, %v511_v54, %v527_v63  ;;  %v760_v6 = vpack.c.bf16 %v446_v60, %v444_v48  ;;  %v495_v7 = vmul.f32 %v486_v33, %v446_v60 }
  0xf9   : > { %v761_v8 = vpack.c.bf16 %v533_v4, %v532_v57  ;;  %v762_v9 = vpack.c.bf16 %v535_v5, %v534_v58  ;;  %474 = vst [vmem:[%s939_s21 + $0x10] sm:$0xff] %v759_v2  ;;  %v528_v10 = vmul.f32 0.1, %v512_v0  ;;  %v513_v11 = vadd.f32 %v506_v61, %v493_v3 }
  0xfa   : > { %475 = vst [vmem:[%s939_s21 + $0x18] sm:$0xff] %v760_v6  ;;  %v515_v12 = vadd.f32 %v506_v61, %v495_v7  ;;  %vm520_vm5 = vcmp.ge.f32.partialorder %v512_v0, 0.0  ;;  %v530_v13 = vmul.f32 0.1, %v514_v1  ;;  %vm522_vm6 = vcmp.ge.f32.partialorder %v514_v1, 0.0  ;;  %v594_v22 = vld [vmem:[%s939_s21] sm:$0xff] (%p898_p5) }
  0xfb   : > { %564 = vst [vmem:[%s946_s13] sm:$0xff] %v761_v8  ;;  %565 = vst [vmem:[%s946_s13 + $0x8] sm:$0xff] %v762_v9  ;;  %vm521_vm7 = vcmp.ge.f32.partialorder %v513_v11, 0.0  ;;  %v529_v14 = vmul.f32 0.1, %v513_v11  ;;  %v536_v16 = vsel %vm520_vm5, %v512_v0, %v528_v10  ;;  %v596_v23 = vld [vmem:[%s939_s21 + $0x8] sm:$0xff] (%p898_p5) }
  0xfc   : > { %vm523_vm8 = vcmp.ge.f32.partialorder %v515_v12, 0.0  ;;  %v531_v15 = vmul.f32 0.1, %v515_v12  ;;  %v538_v18 = vsel %vm522_vm6, %v514_v1, %v530_v13  ;;  %595 = vst [vmem:[%s581_s17] sm:$0xff] (%p898_p5), %v594_v22  ;;  %597 = vst [vmem:[%s581_s17 + $0x8] sm:$0xff] (%p898_p5), %v596_v23 }
  0xfd   : > { %v537_v17 = vsel %vm521_vm7, %v513_v11, %v529_v14  ;;  %578 = sbr.rel (!%p898_p5) target bundleno = 259 (0x103), region = 67 }
  0xfe   : > { %v763_v19 = vpack.c.bf16 %v537_v17, %v536_v16  ;;  %v539_v20 = vsel %vm523_vm8, %v515_v12, %v531_v15 }
  0xff   : > { %v764_v21 = vpack.c.bf16 %v539_v20, %v538_v18 }
 0x100   : > { %566 = vst [vmem:[%s946_s13 + $0x10] sm:$0xff] %v763_v19  ;;  %v598_v24 = vld [vmem:[%s939_s21 + $0x10] sm:$0xff] (%p898_p5) }
 0x101   : > { %567 = vst [vmem:[%s946_s13 + $0x18] sm:$0xff] %v764_v21  ;;  %v600_v25 = vld [vmem:[%s939_s21 + $0x18] sm:$0xff] (%p898_p5)  ;;  %599 = vst [vmem:[%s581_s17 + $0x40] sm:$0xff] (%p898_p5), %v598_v24 }
 0x102   : > { %601 = vst [vmem:[%s581_s17 + $0x48] sm:$0xff] %v600_v25 }
 0x103 PF: > { %607 = sbr.rel (!%p898_p5) target bundleno = 267 (0x10b), region = 90  ;;  %s766_s18 = sshll.u32 (%p898_p5), %s883_s24, 4  ;;  %v623_v26 = vld [vmem:[%s946_s13] sm:$0xff] (%p898_p5)  ;;  %v625_v27 = vld [vmem:[%s946_s13 + $0x8] sm:$0xff] (%p898_p5) }
 0x104   : > { %s610_s23 = scalar_lea.vmem (%p898_p5), %s988_s6, %s766_s18 }
 0x105   : > { %624 = vst [vmem:[%s610_s23] sm:$0xff] (%p898_p5), %v623_v26  ;;  %626 = vst [vmem:[%s610_s23 + $0x8] sm:$0xff] (%p898_p5), %v625_v27 }
 0x108   : > { %v627_v28 = vld [vmem:[%s946_s13 + $0x10] sm:$0xff] }
 0x109   : > { %v629_v29 = vld [vmem:[%s946_s13 + $0x18] sm:$0xff]  ;;  %628 = vst [vmem:[%s610_s23 + $0x40] sm:$0xff] %v627_v28 }
 0x10a   : > { %630 = vst [vmem:[%s610_s23 + $0x48] sm:$0xff] %v629_v29 }
 0x10b PF: > { %p14_p10 = scmp.ge.s32.totalorder %s886_s25, 6   ;;  %s990_s21 = smov %s825_s22 }
 0x10c   : > { %s991_s22 = smov %s896_s28  ;;  %s992_s23 = smov %s886_s25 }
 0x10d   :  { %16 = sbr.rel (!%p14_p10) target bundleno = 2 (0x2), region = 156 }

// kernel: _lambda_.10
= control target key start
LH: loop header
LB: loop body
LE: loop exit
PB: predicated region body
PF: predicated region fallthrough
CT: control target
= control target key end

     0   :  { %s1290_s24 = smov 0   ;;  %s1292_s25 = smov 0   ;;  %s1537_s0 = inlined_call_operand.vmem [shape: bf16[16,144], index: 0, kind: input, shape index: {}]   ;;  %s1538_s1 = inlined_call_operand.vmem [shape: bf16[144,2048], index: 1, kind: input, shape index: {}]   ;;  %s1539_s2 = inlined_call_operand.vmem [shape: f32[16,1], index: 2, kind: input, shape index: {}]   ;;  %s1540_s3 = inlined_call_operand.vmem [shape: bf16[16,2048], index: 3, kind: input, shape index: {}]   ;;  %s1541_s4 = inlined_call_operand.vmem [shape: f32[16,1], index: 4, kind: input, shape index: {}]   ;;  %s1542_s5 = inlined_call_operand.vmem [shape: f32[16,1], index: 5, kind: input, shape index: {}]   ;;  %s1543_s6 = inlined_call_operand.vmem [shape: bf16[16,2048], index: 6, kind: output, shape index: {0}]   ;;  %s1544_s7 = inlined_call_operand.vmem [shape: bf16[16,2048], index: 7, kind: output, shape index: {1}]  }
   0x1   :  { %s1294_s26 = smov 0  }
   0x2 LB: > { %s1306_s27 = sadd.s32 4294967295, %s1247_s26   ;;  %s1309_s28 = sadd.s32 1, %s1247_s26   ;;  %s1247_s26 = sphi %s1294_s26, %s1549_s26   ;;  %s1243_s25 = sphi %s1292_s25, %s1548_s25   ;;  %s1239_s24 = sphi %s1290_s24, %s1547_s24  }
   0x3   : > { %s43_s29 = ssub.s32 %s1247_s26, %s1309_s28  ;;  %s46_s30 = sadd.s32 1, %s1243_s25 }
   0x4   : > { %p44_p0 = scmp.eq.s32.totalorder %s43_s29, 0  ;;  %p53_p1 = scmp.ne.s32.totalorder %s1243_s25, %s1239_s24 }
   0x5   : > { %p54_p2 = scmp.eq.s32.totalorder %s1247_s26, 0  ;;  %p172_p3 = scmp.eq.s32.totalorder %s1306_s27, 3 }
   0x6   : > { %s1319_s8 = scalar_select %p44_p0, %s1243_s25, %s46_s30  }
   0x7   : > { %p1321_p4 = por %p54_p2, %p53_p1  ;;  %p1325_p5 = por %p172_p3, %p53_p1 }
   0x8   : > { %p1061_p6 = scmp.ge.s32.totalorder %s1247_s26, 4 }
   0xa   : > { %232 = sbr.rel (%p1061_p6) target bundleno = 43 (0x2b), region = 32 }
   0xf   : > { %235 = sbr.rel (!%p1321_p4) target bundleno = 37 (0x25), region = 36  ;;  %s237_s11 = sand.u32 (%p1321_p4), 1, %s1243_s25  }
  0x10   : > { %s1127_s12 = sshll.u32 (%p1321_p4), %s1247_s26, 4  ;;  %s1139_s13 = smul.u32 (%p1321_p4), 288, %s237_s11 }
  0x11   : > { %s1337_s16 = scalar_lea.vmem (%p1321_p4), %s1538_s1, %s1127_s12 }
  0x12   : > { %v255_v0 = vld [vmem:[%s1337_s16] sm:$0xff] (%p1321_p4)  ;;  %v257_v1 = vld [vmem:[%s1337_s16 + $0x8] sm:$0xff] (%p1321_p4)  ;;  %s1345_s17 = scalar_lea.vmem (%p1321_p4), [#allocation2], %s1139_s13 }
  0x13   : > { %v259_v2 = vld [vmem:[%s1337_s16 + $0x40] sm:$0xff] (%p1321_p4)  ;;  %v261_v3 = vld [vmem:[%s1337_s16 + $0x48] sm:$0xff] (%p1321_p4)  ;;  %256 = vst [vmem:[%s1345_s17] sm:$0xff] (%p1321_p4), %v255_v0  ;;  %258 = vst [vmem:[%s1345_s17 + $0x8] sm:$0xff] (%p1321_p4), %v257_v1 }
  0x14   : > { %v263_v4 = vld [vmem:[%s1337_s16 + $0x80] sm:$0xff]  ;;  %v265_v5 = vld [vmem:[%s1337_s16 + $0x88] sm:$0xff]  ;;  %260 = vst [vmem:[%s1345_s17 + $0x10] sm:$0xff] %v259_v2  ;;  %262 = vst [vmem:[%s1345_s17 + $0x18] sm:$0xff] %v261_v3 }
  0x15   : > { %264 = vst [vmem:[%s1345_s17 + $0x20] sm:$0xff] %v263_v4  ;;  %266 = vst [vmem:[%s1345_s17 + $0x28] sm:$0xff] %v265_v5  ;;  %v267_v6 = vld [vmem:[%s1337_s16 + $0xc0] sm:$0xff]  ;;  %v269_v7 = vld [vmem:[%s1337_s16 + $0xc8] sm:$0xff] }
  0x16   : > { %v271_v8 = vld [vmem:[%s1337_s16 + $0x100] sm:$0xff]  ;;  %268 = vst [vmem:[%s1345_s17 + $0x30] sm:$0xff] %v267_v6  ;;  %270 = vst [vmem:[%s1345_s17 + $0x38] sm:$0xff] %v269_v7  ;;  %v273_v9 = vld [vmem:[%s1337_s16 + $0x108] sm:$0xff] }
  0x17   : > { %272 = vst [vmem:[%s1345_s17 + $0x40] sm:$0xff] %v271_v8  ;;  %v275_v10 = vld [vmem:[%s1337_s16 + $0x140] sm:$0xff]  ;;  %v277_v11 = vld [vmem:[%s1337_s16 + $0x148] sm:$0xff]  ;;  %274 = vst [vmem:[%s1345_s17 + $0x48] sm:$0xff] %v273_v9 }
  0x18   : > { %276 = vst [vmem:[%s1345_s17 + $0x50] sm:$0xff] %v275_v10  ;;  %278 = vst [vmem:[%s1345_s17 + $0x58] sm:$0xff] %v277_v11  ;;  %v279_v12 = vld [vmem:[%s1337_s16 + $0x180] sm:$0xff]  ;;  %v281_v13 = vld [vmem:[%s1337_s16 + $0x188] sm:$0xff] }
  0x19   : > { %v283_v14 = vld [vmem:[%s1337_s16 + $0x1c0] sm:$0xff]  ;;  %280 = vst [vmem:[%s1345_s17 + $0x60] sm:$0xff] %v279_v12  ;;  %282 = vst [vmem:[%s1345_s17 + $0x68] sm:$0xff] %v281_v13  ;;  %v285_v15 = vld [vmem:[%s1337_s16 + $0x1c8] sm:$0xff] }
  0x1a   : > { %284 = vst [vmem:[%s1345_s17 + $0x70] sm:$0xff] %v283_v14  ;;  %v287_v16 = vld [vmem:[%s1337_s16 + $0x200] sm:$0xff]  ;;  %v289_v17 = vld [vmem:[%s1337_s16 + $0x208] sm:$0xff]  ;;  %286 = vst [vmem:[%s1345_s17 + $0x78] sm:$0xff] %v285_v15 }
  0x1b   : > { %288 = vst [vmem:[%s1345_s17 + $0x80] sm:$0xff] %v287_v16  ;;  %290 = vst [vmem:[%s1345_s17 + $0x88] sm:$0xff] %v289_v17  ;;  %v291_v18 = vld [vmem:[%s1337_s16 + $0x240] sm:$0xff]  ;;  %v293_v19 = vld [vmem:[%s1337_s16 + $0x248] sm:$0xff] }
  0x1c   : > { %v295_v20 = vld [vmem:[%s1337_s16 + $0x280] sm:$0xff]  ;;  %292 = vst [vmem:[%s1345_s17 + $0x90] sm:$0xff] %v291_v18  ;;  %294 = vst [vmem:[%s1345_s17 + $0x98] sm:$0xff] %v293_v19  ;;  %v297_v21 = vld [vmem:[%s1337_s16 + $0x288] sm:$0xff] }
  0x1d   : > { %296 = vst [vmem:[%s1345_s17 + $0xa0] sm:$0xff] %v295_v20  ;;  %v299_v22 = vld [vmem:[%s1337_s16 + $0x2c0] sm:$0xff]  ;;  %v301_v23 = vld [vmem:[%s1337_s16 + $0x2c8] sm:$0xff]  ;;  %298 = vst [vmem:[%s1345_s17 + $0xa8] sm:$0xff] %v297_v21 }
  0x1e   : > { %300 = vst [vmem:[%s1345_s17 + $0xb0] sm:$0xff] %v299_v22  ;;  %302 = vst [vmem:[%s1345_s17 + $0xb8] sm:$0xff] %v301_v23  ;;  %v303_v24 = vld [vmem:[%s1337_s16 + $0x300] sm:$0xff]  ;;  %v305_v25 = vld [vmem:[%s1337_s16 + $0x308] sm:$0xff] }
  0x1f   : > { %v307_v26 = vld [vmem:[%s1337_s16 + $0x340] sm:$0xff]  ;;  %304 = vst [vmem:[%s1345_s17 + $0xc0] sm:$0xff] %v303_v24  ;;  %306 = vst [vmem:[%s1345_s17 + $0xc8] sm:$0xff] %v305_v25  ;;  %v309_v27 = vld [vmem:[%s1337_s16 + $0x348] sm:$0xff] }
  0x20   : > { %308 = vst [vmem:[%s1345_s17 + $0xd0] sm:$0xff] %v307_v26  ;;  %v311_v28 = vld [vmem:[%s1337_s16 + $0x380] sm:$0xff]  ;;  %v313_v29 = vld [vmem:[%s1337_s16 + $0x388] sm:$0xff]  ;;  %310 = vst [vmem:[%s1345_s17 + $0xd8] sm:$0xff] %v309_v27 }
  0x21   : > { %312 = vst [vmem:[%s1345_s17 + $0xe0] sm:$0xff] %v311_v28  ;;  %314 = vst [vmem:[%s1345_s17 + $0xe8] sm:$0xff] %v313_v29  ;;  %v315_v30 = vld [vmem:[%s1337_s16 + $0x3c0] sm:$0xff]  ;;  %v317_v31 = vld [vmem:[%s1337_s16 + $0x3c8] sm:$0xff] }
  0x22   : > { %v319_v32 = vld [vmem:[%s1337_s16 + $0x400] sm:$0xff]  ;;  %316 = vst [vmem:[%s1345_s17 + $0xf0] sm:$0xff] %v315_v30  ;;  %318 = vst [vmem:[%s1345_s17 + $0xf8] sm:$0xff] %v317_v31  ;;  %v321_v33 = vld [vmem:[%s1337_s16 + $0x408] sm:$0xff] }
  0x23   : > { %320 = vst [vmem:[%s1345_s17 + $0x100] sm:$0xff] %v319_v32  ;;  %v323_v34 = vld [vmem:[%s1337_s16 + $0x440] sm:$0xff]  ;;  %v325_v35 = vld [vmem:[%s1337_s16 + $0x448] sm:$0xff]  ;;  %322 = vst [vmem:[%s1345_s17 + $0x108] sm:$0xff] %v321_v33 }
  0x24   : > { %324 = vst [vmem:[%s1345_s17 + $0x110] sm:$0xff] %v323_v34  ;;  %326 = vst [vmem:[%s1345_s17 + $0x118] sm:$0xff] %v325_v35 }
  0x25 PF: > { %332 = sbr.rel (!%p1321_p4) target bundleno = 43 (0x2b), region = 59  ;;  %s334_s18 = sand.u32 (%p1321_p4), 1, %s1243_s25  }
  0x26   : > { %s1128_s19 = sshll.u32 (%p1321_p4), %s1247_s26, 4  ;;  %s1064_s20 = sshll.u32 (%p1321_p4), %s334_s18, 5 }
  0x27   : > { %s339_s23 = scalar_lea.vmem (%p1321_p4), %s1540_s3, %s1128_s19  ;;  %s336_s29 = scalar_lea.vmem (%p1321_p4), [#allocation3], %s1064_s20 }
  0x28   : > { %v352_v36 = vld [vmem:[%s339_s23] sm:$0xff] (%p1321_p4)  ;;  %v354_v37 = vld [vmem:[%s339_s23 + $0x8] sm:$0xff] (%p1321_p4) }
  0x29   : > { %v356_v38 = vld [vmem:[%s339_s23 + $0x40] sm:$0xff] (%p1321_p4)  ;;  %353 = vst [vmem:[%s336_s29] sm:$0xff] (%p1321_p4), %v352_v36  ;;  %355 = vst [vmem:[%s336_s29 + $0x8] sm:$0xff] (%p1321_p4), %v354_v37  ;;  %v358_v39 = vld [vmem:[%s339_s23 + $0x48] sm:$0xff] (%p1321_p4) }
  0x2a   : > { %357 = vst [vmem:[%s336_s29 + $0x10] sm:$0xff] %v356_v38  ;;  %359 = vst [vmem:[%s336_s29 + $0x18] sm:$0xff] %v358_v39 }
  0x2b PF: > { %p1067_p7 = scmp.ge.s32.totalorder %s1247_s26, 1  ;;  %p364_p8 = scmp.lt.s32.totalorder %s1247_s26, 5 }
  0x2d   : > { %p365_p9 = pnand %p1067_p7, %p364_p8 }
  0x2e   : > { %s371_s30 = sand.u32 (!%p365_p9), 1, %s1239_s24  }
  0x2f   : > { %368 = sbr.rel (%p365_p9) target bundleno = 319 (0x13f), region = 82  ;;  %s1489_s12 = sshll.u32 (!%p365_p9), %s371_s30, 5 }
  0x30   : > { %s1140_s9 = smul.u32 (!%p365_p9), 288, %s371_s30  ;;  %s380_s13 = scalar_lea.vmem (!%p365_p9), [#allocation3], %s1489_s12 }
  0x31   : > { %s1493_s24 = scalar_lea.vmem (!%p365_p9), [#allocation4], %s1489_s12  ;;  %s1499_s30 = scalar_lea.vmem (!%p365_p9), [#allocation5], %s1489_s12 }
  0x32   : > { %s1434_s26 = scalar_lea.vmem (!%p365_p9), [#allocation2], %s1140_s9 }
  0x34   : > { %vm660_vm0 = vcmask 130048   ;;  %v1224_v40 = vld [vmem:[%s1537_s0 + $0x4] ss:$8 sps:$4 sm:$0xff]   ;;  %v1249_v43 = vmov 0   ;;  %v1172_v48 = vld [vmem:[%s1434_s26 + $0xe0] ss:$16 sps:$4 sm:$0xff]  }
  0x35   : > { %v459_v41 = vld [vmem:[%s1539_s2] sm:$0xff]  ;;  %1166 = vset.pattern.permute.xlu0 %v1249_v43  ;;  %1167 = vset.pattern.permute.xlu1 %v1249_v43  ;;  %v460_v45 = vld [vmem:[%s1539_s2 + $0x8] sm:$0xff]  ;;  %v752_v34 = vld [vmem:[%s380_s13 + $0x10] sm:$0xff]  ;;  %s1137_s14 = sshll.u32 (%p1325_p5), %s1306_s27, 4 }
  0x36   : > { %v798_v42 = vld [vmem:[%s1541_s4] sm:$0xff]  ;;  %1109 = vmatprep.mubr.msk.bf16.mxu0 %vm660_vm0, %v1224_v40  ;;  %1110 = vmatprep.mubr.msk.bf16.mxu1 %vm660_vm0, %v1224_v40  ;;  %v1170_v46 = vld [vmem:[%s1434_s26 + $0xec] ss:$16 sps:$4 sm:$0xff]   ;;  %v1173_v49 = vld [vmem:[%s1434_s26 + $0xe8] ss:$16 sps:$4 sm:$0xff]   ;;  %v758_v43 = vunpack.c.l.bf16 %v752_v34 }
  0x37   : > { %v1168_v44 = vld [vmem:[%s1434_s26 + $0xe4] ss:$16 sps:$4 sm:$0xff]   ;;  %463 = vperm.xlu0 %1166, %v459_v41   ;;  %802 = vperm.xlu1 %1167, %v798_v42   ;;  %v799_v47 = vld [vmem:[%s1541_s4 + $0x8] sm:$0xff]  ;;  %v1178_v52 = vld [vmem:[%s1434_s26 + $0xc0] ss:$16 sps:$4 sm:$0xff]  }
  0x38   : > { %664 = vmatprep.subr.bf16.mxu0 %v1168_v44  ;;  %707 = vmatprep.subr.bf16.mxu1 %v1170_v46  ;;  %v1174_v50 = vld [vmem:[%s1434_s26 + $0xc4] ss:$16 sps:$4 sm:$0xff]   ;;  %v1176_v51 = vld [vmem:[%s1434_s26 + $0xcc] ss:$16 sps:$4 sm:$0xff]   ;;  %v1179_v53 = vld [vmem:[%s1434_s26 + $0xc8] ss:$16 sps:$4 sm:$0xff]  }
  0x39   : > { %665 = vmatpush1.bf16.msra.mxu0 %v1172_v48  ;;  %708 = vmatpush1.bf16.msra.mxu1 %v1173_v49  ;;  %v818_v54 = vld [vmem:[%s1542_s5] sm:$0xff]  ;;  %v819_v55 = vld [vmem:[%s1542_s5 + $0x8] sm:$0xff]  ;;  %v753_v35 = vld [vmem:[%s380_s13 + $0x18] sm:$0xff] }
  0x3a   : > { %666 = vmatprep.subr.bf16.mxu0 %v1174_v50  ;;  %709 = vmatprep.subr.bf16.mxu1 %v1176_v51  ;;  %v1180_v56 = vld [vmem:[%s1434_s26 + $0xa4] ss:$16 sps:$4 sm:$0xff]   ;;  %v1182_v57 = vld [vmem:[%s1434_s26 + $0xac] ss:$16 sps:$4 sm:$0xff]   ;;  %v1184_v58 = vld [vmem:[%s1434_s26 + $0xa0] ss:$16 sps:$4 sm:$0xff]  }
  0x3b   : > { %468 = vperm.xlu0 %1166, %v460_v45   ;;  %807 = vperm.xlu1 %1167, %v799_v47   ;;  %v1185_v59 = vld [vmem:[%s1434_s26 + $0xa8] ss:$16 sps:$4 sm:$0xff]   ;;  %v1186_v60 = vld [vmem:[%s1434_s26 + $0x84] ss:$16 sps:$4 sm:$0xff]   ;;  %v1188_v61 = vld [vmem:[%s1434_s26 + $0x8c] ss:$16 sps:$4 sm:$0xff]   ;;  %v760_v45 = vunpack.c.l.bf16 %v753_v35 }
  0x3c   : > { %v1190_v62 = vld [vmem:[%s1434_s26 + $0x80] ss:$16 sps:$4 sm:$0xff]   ;;  %v1191_v63 = vld [vmem:[%s1434_s26 + $0x88] ss:$16 sps:$4 sm:$0xff]   ;;  %v1192_v0 = vld [vmem:[%s1434_s26 + $0x64] ss:$16 sps:$4 sm:$0xff]  }
  0x3d   : > { %667 = vmatpush1.bf16.msra.mxu0 %v1178_v52  ;;  %710 = vmatpush1.bf16.msra.mxu1 %v1179_v53  ;;  %v1194_v1 = vld [vmem:[%s1434_s26 + $0x6c] ss:$16 sps:$4 sm:$0xff]   ;;  %v1196_v2 = vld [vmem:[%s1434_s26 + $0x60] ss:$16 sps:$4 sm:$0xff]   ;;  %v1197_v3 = vld [vmem:[%s1434_s26 + $0x68] ss:$16 sps:$4 sm:$0xff]  }
  0x3e   : > { %668 = vmatprep.subr.bf16.mxu0 %v1180_v56  ;;  %711 = vmatprep.subr.bf16.mxu1 %v1182_v57  ;;  %v1198_v4 = vld [vmem:[%s1434_s26 + $0x44] ss:$16 sps:$4 sm:$0xff]   ;;  %v1200_v5 = vld [vmem:[%s1434_s26 + $0x4c] ss:$16 sps:$4 sm:$0xff]   ;;  %v1202_v6 = vld [vmem:[%s1434_s26 + $0x40] ss:$16 sps:$4 sm:$0xff]  }
  0x3f   : > { %822 = vperm.xlu0 %1166, %v818_v54   ;;  %827 = vperm.xlu1 %1167, %v819_v55   ;;  %v1203_v7 = vld [vmem:[%s1434_s26 + $0x48] ss:$16 sps:$4 sm:$0xff]   ;;  %v1204_v8 = vld [vmem:[%s1434_s26 + $0x24] ss:$16 sps:$4 sm:$0xff]   ;;  %v1206_v9 = vld [vmem:[%s1434_s26 + $0x2c] ss:$16 sps:$4 sm:$0xff]  }
  0x40   : > { %v1208_v10 = vld [vmem:[%s1434_s26 + $0x20] ss:$16 sps:$4 sm:$0xff]   ;;  %v1209_v11 = vld [vmem:[%s1434_s26 + $0x28] ss:$16 sps:$4 sm:$0xff]   ;;  %v1210_v12 = vld [vmem:[%s1434_s26 + $0x4] ss:$16 sps:$4 sm:$0xff]  }
  0x41   : > { %669 = vmatpush1.bf16.msra.mxu0 %v1184_v58  ;;  %712 = vmatpush1.bf16.msra.mxu1 %v1185_v59  ;;  %v1212_v13 = vld [vmem:[%s1434_s26 + $0xc] ss:$16 sps:$4 sm:$0xff]   ;;  %v1214_v14 = vld [vmem:[%s1434_s26] ss:$16 sps:$4 sm:$0xff]   ;;  %v1215_v15 = vld [vmem:[%s1434_s26 + $0x8] ss:$16 sps:$4 sm:$0xff]  }
  0x42   : > { %670 = vmatprep.subr.bf16.mxu0 %v1186_v60  ;;  %713 = vmatprep.subr.bf16.mxu1 %v1188_v61  ;;  %v1216_v16 = vld [vmem:[%s1434_s26 + $0x104] ss:$16 sps:$4 sm:$0xff]   ;;  %v1218_v17 = vld [vmem:[%s1434_s26 + $0x10c] ss:$16 sps:$4 sm:$0xff]   ;;  %v1220_v18 = vld [vmem:[%s1434_s26 + $0x100] ss:$16 sps:$4 sm:$0xff]  }
  0x43   : > { %v1221_v19 = vld [vmem:[%s1434_s26 + $0x108] ss:$16 sps:$4 sm:$0xff]   ;;  %v750_v22 = vld [vmem:[%s380_s13] sm:$0xff]  ;;  %s903_s26 = scalar_lea.vmem (%p1325_p5), %s1543_s6, %s1137_s14 }
  0x44   : > { %v1222_v20 = vld [vmem:[%s1537_s0] ss:$8 sps:$4 sm:$0xff]   ;;  %v754_v25 = vunpack.c.l.bf16 %v750_v22  ;;  %v755_v32 = vunpack.c.h.bf16 %v750_v22 }
  0x45   : > { %671 = vmatpush1.bf16.msra.mxu0 %v1190_v62  ;;  %714 = vmatpush1.bf16.msra.mxu1 %v1191_v63  ;;  %v751_v23 = vld [vmem:[%s380_s13 + $0x8] sm:$0xff] }
  0x46   : > { %672 = vmatprep.subr.bf16.mxu0 %v1192_v0  ;;  %715 = vmatprep.subr.bf16.mxu1 %v1194_v1  ;;  %v756_v26 = vunpack.c.l.bf16 %v751_v23  ;;  %v757_v33 = vunpack.c.h.bf16 %v751_v23  ;;  %v759_v1 = vunpack.c.h.bf16 %v752_v34 }
  0x49   : > { %673 = vmatpush1.bf16.msra.mxu0 %v1196_v2  ;;  %716 = vmatpush1.bf16.msra.mxu1 %v1197_v3  ;;  %v761_v2 = vunpack.c.h.bf16 %v753_v35 }
  0x4a   : > { %674 = vmatprep.subr.bf16.mxu0 %v1198_v4  ;;  %717 = vmatprep.subr.bf16.mxu1 %v1200_v5 }
  0x4d   : > { %675 = vmatpush1.bf16.msra.mxu0 %v1202_v6  ;;  %718 = vmatpush1.bf16.msra.mxu1 %v1203_v7 }
  0x4e   : > { %676 = vmatprep.subr.bf16.mxu0 %v1204_v8  ;;  %719 = vmatprep.subr.bf16.mxu1 %v1206_v9 }
  0x51   : > { %677 = vmatpush1.bf16.msra.mxu0 %v1208_v10  ;;  %720 = vmatpush1.bf16.msra.mxu1 %v1209_v11 }
  0x52   : > { %678 = vmatprep.subr.bf16.mxu0 %v1210_v12  ;;  %721 = vmatprep.subr.bf16.mxu1 %v1212_v13 }
  0x55   : > { %679 = vmatpush1.bf16.msra.mxu0 %v1214_v14  ;;  %722 = vmatpush1.bf16.msra.mxu1 %v1215_v15 }
  0x56   : > { %694 = vmatprep.subr.bf16.mxu0 %v1216_v16  ;;  %737 = vmatprep.subr.bf16.mxu1 %v1218_v17 }
  0x59   : > { %695 = vmatpush2.bf16.msra.mxu0 %v1220_v18  ;;  %738 = vmatpush2.bf16.msra.mxu1 %v1221_v19 }
  0x5c   : > { %697 = vmatmul.mubr.bf16.vlgmr.msra.gmra.mxu0 %v1222_v20  ;;  %740 = vmatmul.mubr.bf16.vlgmr.msra.gmra.mxu1 %v1222_v20 }
  0xb2   : > { %v464_v21 = vpop.permute.xlu0 %463  ;;  %v803_v29 = vpop.permute.xlu1 %802 }
  0xb6   : > { %v469_v24 = vpop.permute.xlu0 %468  ;;  %v808_v53 = vpop.permute.xlu1 %807 }
  0xba   : > { %v823_v50 = vpop.permute.xlu0 %822  ;;  %v828_v13 = vpop.permute.xlu1 %827 }
 0x11c   : > { %v698_v27 = vpop.f32.mrf.mxu0  ;;  %v741_v28 = vpop.f32.mrf.mxu1 }
 0x11d   : > { %v699_v30 = vadd.f32 %v698_v27, %v464_v21  ;;  %v742_v31 = vadd.f32 %v741_v28, %v464_v21 }
 0x11e   : > { %v700_v36 = vpop.f32.mrf.mxu0  ;;  %v743_v37 = vpop.f32.mrf.mxu1 }
 0x11f   : > { %v762_v38 = vadd.f32 %v754_v25, %v699_v30  ;;  %v764_v39 = vadd.f32 %v756_v26, %v742_v31  ;;  %v701_v40 = vadd.f32 %v700_v36, %v464_v21  ;;  %v744_v41 = vadd.f32 %v743_v37, %v464_v21 }
 0x120   : > { %v702_v42 = vpop.f32.mrf.mxu0  ;;  %v745_v44 = vpop.f32.mrf.mxu1 }
 0x121   : > { %v810_v46 = vmul.f32 %v803_v29, %v762_v38  ;;  %v812_v47 = vmul.f32 %v803_v29, %v764_v39  ;;  %v763_v48 = vadd.f32 %v755_v32, %v701_v40  ;;  %v765_v49 = vadd.f32 %v757_v33, %v744_v41 }
 0x122   : > { %v703_v51 = vadd.f32 %v702_v42, %v469_v24  ;;  %v746_v52 = vadd.f32 %v745_v44, %v469_v24  ;;  %v704_v62 = vpop.f32.mrf.mxu0  ;;  %v747_v63 = vpop.f32.mrf.mxu1 }
 0x123   : > { %v830_v54 = vadd.f32 %v823_v50, %v810_v46  ;;  %v832_v55 = vadd.f32 %v823_v50, %v812_v47  ;;  %v1129_v56 = vpack.c.bf16 %v763_v48, %v762_v38  ;;  %v811_v57 = vmul.f32 %v803_v29, %v763_v48 }
 0x124   : > { %v1130_v58 = vpack.c.bf16 %v765_v49, %v764_v39  ;;  %v813_v59 = vmul.f32 %v803_v29, %v765_v49  ;;  %v766_v60 = vadd.f32 %v758_v43, %v703_v51  ;;  %v768_v61 = vadd.f32 %v760_v45, %v746_v52 }
 0x125   : > { %vm838_vm1 = vcmp.ge.f32.partialorder %v830_v54, 0.0  ;;  %v846_v0 = vmul.f32 0.1, %v830_v54  ;;  %794 = vst [vmem:[%s1493_s24] sm:$0xff] %v1129_v56  ;;  %v848_v3 = vmul.f32 0.1, %v832_v55  ;;  %v831_v4 = vadd.f32 %v823_v50, %v811_v57 }
 0x126   : > { %795 = vst [vmem:[%s1493_s24 + $0x8] sm:$0xff] %v1130_v58  ;;  %v833_v5 = vadd.f32 %v823_v50, %v813_v59  ;;  %v814_v6 = vmul.f32 %v808_v53, %v766_v60  ;;  %vm840_vm2 = vcmp.ge.f32.partialorder %v832_v55, 0.0  ;;  %v816_v7 = vmul.f32 %v808_v53, %v768_v61 }
 0x127   : > { %v705_v8 = vadd.f32 %v704_v62, %v469_v24  ;;  %v748_v9 = vadd.f32 %v747_v63, %v469_v24  ;;  %vm839_vm3 = vcmp.ge.f32.partialorder %v831_v4, 0.0  ;;  %v847_v10 = vmul.f32 0.1, %v831_v4 }
 0x128   : > { %vm841_vm4 = vcmp.ge.f32.partialorder %v833_v5, 0.0  ;;  %v849_v11 = vmul.f32 0.1, %v833_v5  ;;  %v854_v12 = vsel %vm838_vm1, %v830_v54, %v846_v0  ;;  %v856_v16 = vsel %vm840_vm2, %v832_v55, %v848_v3 }
 0x129   : > { %v767_v14 = vadd.f32 %v759_v1, %v705_v8  ;;  %v769_v15 = vadd.f32 %v761_v2, %v748_v9  ;;  %v855_v17 = vsel %vm839_vm3, %v831_v4, %v847_v10  ;;  %v834_v19 = vadd.f32 %v828_v13, %v814_v6 }
 0x12a   : > { %v857_v18 = vsel %vm841_vm4, %v833_v5, %v849_v11  ;;  %v1133_v20 = vpack.c.bf16 %v855_v17, %v854_v12  ;;  %v836_v22 = vadd.f32 %v828_v13, %v816_v7 }
 0x12b   : > { %v1134_v21 = vpack.c.bf16 %v857_v18, %v856_v16  ;;  %v1131_v23 = vpack.c.bf16 %v767_v14, %v766_v60  ;;  %v815_v24 = vmul.f32 %v808_v53, %v767_v14  ;;  %v1132_v25 = vpack.c.bf16 %v769_v15, %v768_v61 }
 0x12c   : > { %886 = vst [vmem:[%s1499_s30] sm:$0xff] %v1133_v20  ;;  %v817_v26 = vmul.f32 %v808_v53, %v769_v15  ;;  %v850_v27 = vmul.f32 0.1, %v834_v19  ;;  %vm842_vm5 = vcmp.ge.f32.partialorder %v834_v19, 0.0  ;;  %v852_v29 = vmul.f32 0.1, %v836_v22  ;;  %v916_v39 = vld [vmem:[%s1493_s24] sm:$0xff] (%p1325_p5) }
 0x12d   : > { %887 = vst [vmem:[%s1499_s30 + $0x8] sm:$0xff] %v1134_v21  ;;  %796 = vst [vmem:[%s1493_s24 + $0x10] sm:$0xff] %v1131_v23  ;;  %v835_v28 = vadd.f32 %v828_v13, %v815_v24  ;;  %vm844_vm6 = vcmp.ge.f32.partialorder %v836_v22, 0.0  ;;  %v918_v40 = vld [vmem:[%s1493_s24 + $0x8] sm:$0xff] (%p1325_p5) }
 0x12e   : > { %797 = vst [vmem:[%s1493_s24 + $0x18] sm:$0xff] %v1132_v25  ;;  %v837_v30 = vadd.f32 %v828_v13, %v817_v26  ;;  %v858_v33 = vsel %vm842_vm5, %v834_v19, %v850_v27  ;;  %v860_v35 = vsel %vm844_vm6, %v836_v22, %v852_v29  ;;  %917 = vst [vmem:[%s903_s26] sm:$0xff] (%p1325_p5), %v916_v39 }
 0x12f   : > { %vm843_vm7 = vcmp.ge.f32.partialorder %v835_v28, 0.0  ;;  %v851_v31 = vmul.f32 0.1, %v835_v28  ;;  %919 = vst [vmem:[%s903_s26 + $0x8] sm:$0xff] (%p1325_p5), %v918_v40 }
 0x130   : > { %vm845_vm8 = vcmp.ge.f32.partialorder %v837_v30, 0.0  ;;  %v853_v32 = vmul.f32 0.1, %v837_v30 }
 0x131   : > { %v859_v34 = vsel %vm843_vm7, %v835_v28, %v851_v31  ;;  %900 = sbr.rel (!%p1325_p5) target bundleno = 311 (0x137), region = 94 }
 0x132   : > { %v1135_v36 = vpack.c.bf16 %v859_v34, %v858_v33  ;;  %v861_v37 = vsel %vm845_vm8, %v837_v30, %v853_v32 }
 0x133   : > { %v1136_v38 = vpack.c.bf16 %v861_v37, %v860_v35 }
 0x134   : > { %888 = vst [vmem:[%s1499_s30 + $0x10] sm:$0xff] %v1135_v36  ;;  %v920_v41 = vld [vmem:[%s1493_s24 + $0x10] sm:$0xff] (%p1325_p5) }
 0x135   : > { %889 = vst [vmem:[%s1499_s30 + $0x18] sm:$0xff] %v1136_v38  ;;  %v922_v42 = vld [vmem:[%s1493_s24 + $0x18] sm:$0xff] (%p1325_p5)  ;;  %921 = vst [vmem:[%s903_s26 + $0x40] sm:$0xff] (%p1325_p5), %v920_v41 }
 0x136   : > { %923 = vst [vmem:[%s903_s26 + $0x48] sm:$0xff] %v922_v42 }
 0x137 PF: > { %929 = sbr.rel (!%p1325_p5) target bundleno = 319 (0x13f), region = 117  ;;  %s1138_s17 = sshll.u32 (%p1325_p5), %s1306_s27, 4  ;;  %v945_v43 = vld [vmem:[%s1499_s30] sm:$0xff] (%p1325_p5)  ;;  %v947_v44 = vld [vmem:[%s1499_s30 + $0x8] sm:$0xff] (%p1325_p5) }
 0x138   : > { %s932_s20 = scalar_lea.vmem (%p1325_p5), %s1544_s7, %s1138_s17 }
 0x139   : > { %946 = vst [vmem:[%s932_s20] sm:$0xff] (%p1325_p5), %v945_v43  ;;  %948 = vst [vmem:[%s932_s20 + $0x8] sm:$0xff] (%p1325_p5), %v947_v44 }
 0x13c   : > { %v949_v45 = vld [vmem:[%s1499_s30 + $0x10] sm:$0xff] }
 0x13d   : > { %v951_v46 = vld [vmem:[%s1499_s30 + $0x18] sm:$0xff]  ;;  %950 = vst [vmem:[%s932_s20 + $0x40] sm:$0xff] %v949_v45 }
 0x13e   : > { %952 = vst [vmem:[%s932_s20 + $0x48] sm:$0xff] %v951_v46 }
 0x13f PF: > { %p15_p10 = scmp.ge.s32.totalorder %s1309_s28, 6   ;;  %s1547_s24 = smov %s1243_s25 }
 0x140   : > { %s1548_s25 = smov %s1319_s8  ;;  %s1549_s26 = smov %s1309_s28 }
 0x141   :  { %17 = sbr.rel (!%p15_p10) target bundleno = 2 (0x2), region = 191 }

// kernel: _lambda_.9
= control target key start
LH: loop header
LB: loop body
LE: loop exit
PB: predicated region body
PF: predicated region fallthrough
CT: control target
= control target key end

     0   :  { %s1026_s18 = smov 0   ;;  %s1028_s19 = smov 0   ;;  %s1228_s0 = inlined_call_operand.vmem [shape: bf16[16,144], index: 0, kind: input, shape index: {}]   ;;  %s1229_s1 = inlined_call_operand.vmem [shape: bf16[144,2048], index: 1, kind: input, shape index: {}]   ;;  %s1230_s2 = inlined_call_operand.vmem [shape: f32[16,1], index: 2, kind: input, shape index: {}]   ;;  %s1231_s3 = inlined_call_operand.vmem [shape: f32[16,1], index: 3, kind: input, shape index: {}]   ;;  %s1232_s4 = inlined_call_operand.vmem [shape: f32[16,1], index: 4, kind: input, shape index: {}]   ;;  %s1233_s5 = inlined_call_operand.vmem [shape: bf16[16,2048], index: 5, kind: output, shape index: {}]  }
   0x1   :  { %s1030_s20 = smov 0  }
   0x2 LB: > { %s822_s21 = sadd.s32 4294967295, %s993_s20   ;;  %s1043_s22 = sadd.s32 1, %s993_s20   ;;  %s993_s20 = sphi %s1030_s20, %s1237_s20   ;;  %s989_s19 = sphi %s1028_s19, %s1236_s19   ;;  %s985_s18 = sphi %s1026_s18, %s1235_s18  }
   0x3   : > { %s40_s23 = ssub.s32 %s993_s20, %s1043_s22  ;;  %s43_s24 = sadd.s32 1, %s989_s19 }
   0x4   : > { %p41_p0 = scmp.eq.s32.totalorder %s40_s23, 0  ;;  %p50_p1 = scmp.ne.s32.totalorder %s989_s19, %s985_s18 }
   0x5   : > { %p51_p2 = scmp.eq.s32.totalorder %s993_s20, 0  ;;  %p143_p3 = scmp.eq.s32.totalorder %s822_s21, 3 }
   0x6   : > { %s1054_s25 = scalar_select %p41_p0, %s989_s19, %s43_s24  }
   0x7   : > { %p52_p4 = por %p51_p2, %p50_p1  ;;  %p1056_p5 = por %p143_p3, %p50_p1 }
   0x8   : > { %p825_p6 = scmp.ge.s32.totalorder %s993_s20, 4 }
   0xa   : > { %177 = sbr.rel (%p825_p6) target bundleno = 37 (0x25), region = 32 }
   0xf   : > { %180 = sbr.rel (!%p52_p4) target bundleno = 37 (0x25), region = 36  ;;  %s182_s27 = sand.u32 (%p52_p4), 1, %s989_s19  }
  0x10   : > { %s879_s28 = sshll.u32 (%p52_p4), %s993_s20, 4  ;;  %s885_s29 = smul.u32 (%p52_p4), 288, %s182_s27 }
  0x11   : > { %s1066_s7 = scalar_lea.vmem (%p52_p4), %s1229_s1, %s879_s28 }
  0x12   : > { %v200_v0 = vld [vmem:[%s1066_s7] sm:$0xff] (%p52_p4)  ;;  %v202_v1 = vld [vmem:[%s1066_s7 + $0x8] sm:$0xff] (%p52_p4)  ;;  %s1074_s8 = scalar_lea.vmem (%p52_p4), [#allocation2], %s885_s29 }
  0x13   : > { %v204_v2 = vld [vmem:[%s1066_s7 + $0x40] sm:$0xff] (%p52_p4)  ;;  %v206_v3 = vld [vmem:[%s1066_s7 + $0x48] sm:$0xff] (%p52_p4)  ;;  %201 = vst [vmem:[%s1074_s8] sm:$0xff] (%p52_p4), %v200_v0  ;;  %203 = vst [vmem:[%s1074_s8 + $0x8] sm:$0xff] (%p52_p4), %v202_v1 }
  0x14   : > { %v208_v4 = vld [vmem:[%s1066_s7 + $0x80] sm:$0xff]  ;;  %v210_v5 = vld [vmem:[%s1066_s7 + $0x88] sm:$0xff]  ;;  %205 = vst [vmem:[%s1074_s8 + $0x10] sm:$0xff] %v204_v2  ;;  %207 = vst [vmem:[%s1074_s8 + $0x18] sm:$0xff] %v206_v3 }
  0x15   : > { %209 = vst [vmem:[%s1074_s8 + $0x20] sm:$0xff] %v208_v4  ;;  %211 = vst [vmem:[%s1074_s8 + $0x28] sm:$0xff] %v210_v5  ;;  %v212_v6 = vld [vmem:[%s1066_s7 + $0xc0] sm:$0xff]  ;;  %v214_v7 = vld [vmem:[%s1066_s7 + $0xc8] sm:$0xff] }
  0x16   : > { %v216_v8 = vld [vmem:[%s1066_s7 + $0x100] sm:$0xff]  ;;  %213 = vst [vmem:[%s1074_s8 + $0x30] sm:$0xff] %v212_v6  ;;  %215 = vst [vmem:[%s1074_s8 + $0x38] sm:$0xff] %v214_v7  ;;  %v218_v9 = vld [vmem:[%s1066_s7 + $0x108] sm:$0xff] }
  0x17   : > { %217 = vst [vmem:[%s1074_s8 + $0x40] sm:$0xff] %v216_v8  ;;  %v220_v10 = vld [vmem:[%s1066_s7 + $0x140] sm:$0xff]  ;;  %v222_v11 = vld [vmem:[%s1066_s7 + $0x148] sm:$0xff]  ;;  %219 = vst [vmem:[%s1074_s8 + $0x48] sm:$0xff] %v218_v9 }
  0x18   : > { %221 = vst [vmem:[%s1074_s8 + $0x50] sm:$0xff] %v220_v10  ;;  %223 = vst [vmem:[%s1074_s8 + $0x58] sm:$0xff] %v222_v11  ;;  %v224_v12 = vld [vmem:[%s1066_s7 + $0x180] sm:$0xff]  ;;  %v226_v13 = vld [vmem:[%s1066_s7 + $0x188] sm:$0xff] }
  0x19   : > { %v228_v14 = vld [vmem:[%s1066_s7 + $0x1c0] sm:$0xff]  ;;  %225 = vst [vmem:[%s1074_s8 + $0x60] sm:$0xff] %v224_v12  ;;  %227 = vst [vmem:[%s1074_s8 + $0x68] sm:$0xff] %v226_v13  ;;  %v230_v15 = vld [vmem:[%s1066_s7 + $0x1c8] sm:$0xff] }
  0x1a   : > { %229 = vst [vmem:[%s1074_s8 + $0x70] sm:$0xff] %v228_v14  ;;  %v232_v16 = vld [vmem:[%s1066_s7 + $0x200] sm:$0xff]  ;;  %v234_v17 = vld [vmem:[%s1066_s7 + $0x208] sm:$0xff]  ;;  %231 = vst [vmem:[%s1074_s8 + $0x78] sm:$0xff] %v230_v15 }
  0x1b   : > { %233 = vst [vmem:[%s1074_s8 + $0x80] sm:$0xff] %v232_v16  ;;  %235 = vst [vmem:[%s1074_s8 + $0x88] sm:$0xff] %v234_v17  ;;  %v236_v18 = vld [vmem:[%s1066_s7 + $0x240] sm:$0xff]  ;;  %v238_v19 = vld [vmem:[%s1066_s7 + $0x248] sm:$0xff] }
  0x1c   : > { %v240_v20 = vld [vmem:[%s1066_s7 + $0x280] sm:$0xff]  ;;  %237 = vst [vmem:[%s1074_s8 + $0x90] sm:$0xff] %v236_v18  ;;  %239 = vst [vmem:[%s1074_s8 + $0x98] sm:$0xff] %v238_v19  ;;  %v242_v21 = vld [vmem:[%s1066_s7 + $0x288] sm:$0xff] }
  0x1d   : > { %241 = vst [vmem:[%s1074_s8 + $0xa0] sm:$0xff] %v240_v20  ;;  %v244_v22 = vld [vmem:[%s1066_s7 + $0x2c0] sm:$0xff]  ;;  %v246_v23 = vld [vmem:[%s1066_s7 + $0x2c8] sm:$0xff]  ;;  %243 = vst [vmem:[%s1074_s8 + $0xa8] sm:$0xff] %v242_v21 }
  0x1e   : > { %245 = vst [vmem:[%s1074_s8 + $0xb0] sm:$0xff] %v244_v22  ;;  %247 = vst [vmem:[%s1074_s8 + $0xb8] sm:$0xff] %v246_v23  ;;  %v248_v24 = vld [vmem:[%s1066_s7 + $0x300] sm:$0xff]  ;;  %v250_v25 = vld [vmem:[%s1066_s7 + $0x308] sm:$0xff] }
  0x1f   : > { %v252_v26 = vld [vmem:[%s1066_s7 + $0x340] sm:$0xff]  ;;  %249 = vst [vmem:[%s1074_s8 + $0xc0] sm:$0xff] %v248_v24  ;;  %251 = vst [vmem:[%s1074_s8 + $0xc8] sm:$0xff] %v250_v25  ;;  %v254_v27 = vld [vmem:[%s1066_s7 + $0x348] sm:$0xff] }
  0x20   : > { %253 = vst [vmem:[%s1074_s8 + $0xd0] sm:$0xff] %v252_v26  ;;  %v256_v28 = vld [vmem:[%s1066_s7 + $0x380] sm:$0xff]  ;;  %v258_v29 = vld [vmem:[%s1066_s7 + $0x388] sm:$0xff]  ;;  %255 = vst [vmem:[%s1074_s8 + $0xd8] sm:$0xff] %v254_v27 }
  0x21   : > { %257 = vst [vmem:[%s1074_s8 + $0xe0] sm:$0xff] %v256_v28  ;;  %259 = vst [vmem:[%s1074_s8 + $0xe8] sm:$0xff] %v258_v29  ;;  %v260_v30 = vld [vmem:[%s1066_s7 + $0x3c0] sm:$0xff]  ;;  %v262_v31 = vld [vmem:[%s1066_s7 + $0x3c8] sm:$0xff] }
  0x22   : > { %v264_v32 = vld [vmem:[%s1066_s7 + $0x400] sm:$0xff]  ;;  %261 = vst [vmem:[%s1074_s8 + $0xf0] sm:$0xff] %v260_v30  ;;  %263 = vst [vmem:[%s1074_s8 + $0xf8] sm:$0xff] %v262_v31  ;;  %v266_v33 = vld [vmem:[%s1066_s7 + $0x408] sm:$0xff] }
  0x23   : > { %265 = vst [vmem:[%s1074_s8 + $0x100] sm:$0xff] %v264_v32  ;;  %v268_v34 = vld [vmem:[%s1066_s7 + $0x440] sm:$0xff]  ;;  %v270_v35 = vld [vmem:[%s1066_s7 + $0x448] sm:$0xff]  ;;  %267 = vst [vmem:[%s1074_s8 + $0x108] sm:$0xff] %v266_v33 }
  0x24   : > { %269 = vst [vmem:[%s1074_s8 + $0x110] sm:$0xff] %v268_v34  ;;  %271 = vst [vmem:[%s1074_s8 + $0x118] sm:$0xff] %v270_v35 }
  0x25 PF: > { %p828_p7 = scmp.ge.s32.totalorder %s993_s20, 1  ;;  %p276_p8 = scmp.lt.s32.totalorder %s993_s20, 5 }
  0x27   : > { %p277_p9 = pnand %p828_p7, %p276_p8 }
  0x28   : > { %s283_s9 = sand.u32 (!%p277_p9), 1, %s985_s18  }
  0x29   : > { %280 = sbr.rel (%p277_p9) target bundleno = 308 (0x134), region = 59  ;;  %s829_s11 = sshll.u32 (!%p277_p9), %s283_s9, 5 }
  0x2a   : > { %s886_s10 = smul.u32 (!%p277_p9), 288, %s283_s9  ;;  %s308_s18 = scalar_lea.vmem (!%p277_p9), [#allocation3], %s829_s11 }
  0x2c   : > { %s1156_s17 = scalar_lea.vmem (!%p277_p9), [#allocation2], %s886_s10 }
  0x2e   : > { %vm551_vm0 = vcmask 130048   ;;  %v970_v36 = vld [vmem:[%s1228_s0 + $0x4] ss:$8 sps:$4 sm:$0xff]   ;;  %v995_v39 = vmov 0   ;;  %v918_v44 = vld [vmem:[%s1156_s17 + $0xe0] ss:$16 sps:$4 sm:$0xff]  }
  0x2f   : > { %v641_v37 = vld [vmem:[%s1231_s3] sm:$0xff]  ;;  %913 = vset.pattern.permute.xlu1 %v995_v39  ;;  %912 = vset.pattern.permute.xlu0 %v995_v39  ;;  %v642_v41 = vld [vmem:[%s1231_s3 + $0x8] sm:$0xff]  ;;  %s884_s9 = sshll.u32 (%p1056_p5), %s822_s21, 4 }
  0x30   : > { %v350_v38 = vld [vmem:[%s1230_s2] sm:$0xff]  ;;  %868 = vmatprep.mubr.msk.bf16.mxu0 %vm551_vm0, %v970_v36  ;;  %869 = vmatprep.mubr.msk.bf16.mxu1 %vm551_vm0, %v970_v36  ;;  %v916_v42 = vld [vmem:[%s1156_s17 + $0xec] ss:$16 sps:$4 sm:$0xff]   ;;  %v919_v45 = vld [vmem:[%s1156_s17 + $0xe8] ss:$16 sps:$4 sm:$0xff]   ;;  %s742_s14 = scalar_lea.vmem (%p1056_p5), %s1233_s5, %s884_s9 }
  0x31   : > { %v914_v40 = vld [vmem:[%s1156_s17 + $0xe4] ss:$16 sps:$4 sm:$0xff]   ;;  %645 = vperm.xlu1 %913, %v641_v37   ;;  %354 = vperm.xlu0 %912, %v350_v38   ;;  %v351_v43 = vld [vmem:[%s1230_s2 + $0x8] sm:$0xff]  ;;  %v924_v48 = vld [vmem:[%s1156_s17 + $0xc0] ss:$16 sps:$4 sm:$0xff]  }
  0x32   : > { %555 = vmatprep.subr.bf16.mxu0 %v914_v40  ;;  %598 = vmatprep.subr.bf16.mxu1 %v916_v42  ;;  %v920_v46 = vld [vmem:[%s1156_s17 + $0xc4] ss:$16 sps:$4 sm:$0xff]   ;;  %v922_v47 = vld [vmem:[%s1156_s17 + $0xcc] ss:$16 sps:$4 sm:$0xff]   ;;  %v925_v49 = vld [vmem:[%s1156_s17 + $0xc8] ss:$16 sps:$4 sm:$0xff]  }
  0x33   : > { %556 = vmatpush1.bf16.msra.mxu0 %v918_v44  ;;  %599 = vmatpush1.bf16.msra.mxu1 %v919_v45  ;;  %v662_v50 = vld [vmem:[%s1232_s4 + $0x8] sm:$0xff]  ;;  %v661_v51 = vld [vmem:[%s1232_s4] sm:$0xff] }
  0x34   : > { %557 = vmatprep.subr.bf16.mxu0 %v920_v46  ;;  %600 = vmatprep.subr.bf16.mxu1 %v922_v47  ;;  %v926_v52 = vld [vmem:[%s1156_s17 + $0xa4] ss:$16 sps:$4 sm:$0xff]   ;;  %v928_v53 = vld [vmem:[%s1156_s17 + $0xac] ss:$16 sps:$4 sm:$0xff]   ;;  %v930_v54 = vld [vmem:[%s1156_s17 + $0xa0] ss:$16 sps:$4 sm:$0xff]  }
  0x35   : > { %650 = vperm.xlu1 %913, %v642_v41   ;;  %359 = vperm.xlu0 %912, %v351_v43   ;;  %v931_v55 = vld [vmem:[%s1156_s17 + $0xa8] ss:$16 sps:$4 sm:$0xff]   ;;  %v932_v56 = vld [vmem:[%s1156_s17 + $0x84] ss:$16 sps:$4 sm:$0xff]   ;;  %v934_v57 = vld [vmem:[%s1156_s17 + $0x8c] ss:$16 sps:$4 sm:$0xff]  }
  0x36   : > { %v936_v58 = vld [vmem:[%s1156_s17 + $0x80] ss:$16 sps:$4 sm:$0xff]   ;;  %v937_v59 = vld [vmem:[%s1156_s17 + $0x88] ss:$16 sps:$4 sm:$0xff]   ;;  %v938_v60 = vld [vmem:[%s1156_s17 + $0x64] ss:$16 sps:$4 sm:$0xff]  }
  0x37   : > { %558 = vmatpush1.bf16.msra.mxu0 %v924_v48  ;;  %601 = vmatpush1.bf16.msra.mxu1 %v925_v49  ;;  %v940_v61 = vld [vmem:[%s1156_s17 + $0x6c] ss:$16 sps:$4 sm:$0xff]   ;;  %v942_v62 = vld [vmem:[%s1156_s17 + $0x60] ss:$16 sps:$4 sm:$0xff]   ;;  %v943_v63 = vld [vmem:[%s1156_s17 + $0x68] ss:$16 sps:$4 sm:$0xff]  }
  0x38   : > { %559 = vmatprep.subr.bf16.mxu0 %v926_v52  ;;  %602 = vmatprep.subr.bf16.mxu1 %v928_v53  ;;  %v944_v0 = vld [vmem:[%s1156_s17 + $0x44] ss:$16 sps:$4 sm:$0xff]   ;;  %v946_v1 = vld [vmem:[%s1156_s17 + $0x4c] ss:$16 sps:$4 sm:$0xff]   ;;  %v948_v2 = vld [vmem:[%s1156_s17 + $0x40] ss:$16 sps:$4 sm:$0xff]  }
  0x39   : > { %670 = vperm.xlu1 %913, %v662_v50   ;;  %665 = vperm.xlu0 %912, %v661_v51   ;;  %v949_v3 = vld [vmem:[%s1156_s17 + $0x48] ss:$16 sps:$4 sm:$0xff]   ;;  %v950_v4 = vld [vmem:[%s1156_s17 + $0x24] ss:$16 sps:$4 sm:$0xff]   ;;  %v952_v5 = vld [vmem:[%s1156_s17 + $0x2c] ss:$16 sps:$4 sm:$0xff]  }
  0x3a   : > { %v954_v6 = vld [vmem:[%s1156_s17 + $0x20] ss:$16 sps:$4 sm:$0xff]   ;;  %v955_v7 = vld [vmem:[%s1156_s17 + $0x28] ss:$16 sps:$4 sm:$0xff]   ;;  %v956_v8 = vld [vmem:[%s1156_s17 + $0x4] ss:$16 sps:$4 sm:$0xff]  }
  0x3b   : > { %560 = vmatpush1.bf16.msra.mxu0 %v930_v54  ;;  %603 = vmatpush1.bf16.msra.mxu1 %v931_v55  ;;  %v958_v9 = vld [vmem:[%s1156_s17 + $0xc] ss:$16 sps:$4 sm:$0xff]   ;;  %v960_v10 = vld [vmem:[%s1156_s17] ss:$16 sps:$4 sm:$0xff]   ;;  %v961_v11 = vld [vmem:[%s1156_s17 + $0x8] ss:$16 sps:$4 sm:$0xff]  }
  0x3c   : > { %561 = vmatprep.subr.bf16.mxu0 %v932_v56  ;;  %604 = vmatprep.subr.bf16.mxu1 %v934_v57  ;;  %v962_v12 = vld [vmem:[%s1156_s17 + $0x104] ss:$16 sps:$4 sm:$0xff]   ;;  %v964_v13 = vld [vmem:[%s1156_s17 + $0x10c] ss:$16 sps:$4 sm:$0xff]   ;;  %v966_v14 = vld [vmem:[%s1156_s17 + $0x100] ss:$16 sps:$4 sm:$0xff]  }
  0x3d   : > { %v967_v15 = vld [vmem:[%s1156_s17 + $0x108] ss:$16 sps:$4 sm:$0xff]  }
  0x3e   : > { %v968_v16 = vld [vmem:[%s1228_s0] ss:$8 sps:$4 sm:$0xff]  }
  0x3f   : > { %562 = vmatpush1.bf16.msra.mxu0 %v936_v58  ;;  %605 = vmatpush1.bf16.msra.mxu1 %v937_v59 }
  0x40   : > { %563 = vmatprep.subr.bf16.mxu0 %v938_v60  ;;  %606 = vmatprep.subr.bf16.mxu1 %v940_v61 }
  0x43   : > { %564 = vmatpush1.bf16.msra.mxu0 %v942_v62  ;;  %607 = vmatpush1.bf16.msra.mxu1 %v943_v63 }
  0x44   : > { %565 = vmatprep.subr.bf16.mxu0 %v944_v0  ;;  %608 = vmatprep.subr.bf16.mxu1 %v946_v1 }
  0x47   : > { %566 = vmatpush1.bf16.msra.mxu0 %v948_v2  ;;  %609 = vmatpush1.bf16.msra.mxu1 %v949_v3 }
  0x48   : > { %567 = vmatprep.subr.bf16.mxu0 %v950_v4  ;;  %610 = vmatprep.subr.bf16.mxu1 %v952_v5 }
  0x4b   : > { %568 = vmatpush1.bf16.msra.mxu0 %v954_v6  ;;  %611 = vmatpush1.bf16.msra.mxu1 %v955_v7 }
  0x4c   : > { %569 = vmatprep.subr.bf16.mxu0 %v956_v8  ;;  %612 = vmatprep.subr.bf16.mxu1 %v958_v9 }
  0x4f   : > { %570 = vmatpush1.bf16.msra.mxu0 %v960_v10  ;;  %613 = vmatpush1.bf16.msra.mxu1 %v961_v11 }
  0x50   : > { %585 = vmatprep.subr.bf16.mxu0 %v962_v12  ;;  %628 = vmatprep.subr.bf16.mxu1 %v964_v13 }
  0x53   : > { %586 = vmatpush2.bf16.msra.mxu0 %v966_v14  ;;  %629 = vmatpush2.bf16.msra.mxu1 %v967_v15 }
  0x56   : > { %588 = vmatmul.mubr.bf16.vlgmr.msra.gmra.mxu0 %v968_v16  ;;  %631 = vmatmul.mubr.bf16.vlgmr.msra.gmra.mxu1 %v968_v16 }
  0xac   : > { %v355_v17 = vpop.permute.xlu0 %354  ;;  %v646_v18 = vpop.permute.xlu1 %645 }
  0xb0   : > { %v360_v19 = vpop.permute.xlu0 %359  ;;  %v651_v26 = vpop.permute.xlu1 %650 }
  0xb4   : > { %v666_v29 = vpop.permute.xlu0 %665  ;;  %v671_v50 = vpop.permute.xlu1 %670 }
 0x116   : > { %v589_v20 = vpop.f32.mrf.mxu0  ;;  %v632_v21 = vpop.f32.mrf.mxu1 }
 0x117   : > { %v590_v22 = vadd.f32 %v589_v20, %v355_v17  ;;  %v633_v23 = vadd.f32 %v632_v21, %v355_v17 }
 0x118   : > { %v591_v24 = vpop.f32.mrf.mxu0  ;;  %v634_v25 = vpop.f32.mrf.mxu1 }
 0x119   : > { %v653_v27 = vmul.f32 %v646_v18, %v590_v22  ;;  %v655_v28 = vmul.f32 %v646_v18, %v633_v23  ;;  %v592_v30 = vadd.f32 %v591_v24, %v355_v17  ;;  %v635_v31 = vadd.f32 %v634_v25, %v355_v17 }
 0x11a   : > { %v593_v32 = vpop.f32.mrf.mxu0  ;;  %v636_v33 = vpop.f32.mrf.mxu1 }
 0x11b   : > { %v673_v34 = vadd.f32 %v666_v29, %v653_v27  ;;  %v675_v35 = vadd.f32 %v666_v29, %v655_v28  ;;  %v654_v36 = vmul.f32 %v646_v18, %v592_v30  ;;  %v656_v37 = vmul.f32 %v646_v18, %v635_v31 }
 0x11c   : > { %v594_v38 = vadd.f32 %v593_v32, %v360_v19  ;;  %v637_v39 = vadd.f32 %v636_v33, %v360_v19  ;;  %v595_v40 = vpop.f32.mrf.mxu0  ;;  %v638_v41 = vpop.f32.mrf.mxu1 }
 0x11d   : > { %v689_v42 = vmul.f32 0.1, %v673_v34  ;;  %v691_v43 = vmul.f32 0.1, %v675_v35  ;;  %v674_v44 = vadd.f32 %v666_v29, %v654_v36  ;;  %v676_v45 = vadd.f32 %v666_v29, %v656_v37 }
 0x11e   : > { %v657_v46 = vmul.f32 %v651_v26, %v594_v38  ;;  %v659_v47 = vmul.f32 %v651_v26, %v637_v39  ;;  %vm681_vm1 = vcmp.ge.f32.partialorder %v673_v34, 0.0  ;;  %vm683_vm2 = vcmp.ge.f32.partialorder %v675_v35, 0.0 }
 0x11f   : > { %v596_v48 = vadd.f32 %v595_v40, %v360_v19  ;;  %v639_v49 = vadd.f32 %v638_v41, %v360_v19  ;;  %vm682_vm3 = vcmp.ge.f32.partialorder %v674_v44, 0.0  ;;  %v690_v51 = vmul.f32 0.1, %v674_v44 }
 0x120   : > { %vm684_vm4 = vcmp.ge.f32.partialorder %v676_v45, 0.0  ;;  %v692_v52 = vmul.f32 0.1, %v676_v45  ;;  %v677_v53 = vadd.f32 %v671_v50, %v657_v46  ;;  %v679_v54 = vadd.f32 %v671_v50, %v659_v47 }
 0x121   : > { %v658_v55 = vmul.f32 %v651_v26, %v596_v48  ;;  %v660_v56 = vmul.f32 %v651_v26, %v639_v49  ;;  %v697_v57 = vsel %vm681_vm1, %v673_v34, %v689_v42  ;;  %v699_v58 = vsel %vm683_vm2, %v675_v35, %v691_v43 }
 0x122   : > { %v698_v59 = vsel %vm682_vm3, %v674_v44, %v690_v51  ;;  %v700_v60 = vsel %vm684_vm4, %v676_v45, %v692_v52  ;;  %v693_v63 = vmul.f32 0.1, %v677_v53  ;;  %vm685_vm5 = vcmp.ge.f32.partialorder %v677_v53, 0.0 }
 0x123   : > { %v880_v61 = vpack.c.bf16 %v698_v59, %v697_v57  ;;  %v881_v62 = vpack.c.bf16 %v700_v60, %v699_v58  ;;  %v678_v0 = vadd.f32 %v671_v50, %v658_v55  ;;  %v680_v1 = vadd.f32 %v671_v50, %v660_v56 }
 0x124   : > { %v695_v2 = vmul.f32 0.1, %v679_v54  ;;  %vm687_vm6 = vcmp.ge.f32.partialorder %v679_v54, 0.0  ;;  %v701_v5 = vsel %vm685_vm5, %v677_v53, %v693_v63 }
 0x125   : > { %729 = vst [vmem:[%s308_s18] sm:$0xff] %v880_v61  ;;  %730 = vst [vmem:[%s308_s18 + $0x8] sm:$0xff] %v881_v62  ;;  %vm686_vm7 = vcmp.ge.f32.partialorder %v678_v0, 0.0  ;;  %v694_v3 = vmul.f32 0.1, %v678_v0  ;;  %vm688_vm8 = vcmp.ge.f32.partialorder %v680_v1, 0.0 }
 0x126   : > { %v696_v4 = vmul.f32 0.1, %v680_v1  ;;  %v703_v7 = vsel %vm687_vm6, %v679_v54, %v695_v2 }
 0x127   : > { %v702_v6 = vsel %vm686_vm7, %v678_v0, %v694_v3  ;;  %739 = sbr.rel (!%p1056_p5) target bundleno = 308 (0x134), region = 67 }
 0x128   : > { %v882_v8 = vpack.c.bf16 %v702_v6, %v701_v5  ;;  %v704_v9 = vsel %vm688_vm8, %v680_v1, %v696_v4 }
 0x129   : > { %v883_v10 = vpack.c.bf16 %v704_v9, %v703_v7 }
 0x12a   : > { %731 = vst [vmem:[%s308_s18 + $0x10] sm:$0xff] %v882_v8 }
 0x12b   : > { %732 = vst [vmem:[%s308_s18 + $0x18] sm:$0xff] %v883_v10 }
 0x12c   : > { %v755_v11 = vld [vmem:[%s308_s18] sm:$0xff]  ;;  %v757_v12 = vld [vmem:[%s308_s18 + $0x8] sm:$0xff] }
 0x12d   : > { %756 = vst [vmem:[%s742_s14] sm:$0xff] %v755_v11  ;;  %758 = vst [vmem:[%s742_s14 + $0x8] sm:$0xff] %v757_v12 }
 0x131   : > { %v759_v13 = vld [vmem:[%s308_s18 + $0x10] sm:$0xff] }
 0x132   : > { %v761_v14 = vld [vmem:[%s308_s18 + $0x18] sm:$0xff]  ;;  %760 = vst [vmem:[%s742_s14 + $0x40] sm:$0xff] %v759_v13 }
 0x133   : > { %762 = vst [vmem:[%s742_s14 + $0x48] sm:$0xff] %v761_v14 }
 0x134 PF: > { %p12_p10 = scmp.ge.s32.totalorder %s1043_s22, 6   ;;  %s1235_s18 = smov %s989_s19 }
 0x135   : > { %s1236_s19 = smov %s1054_s25  ;;  %s1237_s20 = smov %s1043_s22 }
 0x136   :  { %14 = sbr.rel (!%p12_p10) target bundleno = 2 (0x2), region = 121 }

// kernel: _lambda_.11
= control target key start
LH: loop header
LB: loop body
LE: loop exit
PB: predicated region body
PF: predicated region fallthrough
CT: control target
= control target key end

     0   :  { %s1187_s18 = smov 0   ;;  %s1189_s19 = smov 0   ;;  %s1460_s0 = inlined_call_operand.vmem [shape: bf16[32,144], index: 0, kind: input, shape index: {}]   ;;  %s1461_s1 = inlined_call_operand.vmem [shape: bf16[144,2048], index: 1, kind: input, shape index: {}]   ;;  %s1462_s2 = inlined_call_operand.vmem [shape: f32[32,1], index: 2, kind: input, shape index: {}]   ;;  %s1463_s3 = inlined_call_operand.vmem [shape: f32[32,1], index: 3, kind: input, shape index: {}]   ;;  %s1464_s4 = inlined_call_operand.vmem [shape: f32[32,1], index: 4, kind: input, shape index: {}]   ;;  %s1465_s5 = inlined_call_operand.vmem [shape: bf16[32,2048], index: 5, kind: output, shape index: {}]  }
   0x1   :  { %s1191_s20 = smov 0  }
   0x2 LB: > { %s968_s21 = sadd.s32 4294967295, %s1154_s20   ;;  %s1204_s22 = sadd.s32 1, %s1154_s20   ;;  %s1154_s20 = sphi %s1191_s20, %s1469_s20   ;;  %s1150_s19 = sphi %s1189_s19, %s1468_s19   ;;  %s1146_s18 = sphi %s1187_s18, %s1467_s18  }
   0x3   : > { %s40_s23 = ssub.s32 %s1154_s20, %s1204_s22  ;;  %s43_s24 = sadd.s32 1, %s1150_s19 }
   0x4   : > { %p41_p0 = scmp.eq.s32.totalorder %s40_s23, 0  ;;  %p50_p1 = scmp.ne.s32.totalorder %s1150_s19, %s1146_s18 }
   0x5   : > { %p51_p2 = scmp.eq.s32.totalorder %s1154_s20, 0  ;;  %p143_p3 = scmp.eq.s32.totalorder %s968_s21, 3 }
   0x6   : > { %s1215_s25 = scalar_select %p41_p0, %s1150_s19, %s43_s24  }
   0x7   : > { %p52_p4 = por %p51_p2, %p50_p1  ;;  %p1217_p5 = por %p143_p3, %p50_p1 }
   0x8   : > { %p971_p6 = scmp.ge.s32.totalorder %s1154_s20, 4 }
   0xa   : > { %177 = sbr.rel (%p971_p6) target bundleno = 37 (0x25), region = 32 }
   0xf   : > { %180 = sbr.rel (!%p52_p4) target bundleno = 37 (0x25), region = 36  ;;  %s182_s27 = sand.u32 (%p52_p4), 1, %s1150_s19  }
  0x10   : > { %s1033_s28 = sshll.u32 (%p52_p4), %s1154_s20, 4  ;;  %s1043_s29 = smul.u32 (%p52_p4), 288, %s182_s27 }
  0x11   : > { %s1227_s7 = scalar_lea.vmem (%p52_p4), %s1461_s1, %s1033_s28 }
  0x12   : > { %v200_v0 = vld [vmem:[%s1227_s7] sm:$0xff] (%p52_p4)  ;;  %v202_v1 = vld [vmem:[%s1227_s7 + $0x8] sm:$0xff] (%p52_p4)  ;;  %s1235_s8 = scalar_lea.vmem (%p52_p4), [#allocation2], %s1043_s29 }
  0x13   : > { %v204_v2 = vld [vmem:[%s1227_s7 + $0x40] sm:$0xff] (%p52_p4)  ;;  %v206_v3 = vld [vmem:[%s1227_s7 + $0x48] sm:$0xff] (%p52_p4)  ;;  %201 = vst [vmem:[%s1235_s8] sm:$0xff] (%p52_p4), %v200_v0  ;;  %203 = vst [vmem:[%s1235_s8 + $0x8] sm:$0xff] (%p52_p4), %v202_v1 }
  0x14   : > { %v208_v4 = vld [vmem:[%s1227_s7 + $0x80] sm:$0xff]  ;;  %v210_v5 = vld [vmem:[%s1227_s7 + $0x88] sm:$0xff]  ;;  %205 = vst [vmem:[%s1235_s8 + $0x10] sm:$0xff] %v204_v2  ;;  %207 = vst [vmem:[%s1235_s8 + $0x18] sm:$0xff] %v206_v3 }
  0x15   : > { %209 = vst [vmem:[%s1235_s8 + $0x20] sm:$0xff] %v208_v4  ;;  %211 = vst [vmem:[%s1235_s8 + $0x28] sm:$0xff] %v210_v5  ;;  %v212_v6 = vld [vmem:[%s1227_s7 + $0xc0] sm:$0xff]  ;;  %v214_v7 = vld [vmem:[%s1227_s7 + $0xc8] sm:$0xff] }
  0x16   : > { %v216_v8 = vld [vmem:[%s1227_s7 + $0x100] sm:$0xff]  ;;  %213 = vst [vmem:[%s1235_s8 + $0x30] sm:$0xff] %v212_v6  ;;  %215 = vst [vmem:[%s1235_s8 + $0x38] sm:$0xff] %v214_v7  ;;  %v218_v9 = vld [vmem:[%s1227_s7 + $0x108] sm:$0xff] }
  0x17   : > { %217 = vst [vmem:[%s1235_s8 + $0x40] sm:$0xff] %v216_v8  ;;  %v220_v10 = vld [vmem:[%s1227_s7 + $0x140] sm:$0xff]  ;;  %v222_v11 = vld [vmem:[%s1227_s7 + $0x148] sm:$0xff]  ;;  %219 = vst [vmem:[%s1235_s8 + $0x48] sm:$0xff] %v218_v9 }
  0x18   : > { %221 = vst [vmem:[%s1235_s8 + $0x50] sm:$0xff] %v220_v10  ;;  %223 = vst [vmem:[%s1235_s8 + $0x58] sm:$0xff] %v222_v11  ;;  %v224_v12 = vld [vmem:[%s1227_s7 + $0x180] sm:$0xff]  ;;  %v226_v13 = vld [vmem:[%s1227_s7 + $0x188] sm:$0xff] }
  0x19   : > { %v228_v14 = vld [vmem:[%s1227_s7 + $0x1c0] sm:$0xff]  ;;  %225 = vst [vmem:[%s1235_s8 + $0x60] sm:$0xff] %v224_v12  ;;  %227 = vst [vmem:[%s1235_s8 + $0x68] sm:$0xff] %v226_v13  ;;  %v230_v15 = vld [vmem:[%s1227_s7 + $0x1c8] sm:$0xff] }
  0x1a   : > { %229 = vst [vmem:[%s1235_s8 + $0x70] sm:$0xff] %v228_v14  ;;  %v232_v16 = vld [vmem:[%s1227_s7 + $0x200] sm:$0xff]  ;;  %v234_v17 = vld [vmem:[%s1227_s7 + $0x208] sm:$0xff]  ;;  %231 = vst [vmem:[%s1235_s8 + $0x78] sm:$0xff] %v230_v15 }
  0x1b   : > { %233 = vst [vmem:[%s1235_s8 + $0x80] sm:$0xff] %v232_v16  ;;  %235 = vst [vmem:[%s1235_s8 + $0x88] sm:$0xff] %v234_v17  ;;  %v236_v18 = vld [vmem:[%s1227_s7 + $0x240] sm:$0xff]  ;;  %v238_v19 = vld [vmem:[%s1227_s7 + $0x248] sm:$0xff] }
  0x1c   : > { %v240_v20 = vld [vmem:[%s1227_s7 + $0x280] sm:$0xff]  ;;  %237 = vst [vmem:[%s1235_s8 + $0x90] sm:$0xff] %v236_v18  ;;  %239 = vst [vmem:[%s1235_s8 + $0x98] sm:$0xff] %v238_v19  ;;  %v242_v21 = vld [vmem:[%s1227_s7 + $0x288] sm:$0xff] }
  0x1d   : > { %241 = vst [vmem:[%s1235_s8 + $0xa0] sm:$0xff] %v240_v20  ;;  %v244_v22 = vld [vmem:[%s1227_s7 + $0x2c0] sm:$0xff]  ;;  %v246_v23 = vld [vmem:[%s1227_s7 + $0x2c8] sm:$0xff]  ;;  %243 = vst [vmem:[%s1235_s8 + $0xa8] sm:$0xff] %v242_v21 }
  0x1e   : > { %245 = vst [vmem:[%s1235_s8 + $0xb0] sm:$0xff] %v244_v22  ;;  %247 = vst [vmem:[%s1235_s8 + $0xb8] sm:$0xff] %v246_v23  ;;  %v248_v24 = vld [vmem:[%s1227_s7 + $0x300] sm:$0xff]  ;;  %v250_v25 = vld [vmem:[%s1227_s7 + $0x308] sm:$0xff] }
  0x1f   : > { %v252_v26 = vld [vmem:[%s1227_s7 + $0x340] sm:$0xff]  ;;  %249 = vst [vmem:[%s1235_s8 + $0xc0] sm:$0xff] %v248_v24  ;;  %251 = vst [vmem:[%s1235_s8 + $0xc8] sm:$0xff] %v250_v25  ;;  %v254_v27 = vld [vmem:[%s1227_s7 + $0x348] sm:$0xff] }
  0x20   : > { %253 = vst [vmem:[%s1235_s8 + $0xd0] sm:$0xff] %v252_v26  ;;  %v256_v28 = vld [vmem:[%s1227_s7 + $0x380] sm:$0xff]  ;;  %v258_v29 = vld [vmem:[%s1227_s7 + $0x388] sm:$0xff]  ;;  %255 = vst [vmem:[%s1235_s8 + $0xd8] sm:$0xff] %v254_v27 }
  0x21   : > { %257 = vst [vmem:[%s1235_s8 + $0xe0] sm:$0xff] %v256_v28  ;;  %259 = vst [vmem:[%s1235_s8 + $0xe8] sm:$0xff] %v258_v29  ;;  %v260_v30 = vld [vmem:[%s1227_s7 + $0x3c0] sm:$0xff]  ;;  %v262_v31 = vld [vmem:[%s1227_s7 + $0x3c8] sm:$0xff] }
  0x22   : > { %v264_v32 = vld [vmem:[%s1227_s7 + $0x400] sm:$0xff]  ;;  %261 = vst [vmem:[%s1235_s8 + $0xf0] sm:$0xff] %v260_v30  ;;  %263 = vst [vmem:[%s1235_s8 + $0xf8] sm:$0xff] %v262_v31  ;;  %v266_v33 = vld [vmem:[%s1227_s7 + $0x408] sm:$0xff] }
  0x23   : > { %265 = vst [vmem:[%s1235_s8 + $0x100] sm:$0xff] %v264_v32  ;;  %v268_v34 = vld [vmem:[%s1227_s7 + $0x440] sm:$0xff]  ;;  %v270_v35 = vld [vmem:[%s1227_s7 + $0x448] sm:$0xff]  ;;  %267 = vst [vmem:[%s1235_s8 + $0x108] sm:$0xff] %v266_v33 }
  0x24   : > { %269 = vst [vmem:[%s1235_s8 + $0x110] sm:$0xff] %v268_v34  ;;  %271 = vst [vmem:[%s1235_s8 + $0x118] sm:$0xff] %v270_v35 }
  0x25 PF: > { %p974_p7 = scmp.ge.s32.totalorder %s1154_s20, 1  ;;  %p276_p8 = scmp.lt.s32.totalorder %s1154_s20, 5 }
  0x27   : > { %p277_p9 = pnand %p974_p7, %p276_p8 }
  0x28   : > { %s283_s9 = sand.u32 (!%p277_p9), 1, %s1146_s18  }
  0x29   : > { %280 = sbr.rel (%p277_p9) target bundleno = 321 (0x141), region = 59 }
  0x2a   : > { %s1044_s10 = smul.u32 (!%p277_p9), 288, %s283_s9 }
  0x2c   : > { %s1319_s17 = scalar_lea.vmem (!%p277_p9), [#allocation2], %s1044_s10  ;;  %s975_s10 = sshll.u32 (!%p277_p9), %s283_s9, 6 }
  0x2d   : > { %s1410_s18 = scalar_lea.vmem (!%p277_p9), [#allocation3], %s975_s10 }
  0x2e   : > { %vm574_vm0 = vcmask 130048   ;;  %v1128_v36 = vld [vmem:[%s1460_s0 + $0x4] ss:$8 sps:$4 sm:$0xff]   ;;  %v1156_v37 = vmov 0   ;;  %v354_v38 = vld [vmem:[%s1462_s2 + $0x10] sm:$0xff]  ;;  %v355_v41 = vld [vmem:[%s1462_s2 + $0x18] sm:$0xff] }
  0x2f   : > { %1071 = vset.pattern.permute.xlu1 %v1156_v37  ;;  %1070 = vset.pattern.permute.xlu0 %v1156_v37  ;;  %v352_v39 = vld [vmem:[%s1462_s2] sm:$0xff]  ;;  %v1074_v42 = vld [vmem:[%s1319_s17 + $0xec] ss:$16 sps:$4 sm:$0xff]   ;;  %v1077_v45 = vld [vmem:[%s1319_s17 + $0xe8] ss:$16 sps:$4 sm:$0xff]   ;;  %s1042_s9 = sshll.u32 (%p1217_p5), %s968_s21, 4 }
  0x30   : > { %1016 = vmatprep.mubr.msk.bf16.mxu0 %vm574_vm0, %v1128_v36  ;;  %1018 = vmatprep.mubr.msk.bf16.mxu1 %vm574_vm0, %v1128_v36  ;;  %v1072_v40 = vld [vmem:[%s1319_s17 + $0xe4] ss:$16 sps:$4 sm:$0xff]   ;;  %v353_v43 = vld [vmem:[%s1462_s2 + $0x8] sm:$0xff]  ;;  %v1076_v44 = vld [vmem:[%s1319_s17 + $0xe0] ss:$16 sps:$4 sm:$0xff]   ;;  %s880_s13 = scalar_lea.vmem (%p1217_p5), %s1465_s5, %s1042_s9 }
  0x31   : > { %368 = vperm.xlu1 %1071, %v354_v38   ;;  %358 = vperm.xlu0 %1070, %v352_v39   ;;  %v1078_v46 = vld [vmem:[%s1319_s17 + $0xc4] ss:$16 sps:$4 sm:$0xff]   ;;  %v1080_v47 = vld [vmem:[%s1319_s17 + $0xcc] ss:$16 sps:$4 sm:$0xff]   ;;  %v1082_v48 = vld [vmem:[%s1319_s17 + $0xc0] ss:$16 sps:$4 sm:$0xff]  }
  0x32   : > { %581 = vmatprep.subr.bf16.mxu0 %v1072_v40  ;;  %634 = vmatprep.subr.bf16.mxu1 %v1074_v42  ;;  %v1083_v49 = vld [vmem:[%s1319_s17 + $0xc8] ss:$16 sps:$4 sm:$0xff]   ;;  %v1084_v50 = vld [vmem:[%s1319_s17 + $0xa4] ss:$16 sps:$4 sm:$0xff]   ;;  %v1086_v51 = vld [vmem:[%s1319_s17 + $0xac] ss:$16 sps:$4 sm:$0xff]  }
  0x33   : > { %582 = vmatpush1.bf16.msra.mxu0 %v1076_v44  ;;  %635 = vmatpush1.bf16.msra.mxu1 %v1077_v45  ;;  %v1088_v52 = vld [vmem:[%s1319_s17 + $0xa0] ss:$16 sps:$4 sm:$0xff]   ;;  %v1089_v53 = vld [vmem:[%s1319_s17 + $0xa8] ss:$16 sps:$4 sm:$0xff]   ;;  %v1090_v54 = vld [vmem:[%s1319_s17 + $0x84] ss:$16 sps:$4 sm:$0xff]  }
  0x34   : > { %583 = vmatprep.subr.bf16.mxu0 %v1078_v46  ;;  %636 = vmatprep.subr.bf16.mxu1 %v1080_v47  ;;  %v1092_v55 = vld [vmem:[%s1319_s17 + $0x8c] ss:$16 sps:$4 sm:$0xff]   ;;  %v1094_v56 = vld [vmem:[%s1319_s17 + $0x80] ss:$16 sps:$4 sm:$0xff]   ;;  %v1095_v57 = vld [vmem:[%s1319_s17 + $0x88] ss:$16 sps:$4 sm:$0xff]  }
  0x35   : > { %373 = vperm.xlu1 %1071, %v355_v41   ;;  %363 = vperm.xlu0 %1070, %v353_v43   ;;  %v1096_v58 = vld [vmem:[%s1319_s17 + $0x64] ss:$16 sps:$4 sm:$0xff]   ;;  %v1098_v59 = vld [vmem:[%s1319_s17 + $0x6c] ss:$16 sps:$4 sm:$0xff]   ;;  %v1100_v60 = vld [vmem:[%s1319_s17 + $0x60] ss:$16 sps:$4 sm:$0xff]  }
  0x36   : > { %v1101_v61 = vld [vmem:[%s1319_s17 + $0x68] ss:$16 sps:$4 sm:$0xff]   ;;  %v1102_v62 = vld [vmem:[%s1319_s17 + $0x44] ss:$16 sps:$4 sm:$0xff]   ;;  %v1104_v63 = vld [vmem:[%s1319_s17 + $0x4c] ss:$16 sps:$4 sm:$0xff]  }
  0x37   : > { %584 = vmatpush1.bf16.msra.mxu0 %v1082_v48  ;;  %637 = vmatpush1.bf16.msra.mxu1 %v1083_v49  ;;  %v1106_v0 = vld [vmem:[%s1319_s17 + $0x40] ss:$16 sps:$4 sm:$0xff]   ;;  %v1107_v1 = vld [vmem:[%s1319_s17 + $0x48] ss:$16 sps:$4 sm:$0xff]   ;;  %v1108_v2 = vld [vmem:[%s1319_s17 + $0x24] ss:$16 sps:$4 sm:$0xff]  }
  0x38   : > { %585 = vmatprep.subr.bf16.mxu0 %v1084_v50  ;;  %638 = vmatprep.subr.bf16.mxu1 %v1086_v51  ;;  %v1110_v3 = vld [vmem:[%s1319_s17 + $0x2c] ss:$16 sps:$4 sm:$0xff]   ;;  %v1112_v4 = vld [vmem:[%s1319_s17 + $0x20] ss:$16 sps:$4 sm:$0xff]   ;;  %v1113_v5 = vld [vmem:[%s1319_s17 + $0x28] ss:$16 sps:$4 sm:$0xff]  }
  0x39   : > { %v688_v6 = vld [vmem:[%s1463_s3 + $0x8] sm:$0xff]  ;;  %v687_v7 = vld [vmem:[%s1463_s3] sm:$0xff]  ;;  %v690_v10 = vld [vmem:[%s1463_s3 + $0x18] sm:$0xff] }
  0x3a   : > { %v1114_v8 = vld [vmem:[%s1319_s17 + $0x4] ss:$16 sps:$4 sm:$0xff]   ;;  %v1116_v9 = vld [vmem:[%s1319_s17 + $0xc] ss:$16 sps:$4 sm:$0xff]   ;;  %698 = vperm.xlu1 %1071, %v688_v6   ;;  %693 = vperm.xlu0 %1070, %v687_v7   ;;  %v1118_v12 = vld [vmem:[%s1319_s17] ss:$16 sps:$4 sm:$0xff]  }
  0x3b   : > { %586 = vmatpush1.bf16.msra.mxu0 %v1088_v52  ;;  %639 = vmatpush1.bf16.msra.mxu1 %v1089_v53  ;;  %v689_v11 = vld [vmem:[%s1463_s3 + $0x10] sm:$0xff]  ;;  %v1119_v13 = vld [vmem:[%s1319_s17 + $0x8] ss:$16 sps:$4 sm:$0xff]   ;;  %v1122_v15 = vld [vmem:[%s1319_s17 + $0x10c] ss:$16 sps:$4 sm:$0xff]  }
  0x3c   : > { %587 = vmatprep.subr.bf16.mxu0 %v1090_v54  ;;  %640 = vmatprep.subr.bf16.mxu1 %v1092_v55  ;;  %v1120_v14 = vld [vmem:[%s1319_s17 + $0x104] ss:$16 sps:$4 sm:$0xff]   ;;  %v728_v16 = vld [vmem:[%s1464_s4 + $0x8] sm:$0xff]  ;;  %v1124_v18 = vld [vmem:[%s1319_s17 + $0x100] ss:$16 sps:$4 sm:$0xff]  }
  0x3d   : > { %v727_v17 = vld [vmem:[%s1464_s4] sm:$0xff]  ;;  %v1125_v19 = vld [vmem:[%s1319_s17 + $0x108] ss:$16 sps:$4 sm:$0xff]   ;;  %v729_v22 = vld [vmem:[%s1464_s4 + $0x10] sm:$0xff] }
  0x3e   : > { %708 = vperm.xlu1 %1071, %v690_v10   ;;  %703 = vperm.xlu0 %1070, %v689_v11   ;;  %v1126_v20 = vld [vmem:[%s1460_s0] ss:$8 sps:$4 sm:$0xff]   ;;  %v730_v21 = vld [vmem:[%s1464_s4 + $0x18] sm:$0xff] }
  0x3f   : > { %588 = vmatpush1.bf16.msra.mxu0 %v1094_v56  ;;  %641 = vmatpush1.bf16.msra.mxu1 %v1095_v57  ;;  %v1129_v23 = vld [vmem:[%s1460_s0 + $0x14] ss:$8 sps:$4 sm:$0xff]   ;;  %v1131_v24 = vld [vmem:[%s1460_s0 + $0x10] ss:$8 sps:$4 sm:$0xff]  }
  0x40   : > { %589 = vmatprep.subr.bf16.mxu0 %v1096_v58  ;;  %642 = vmatprep.subr.bf16.mxu1 %v1098_v59 }
  0x42   : > { %738 = vperm.xlu1 %1071, %v728_v16   ;;  %733 = vperm.xlu0 %1070, %v727_v17  }
  0x43   : > { %590 = vmatpush1.bf16.msra.mxu0 %v1100_v60  ;;  %643 = vmatpush1.bf16.msra.mxu1 %v1101_v61 }
  0x44   : > { %591 = vmatprep.subr.bf16.mxu0 %v1102_v62  ;;  %644 = vmatprep.subr.bf16.mxu1 %v1104_v63 }
  0x46   : > { %748 = vperm.xlu1 %1071, %v730_v21   ;;  %743 = vperm.xlu0 %1070, %v729_v22  }
  0x47   : > { %592 = vmatpush1.bf16.msra.mxu0 %v1106_v0  ;;  %645 = vmatpush1.bf16.msra.mxu1 %v1107_v1 }
  0x48   : > { %593 = vmatprep.subr.bf16.mxu0 %v1108_v2  ;;  %646 = vmatprep.subr.bf16.mxu1 %v1110_v3 }
  0x4b   : > { %594 = vmatpush1.bf16.msra.mxu0 %v1112_v4  ;;  %647 = vmatpush1.bf16.msra.mxu1 %v1113_v5 }
  0x4c   : > { %595 = vmatprep.subr.bf16.mxu0 %v1114_v8  ;;  %648 = vmatprep.subr.bf16.mxu1 %v1116_v9 }
  0x4f   : > { %596 = vmatpush1.bf16.msra.mxu0 %v1118_v12  ;;  %649 = vmatpush1.bf16.msra.mxu1 %v1119_v13 }
  0x50   : > { %611 = vmatprep.subr.bf16.mxu0 %v1120_v14  ;;  %664 = vmatprep.subr.bf16.mxu1 %v1122_v15 }
  0x53   : > { %612 = vmatpush2.bf16.msra.mxu0 %v1124_v18  ;;  %665 = vmatpush2.bf16.msra.mxu1 %v1125_v19 }
  0x56   : > { %614 = vmatmul.mubr.bf16.vlgmr.msra.gmra.mxu0 %v1126_v20  ;;  %667 = vmatmul.mubr.bf16.vlgmr.msra.gmra.mxu1 %v1126_v20 }
  0x57   : > { %1017 = vmatprep.mubr.msk.bf16.mxu0 %vm574_vm0, %v1129_v23  ;;  %1019 = vmatprep.mubr.msk.bf16.mxu1 %vm574_vm0, %v1129_v23 }
  0x5e   : > { %624 = vmatmul.mubr.bf16.gmra.mxu0 %v1131_v24  ;;  %677 = vmatmul.mubr.bf16.gmra.mxu1 %v1131_v24 }
  0xac   : > { %v359_v25 = vpop.permute.xlu0 %358  ;;  %v1398_v26 = vpop.permute.xlu1 %368 }
  0xb0   : > { %v364_v27 = vpop.permute.xlu0 %363  ;;  %v1400_v28 = vpop.permute.xlu1 %373 }
  0xb5   : > { %v694_v29 = vpop.permute.xlu0 %693  ;;  %v699_v30 = vpop.permute.xlu1 %698 }
  0xb9   : > { %v1402_v31 = vpop.permute.xlu0 %703  ;;  %v1404_v38 = vpop.permute.xlu1 %708 }
  0xbd   : > { %v734_v39 = vpop.permute.xlu0 %733  ;;  %v739_v2 = vpop.permute.xlu1 %738 }
 0x116   : > { %v615_v32 = vpop.f32.mrf.mxu0  ;;  %v668_v33 = vpop.f32.mrf.mxu1 }
 0x117   : > { %v616_v34 = vadd.f32 %v615_v32, %v359_v25  ;;  %v669_v35 = vadd.f32 %v668_v33, %v359_v25 }
 0x118   : > { %v617_v36 = vpop.f32.mrf.mxu0  ;;  %v670_v37 = vpop.f32.mrf.mxu1 }
 0x119   : > { %v711_v40 = vmul.f32 %v694_v29, %v616_v34  ;;  %v713_v41 = vmul.f32 %v694_v29, %v669_v35  ;;  %v618_v42 = vadd.f32 %v617_v36, %v359_v25  ;;  %v671_v43 = vadd.f32 %v670_v37, %v359_v25 }
 0x11a   : > { %v619_v44 = vpop.f32.mrf.mxu0  ;;  %v672_v45 = vpop.f32.mrf.mxu1 }
 0x11b   : > { %v751_v46 = vadd.f32 %v734_v39, %v711_v40  ;;  %v753_v47 = vadd.f32 %v734_v39, %v713_v41  ;;  %v712_v48 = vmul.f32 %v694_v29, %v618_v42  ;;  %v714_v49 = vmul.f32 %v694_v29, %v671_v43 }
 0x11c   : > { %v620_v50 = vadd.f32 %v619_v44, %v364_v27  ;;  %v673_v51 = vadd.f32 %v672_v45, %v364_v27  ;;  %v621_v52 = vpop.f32.mrf.mxu0  ;;  %v674_v53 = vpop.f32.mrf.mxu1 }
 0x11d   : > { %vm767_vm1 = vcmp.ge.f32.partialorder %v751_v46, 0.0  ;;  %v783_v54 = vmul.f32 0.1, %v751_v46  ;;  %vm769_vm2 = vcmp.ge.f32.partialorder %v753_v47, 0.0  ;;  %v785_v55 = vmul.f32 0.1, %v753_v47 }
 0x11e   : > { %v752_v56 = vadd.f32 %v734_v39, %v712_v48  ;;  %v754_v57 = vadd.f32 %v734_v39, %v714_v49  ;;  %v715_v58 = vmul.f32 %v699_v30, %v620_v50  ;;  %v717_v59 = vmul.f32 %v699_v30, %v673_v51  ;;  %v625_v60 = vpop.f32.mrf.mxu0  ;;  %v678_v61 = vpop.f32.mrf.mxu1 }
 0x11f   : > { %v799_v62 = vsel %vm767_vm1, %v751_v46, %v783_v54  ;;  %v801_v63 = vsel %vm769_vm2, %v753_v47, %v785_v55  ;;  %v622_v0 = vadd.f32 %v621_v52, %v364_v27  ;;  %v675_v1 = vadd.f32 %v674_v53, %v364_v27  ;;  %v744_v27 = vpop.permute.xlu0 %743  ;;  %v749_v51 = vpop.permute.xlu1 %748 }
 0x120   : > { %vm768_vm3 = vcmp.ge.f32.partialorder %v752_v56, 0.0  ;;  %v784_v3 = vmul.f32 0.1, %v752_v56  ;;  %vm770_vm4 = vcmp.ge.f32.partialorder %v754_v57, 0.0  ;;  %v786_v4 = vmul.f32 0.1, %v754_v57  ;;  %v627_v9 = vpop.f32.mrf.mxu0  ;;  %v680_v10 = vpop.f32.mrf.mxu1 }
 0x121   : > { %v755_v5 = vadd.f32 %v739_v2, %v715_v58  ;;  %v757_v6 = vadd.f32 %v739_v2, %v717_v59  ;;  %v716_v7 = vmul.f32 %v699_v30, %v622_v0  ;;  %v718_v8 = vmul.f32 %v699_v30, %v675_v1 }
 0x122   : > { %v800_v11 = vsel %vm768_vm3, %v752_v56, %v784_v3  ;;  %v802_v12 = vsel %vm770_vm4, %v754_v57, %v786_v4  ;;  %v626_v13 = vadd.f32 %v625_v60, %v1398_v26  ;;  %v679_v14 = vadd.f32 %v678_v61, %v1398_v26  ;;  %v629_v24 = vpop.f32.mrf.mxu0  ;;  %v682_v25 = vpop.f32.mrf.mxu1 }
 0x123   : > { %v1034_v15 = vpack.c.bf16 %v800_v11, %v799_v62  ;;  %v1035_v16 = vpack.c.bf16 %v802_v12, %v801_v63  ;;  %v787_v17 = vmul.f32 0.1, %v755_v5  ;;  %vm771_vm5 = vcmp.ge.f32.partialorder %v755_v5, 0.0 }
 0x124   : > { %v756_v18 = vadd.f32 %v739_v2, %v716_v7  ;;  %v758_v19 = vadd.f32 %v739_v2, %v718_v8  ;;  %v789_v20 = vmul.f32 0.1, %v757_v6  ;;  %v719_v21 = vmul.f32 %v1402_v31, %v626_v13  ;;  %v631_v44 = vpop.f32.mrf.mxu0  ;;  %v684_v48 = vpop.f32.mrf.mxu1 }
 0x125   : > { %863 = vst [vmem:[%s1410_s18] sm:$0xff] %v1034_v15  ;;  %864 = vst [vmem:[%s1410_s18 + $0x8] sm:$0xff] %v1035_v16  ;;  %v721_v22 = vmul.f32 %v1402_v31, %v679_v14  ;;  %v628_v23 = vadd.f32 %v627_v9, %v1398_v26  ;;  %vm773_vm6 = vcmp.ge.f32.partialorder %v757_v6, 0.0  ;;  %v803_v30 = vsel %vm771_vm5, %v755_v5, %v787_v17 }
 0x126   : > { %vm772_vm7 = vcmp.ge.f32.partialorder %v756_v18, 0.0  ;;  %v788_v29 = vmul.f32 0.1, %v756_v18  ;;  %vm774_vm8 = vcmp.ge.f32.partialorder %v758_v19, 0.0  ;;  %v790_v32 = vmul.f32 0.1, %v758_v19 }
 0x127   : > { %v759_v33 = vadd.f32 %v744_v27, %v719_v21  ;;  %v720_v34 = vmul.f32 %v1402_v31, %v628_v23  ;;  %v681_v36 = vadd.f32 %v680_v10, %v1398_v26  ;;  %v630_v37 = vadd.f32 %v629_v24, %v1400_v28 }
 0x128   : > { %v804_v35 = vsel %vm772_vm7, %v756_v18, %v788_v29  ;;  %v683_v39 = vadd.f32 %v682_v25, %v1400_v28  ;;  %v805_v40 = vsel %vm773_vm6, %v757_v6, %v789_v20  ;;  %v806_v42 = vsel %vm774_vm8, %v758_v19, %v790_v32 }
 0x129   : > { %v1036_v41 = vpack.c.bf16 %v804_v35, %v803_v30  ;;  %v761_v43 = vadd.f32 %v744_v27, %v721_v22  ;;  %v1037_v45 = vpack.c.bf16 %v806_v42, %v805_v40  ;;  %v791_v46 = vmul.f32 0.1, %v759_v33 }
 0x12a   : > { %v760_v47 = vadd.f32 %v744_v27, %v720_v34  ;;  %vm775_vm9 = vcmp.ge.f32.partialorder %v759_v33, 0.0  ;;  %v722_v49 = vmul.f32 %v1402_v31, %v681_v36  ;;  %v723_v26 = vmul.f32 %v1404_v38, %v630_v37 }
 0x12b   : > { %865 = vst [vmem:[%s1410_s18 + $0x10] sm:$0xff] %v1036_v41  ;;  %v725_v50 = vmul.f32 %v1404_v38, %v683_v39  ;;  %866 = vst [vmem:[%s1410_s18 + $0x18] sm:$0xff] %v1037_v45  ;;  %v632_v53 = vadd.f32 %v631_v44, %v1400_v28  ;;  %v793_v54 = vmul.f32 0.1, %v761_v43  ;;  %v685_v57 = vadd.f32 %v684_v48, %v1400_v28 }
 0x12c   : > { %vm776_vm10 = vcmp.ge.f32.partialorder %v760_v47, 0.0  ;;  %v792_v52 = vmul.f32 0.1, %v760_v47  ;;  %v762_v55 = vadd.f32 %v744_v27, %v722_v49  ;;  %v763_v56 = vadd.f32 %v749_v51, %v723_v26  ;;  %v895_v14 = vld [vmem:[%s1410_s18 + $0x8] sm:$0xff] (%p1217_p5) }
 0x12d   : > { %v807_v58 = vsel %vm775_vm9, %v759_v33, %v791_v46  ;;  %vm777_vm11 = vcmp.ge.f32.partialorder %v761_v43, 0.0  ;;  %v724_v31 = vmul.f32 %v1404_v38, %v632_v53  ;;  %v765_v62 = vadd.f32 %v749_v51, %v725_v50  ;;  %896 = vst [vmem:[%s880_s13 + $0x8] sm:$0xff] (%p1217_p5), %v895_v14 }
 0x12e   : > { %v808_v59 = vsel %vm776_vm10, %v760_v47, %v792_v52  ;;  %vm778_vm12 = vcmp.ge.f32.partialorder %v762_v55, 0.0  ;;  %v794_v61 = vmul.f32 0.1, %v762_v55  ;;  %v809_v0 = vsel %vm777_vm11, %v761_v43, %v793_v54 }
 0x12f   : > { %v1038_v60 = vpack.c.bf16 %v808_v59, %v807_v58  ;;  %v764_v63 = vadd.f32 %v749_v51, %v724_v31  ;;  %v795_v2 = vmul.f32 0.1, %v763_v56  ;;  %v726_v3 = vmul.f32 %v1404_v38, %v685_v57  ;;  %v893_v38 = vld [vmem:[%s1410_s18] sm:$0xff] (%p1217_p5) }
 0x130   : > { %v810_v1 = vsel %vm778_vm12, %v762_v55, %v794_v61  ;;  %vm779_vm13 = vcmp.ge.f32.partialorder %v763_v56, 0.0  ;;  %v797_v28 = vmul.f32 0.1, %v765_v62  ;;  %vm781_vm15 = vcmp.ge.f32.partialorder %v765_v62, 0.0  ;;  %894 = vst [vmem:[%s880_s13] sm:$0xff] (%p1217_p5), %v893_v38 }
 0x131   : > { %867 = vst [vmem:[%s1410_s18 + $0x20] sm:$0xff] %v1038_v60  ;;  %v1039_v4 = vpack.c.bf16 %v810_v1, %v809_v0  ;;  %vm780_vm14 = vcmp.ge.f32.partialorder %v764_v63, 0.0  ;;  %v796_v5 = vmul.f32 0.1, %v764_v63  ;;  %v766_v6 = vadd.f32 %v749_v51, %v726_v3 }
 0x132   : > { %v811_v7 = vsel %vm779_vm13, %v763_v56, %v795_v2  ;;  %v813_v11 = vsel %vm781_vm15, %v765_v62, %v797_v28  ;;  %v897_v15 = vld [vmem:[%s1410_s18 + $0x10] sm:$0xff] (%p1217_p5)  ;;  %v899_v16 = vld [vmem:[%s1410_s18 + $0x18] sm:$0xff] (%p1217_p5) }
 0x133   : > { %868 = vst [vmem:[%s1410_s18 + $0x28] sm:$0xff] %v1039_v4  ;;  %v812_v8 = vsel %vm780_vm14, %v764_v63, %v796_v5  ;;  %vm782_vm0 = vcmp.ge.f32.partialorder %v766_v6, 0.0  ;;  %v798_v9 = vmul.f32 0.1, %v766_v6  ;;  %898 = vst [vmem:[%s880_s13 + $0x40] sm:$0xff] (%p1217_p5), %v897_v15 }
 0x134   : > { %v1040_v10 = vpack.c.bf16 %v812_v8, %v811_v7  ;;  %877 = sbr.rel (!%p1217_p5) target bundleno = 321 (0x141), region = 67  ;;  %900 = vst [vmem:[%s880_s13 + $0x48] sm:$0xff] (%p1217_p5), %v899_v16 }
 0x135   : > { %v814_v12 = vsel %vm782_vm0, %v766_v6, %v798_v9 }
 0x136   : > { %869 = vst [vmem:[%s1410_s18 + $0x30] sm:$0xff] %v1040_v10  ;;  %v1041_v13 = vpack.c.bf16 %v814_v12, %v813_v11 }
 0x138   : > { %870 = vst [vmem:[%s1410_s18 + $0x38] sm:$0xff] %v1041_v13  ;;  %v901_v17 = vld [vmem:[%s1410_s18 + $0x20] sm:$0xff] (%p1217_p5) }
 0x139   : > { %902 = vst [vmem:[%s880_s13 + $0x80] sm:$0xff] %v901_v17 }
 0x13a   : > { %v903_v18 = vld [vmem:[%s1410_s18 + $0x28] sm:$0xff] }
 0x13b   : > { %904 = vst [vmem:[%s880_s13 + $0x88] sm:$0xff] %v903_v18 }
 0x13d   : > { %v905_v19 = vld [vmem:[%s1410_s18 + $0x30] sm:$0xff] }
 0x13e   : > { %906 = vst [vmem:[%s880_s13 + $0xc0] sm:$0xff] %v905_v19 }
 0x13f   : > { %v907_v20 = vld [vmem:[%s1410_s18 + $0x38] sm:$0xff] }
 0x140   : > { %908 = vst [vmem:[%s880_s13 + $0xc8] sm:$0xff] %v907_v20 }
 0x141 PF: > { %p12_p10 = scmp.ge.s32.totalorder %s1204_s22, 6   ;;  %s1467_s18 = smov %s1150_s19 }
 0x142   : > { %s1468_s19 = smov %s1215_s25  ;;  %s1469_s20 = smov %s1204_s22 }
 0x143   :  { %14 = sbr.rel (!%p12_p10) target bundleno = 2 (0x2), region = 121 }

// kernel: _lambda_.12
= control target key start
LH: loop header
LB: loop body
LE: loop exit
PB: predicated region body
PF: predicated region fallthrough
CT: control target
= control target key end

     0   :  { %v1251_v1 = vmov 0   ;;  %vm541_vm0 = vcmask 392192   ;;  %s1707_s1 = inlined_call_operand.vmem [shape: bf16[304,512], index: 1, kind: input, shape index: {}]   ;;  %s1708_s0 = inlined_call_operand.vmem [shape: bf16[32,304], index: 0, kind: input, shape index: {}]   ;;  %s1709_s2 = inlined_call_operand.vmem [shape: f32[32,1], index: 2, kind: input, shape index: {}]   ;;  %s1710_s3 = inlined_call_operand.vmem [shape: f32[32,1], index: 3, kind: input, shape index: {}]   ;;  %s1711_s4 = inlined_call_operand.vmem [shape: f32[32,1], index: 4, kind: input, shape index: {}]   ;;  %s1712_s5 = inlined_call_operand.vmem [shape: bf16[32,512], index: 5, kind: output, shape index: {0}]   ;;  %s1713_s6 = inlined_call_operand.vmem [shape: bf16[32,512], index: 6, kind: output, shape index: {1}]  }
   0x1   :  { %v1129_v0 = vld [vmem:[%s1707_s1 + $0xe4] ss:$16 sps:$4 sm:$0xff]   ;;  %633 = vmatprep.mubr.bf16.mxu1 %v1251_v1  ;;  %1127 = vset.pattern.permute.xlu0 %v1251_v1  ;;  %v1133_v3 = vld [vmem:[%s1707_s1 + $0xe0] ss:$16 sps:$4 sm:$0xff]   ;;  %v1150_v15 = vld [vmem:[%s1707_s1 + $0xe8] ss:$16 sps:$4 sm:$0xff]  }
   0x2   :  { %v1131_v2 = vld [vmem:[%s1707_s1 + $0x244] ss:$16 sps:$4 sm:$0xff]   ;;  %1128 = vset.pattern.permute.xlu1 %v1251_v1  ;;  %548 = vmatprep.subr.bf16.mxu0 %v1129_v0  ;;  %v1134_v4 = vld [vmem:[%s1707_s1 + $0x240] ss:$16 sps:$4 sm:$0xff]   ;;  %v1152_v16 = vld [vmem:[%s1707_s1 + $0xec] ss:$16 sps:$4 sm:$0xff]  }
   0x3   :  { %611 = vmatprep.subr.bf16.mxu1 %v1131_v2  ;;  %v1135_v5 = vld [vmem:[%s1707_s1 + $0xc4] ss:$16 sps:$4 sm:$0xff]   ;;  %549 = vmatpush1.bf16.msra.mxu0 %v1133_v3  ;;  %v1139_v7 = vld [vmem:[%s1707_s1 + $0xc0] ss:$16 sps:$4 sm:$0xff]   ;;  %v1158_v19 = vld [vmem:[%s1707_s1 + $0xcc] ss:$16 sps:$4 sm:$0xff]  }
   0x4   :  { %612 = vmatpush1.bf16.msra.mxu1 %v1134_v4  ;;  %v1137_v6 = vld [vmem:[%s1707_s1 + $0x224] ss:$16 sps:$4 sm:$0xff]   ;;  %550 = vmatprep.subr.bf16.mxu0 %v1135_v5  ;;  %v1140_v8 = vld [vmem:[%s1707_s1 + $0x220] ss:$16 sps:$4 sm:$0xff]   ;;  %v1156_v20 = vld [vmem:[%s1707_s1 + $0xc8] ss:$16 sps:$4 sm:$0xff]  }
   0x5   :  { %613 = vmatprep.subr.bf16.mxu1 %v1137_v6  ;;  %v1141_v9 = vld [vmem:[%s1707_s1 + $0xa4] ss:$16 sps:$4 sm:$0xff]   ;;  %v1145_v11 = vld [vmem:[%s1707_s1 + $0xa0] ss:$16 sps:$4 sm:$0xff]   ;;  %v1164_v23 = vld [vmem:[%s1707_s1 + $0xac] ss:$16 sps:$4 sm:$0xff]  }
   0x6   :  { %v1143_v10 = vld [vmem:[%s1707_s1 + $0x204] ss:$16 sps:$4 sm:$0xff]   ;;  %v1146_v12 = vld [vmem:[%s1707_s1 + $0x200] ss:$16 sps:$4 sm:$0xff]   ;;  %v1162_v24 = vld [vmem:[%s1707_s1 + $0xa8] ss:$16 sps:$4 sm:$0xff]  }
   0x7   :  { %551 = vmatpush1.bf16.msra.mxu0 %v1139_v7  ;;  %v1147_v13 = vld [vmem:[%s1707_s1 + $0x84] ss:$16 sps:$4 sm:$0xff]   ;;  %v1153_v17 = vld [vmem:[%s1707_s1 + $0x80] ss:$16 sps:$4 sm:$0xff]   ;;  %v1170_v27 = vld [vmem:[%s1707_s1 + $0x8c] ss:$16 sps:$4 sm:$0xff]  }
   0x8   :  { %614 = vmatpush1.bf16.msra.mxu1 %v1140_v8  ;;  %552 = vmatprep.subr.bf16.mxu0 %v1141_v9  ;;  %v1332_v14 = vld [vmem:[%s1708_s0 + $0x8] ss:$12 sps:$4 sm:$0xff]   ;;  %v1159_v21 = vld [vmem:[%s1707_s1 + $0x60] ss:$16 sps:$4 sm:$0xff]   ;;  %v1176_v31 = vld [vmem:[%s1707_s1 + $0x6c] ss:$16 sps:$4 sm:$0xff]  }
   0x9   :  { %615 = vmatprep.subr.bf16.mxu1 %v1143_v10  ;;  %v1154_v18 = vld [vmem:[%s1707_s1 + $0x64] ss:$16 sps:$4 sm:$0xff]   ;;  %v1165_v25 = vld [vmem:[%s1707_s1 + $0x40] ss:$16 sps:$4 sm:$0xff]   ;;  %v1168_v28 = vld [vmem:[%s1707_s1 + $0x88] ss:$16 sps:$4 sm:$0xff]  }
   0xa   :  { %v1160_v22 = vld [vmem:[%s1707_s1 + $0x44] ss:$16 sps:$4 sm:$0xff]   ;;  %v1171_v29 = vld [vmem:[%s1707_s1 + $0x20] ss:$16 sps:$4 sm:$0xff]   ;;  %v1174_v32 = vld [vmem:[%s1707_s1 + $0x68] ss:$16 sps:$4 sm:$0xff]  }
   0xb   :  { %553 = vmatpush1.bf16.msra.mxu0 %v1145_v11  ;;  %v1166_v26 = vld [vmem:[%s1707_s1 + $0x24] ss:$16 sps:$4 sm:$0xff]   ;;  %v1177_v33 = vld [vmem:[%s1707_s1] ss:$16 sps:$4 sm:$0xff]   ;;  %v1182_v35 = vld [vmem:[%s1707_s1 + $0x4c] ss:$16 sps:$4 sm:$0xff]  }
   0xc   :  { %616 = vmatpush1.bf16.msra.mxu1 %v1146_v12  ;;  %554 = vmatprep.subr.bf16.mxu0 %v1147_v13  ;;  %v1172_v30 = vld [vmem:[%s1707_s1 + $0x4] ss:$16 sps:$4 sm:$0xff]   ;;  %v1180_v36 = vld [vmem:[%s1707_s1 + $0x48] ss:$16 sps:$4 sm:$0xff]   ;;  %v1183_v37 = vld [vmem:[%s1707_s1 + $0x1e0] ss:$16 sps:$4 sm:$0xff]  }
   0xd   :  { %654 = vmatprep.subr.bf16.mxu1 %v1152_v16  ;;  %v1178_v34 = vld [vmem:[%s1707_s1 + $0x1e4] ss:$16 sps:$4 sm:$0xff]   ;;  %v1188_v39 = vld [vmem:[%s1707_s1 + $0x2c] ss:$16 sps:$4 sm:$0xff]   ;;  %v1186_v40 = vld [vmem:[%s1707_s1 + $0x28] ss:$16 sps:$4 sm:$0xff]  }
   0xe   :  { %v1184_v38 = vld [vmem:[%s1707_s1 + $0x1c4] ss:$16 sps:$4 sm:$0xff]   ;;  %v1189_v41 = vld [vmem:[%s1707_s1 + $0x1c0] ss:$16 sps:$4 sm:$0xff]   ;;  %v1194_v43 = vld [vmem:[%s1707_s1 + $0xc] ss:$16 sps:$4 sm:$0xff]  }
   0xf   :  { %1090 = vmatmul.mubr.msk.bf16.vlgmr.msra.gmra.mxu1 %vm541_vm0, %v1332_v14  ;;  %555 = vmatpush1.bf16.msra.mxu0 %v1153_v17  ;;  %v1190_v42 = vld [vmem:[%s1707_s1 + $0x1a4] ss:$16 sps:$4 sm:$0xff]   ;;  %v1192_v44 = vld [vmem:[%s1707_s1 + $0x8] ss:$16 sps:$4 sm:$0xff]   ;;  %v1195_v45 = vld [vmem:[%s1707_s1 + $0x1a0] ss:$16 sps:$4 sm:$0xff]  }
  0x10   :  { %655 = vmatpush1.bf16.msra.mxu1 %v1150_v15  ;;  %556 = vmatprep.subr.bf16.mxu0 %v1154_v18  ;;  %v1196_v46 = vld [vmem:[%s1707_s1 + $0x184] ss:$16 sps:$4 sm:$0xff]   ;;  %v1200_v47 = vld [vmem:[%s1707_s1 + $0x1ec] ss:$16 sps:$4 sm:$0xff]   ;;  %v1198_v48 = vld [vmem:[%s1707_s1 + $0x1e8] ss:$16 sps:$4 sm:$0xff]  }
  0x11   :  { %656 = vmatprep.subr.bf16.mxu1 %v1158_v19  ;;  %643 = vmatprep.mubr.bf16.mxu1 %v1251_v1  ;;  %v1201_v49 = vld [vmem:[%s1707_s1 + $0x180] ss:$16 sps:$4 sm:$0xff]   ;;  %v1202_v50 = vld [vmem:[%s1707_s1 + $0x164] ss:$16 sps:$4 sm:$0xff]   ;;  %v1206_v52 = vld [vmem:[%s1707_s1 + $0x1cc] ss:$16 sps:$4 sm:$0xff]  }
  0x12   :  { %v1228_v51 = vld [vmem:[%s1708_s0 + $0x4] ss:$12 sps:$4 sm:$0xff]   ;;  %v1204_v53 = vld [vmem:[%s1707_s1 + $0x1c8] ss:$16 sps:$4 sm:$0xff]   ;;  %v1460_v55 = vld [vmem:[%s1708_s0 + $0x20] ss:$12 sps:$4 sm:$0xff]  }
  0x13   :  { %557 = vmatpush1.bf16.msra.mxu0 %v1159_v21  ;;  %580 = vmatprep.mubr.bf16.mxu0 %v1228_v51  ;;  %v1207_v54 = vld [vmem:[%s1707_s1 + $0x160] ss:$16 sps:$4 sm:$0xff]   ;;  %v1208_v56 = vld [vmem:[%s1707_s1 + $0x144] ss:$16 sps:$4 sm:$0xff]   ;;  %v1212_v57 = vld [vmem:[%s1707_s1 + $0x1ac] ss:$16 sps:$4 sm:$0xff]  }
  0x14   :  { %657 = vmatpush1.bf16.msra.mxu1 %v1156_v20  ;;  %558 = vmatprep.subr.bf16.mxu0 %v1160_v22  ;;  %v1210_v58 = vld [vmem:[%s1707_s1 + $0x1a8] ss:$16 sps:$4 sm:$0xff]   ;;  %v1213_v59 = vld [vmem:[%s1707_s1 + $0x140] ss:$16 sps:$4 sm:$0xff]   ;;  %v1214_v60 = vld [vmem:[%s1707_s1 + $0x124] ss:$16 sps:$4 sm:$0xff]  }
  0x15   :  { %658 = vmatprep.subr.bf16.mxu1 %v1164_v23  ;;  %v1218_v61 = vld [vmem:[%s1707_s1 + $0x18c] ss:$16 sps:$4 sm:$0xff]   ;;  %v107_v62 = vld [vmem:[%s1709_s2] sm:$0xff]  ;;  %v109_v63 = vld [vmem:[%s1709_s2 + $0x10] sm:$0xff] }
  0x16   :  { %v1216_v0 = vld [vmem:[%s1707_s1 + $0x188] ss:$16 sps:$4 sm:$0xff]   ;;  %v1219_v2 = vld [vmem:[%s1707_s1 + $0x120] ss:$16 sps:$4 sm:$0xff]   ;;  %v1220_v3 = vld [vmem:[%s1707_s1 + $0x104] ss:$16 sps:$4 sm:$0xff]   ;;  %113 = vperm.xlu0 %1127, %v107_v62   ;;  %123 = vperm.xlu1 %1128, %v109_v63  }
  0x17   :  { %559 = vmatpush1.bf16.msra.mxu0 %v1165_v25  ;;  %1091 = vmatmul.mubr.msk.bf16.gmra.mxu1 %vm541_vm0, %v1460_v55  ;;  %v1224_v4 = vld [vmem:[%s1707_s1 + $0x16c] ss:$16 sps:$4 sm:$0xff]   ;;  %v1222_v7 = vld [vmem:[%s1707_s1 + $0x168] ss:$16 sps:$4 sm:$0xff]   ;;  %v1225_v8 = vld [vmem:[%s1707_s1 + $0x100] ss:$16 sps:$4 sm:$0xff]  }
  0x18   :  { %659 = vmatpush1.bf16.msra.mxu1 %v1162_v24  ;;  %560 = vmatprep.subr.bf16.mxu0 %v1166_v26  ;;  %v108_v5 = vld [vmem:[%s1709_s2 + $0x8] sm:$0xff]  ;;  %v110_v6 = vld [vmem:[%s1709_s2 + $0x18] sm:$0xff]  ;;  %v816_v12 = vld [vmem:[%s1710_s3] sm:$0xff] }
  0x19   :  { %660 = vmatprep.subr.bf16.mxu1 %v1170_v27  ;;  %686 = vmatprep.mubr.bf16.mxu1 %v1228_v51  ;;  %v1231_v9 = vld [vmem:[%s1707_s1 + $0x14c] ss:$16 sps:$4 sm:$0xff]   ;;  %v1229_v15 = vld [vmem:[%s1707_s1 + $0x148] ss:$16 sps:$4 sm:$0xff]   ;;  %v818_v20 = vld [vmem:[%s1710_s3 + $0x10] sm:$0xff] }
  0x1a   :  { %v1234_v10 = vld [vmem:[%s1707_s1 + $0x24c] ss:$16 sps:$4 sm:$0xff]   ;;  %118 = vperm.xlu0 %1127, %v108_v5   ;;  %128 = vperm.xlu1 %1128, %v110_v6   ;;  %v1232_v16 = vld [vmem:[%s1707_s1 + $0x248] ss:$16 sps:$4 sm:$0xff]   ;;  %v856_v27 = vld [vmem:[%s1711_s4] sm:$0xff] }
  0x1b   :  { %561 = vmatpush1.bf16.msra.mxu0 %v1171_v29  ;;  %v1226_v11 = vld [vmem:[%s1708_s0] ss:$12 sps:$4 sm:$0xff]   ;;  %v1242_v19 = vld [vmem:[%s1708_s0 + $0x1c] ss:$12 sps:$4 sm:$0xff]   ;;  %v1244_v26 = vld [vmem:[%s1708_s0 + $0x18] ss:$12 sps:$4 sm:$0xff]  }
  0x1c   :  { %661 = vmatpush1.bf16.msra.mxu1 %v1168_v28  ;;  %562 = vmatprep.subr.bf16.mxu0 %v1172_v30  ;;  %v817_v13 = vld [vmem:[%s1710_s3 + $0x8] sm:$0xff]  ;;  %v819_v23 = vld [vmem:[%s1710_s3 + $0x18] sm:$0xff] }
  0x1d   :  { %662 = vmatprep.subr.bf16.mxu1 %v1176_v31  ;;  %v1238_v17 = vld [vmem:[%s1707_s1 + $0x12c] ss:$16 sps:$4 sm:$0xff]   ;;  %v1236_v21 = vld [vmem:[%s1707_s1 + $0x128] ss:$16 sps:$4 sm:$0xff]   ;;  %v858_v31 = vld [vmem:[%s1711_s4 + $0x10] sm:$0xff] }
  0x1e   :  { %v1241_v18 = vld [vmem:[%s1707_s1 + $0x22c] ss:$16 sps:$4 sm:$0xff]   ;;  %822 = vperm.xlu0 %1127, %v816_v12   ;;  %827 = vperm.xlu1 %1128, %v817_v13   ;;  %v1239_v22 = vld [vmem:[%s1707_s1 + $0x228] ss:$16 sps:$4 sm:$0xff]  }
  0x1f   :  { %563 = vmatpush1.bf16.msra.mxu0 %v1177_v33  ;;  %v1247_v24 = vld [vmem:[%s1707_s1 + $0x10c] ss:$16 sps:$4 sm:$0xff]   ;;  %v1245_v28 = vld [vmem:[%s1707_s1 + $0x108] ss:$16 sps:$4 sm:$0xff]  }
  0x20   :  { %663 = vmatpush1.bf16.msra.mxu1 %v1174_v32  ;;  %564 = vmatprep.subr.bf16.mxu0 %v1178_v34  ;;  %v1250_v25 = vld [vmem:[%s1707_s1 + $0x20c] ss:$16 sps:$4 sm:$0xff]   ;;  %v1248_v29 = vld [vmem:[%s1707_s1 + $0x208] ss:$16 sps:$4 sm:$0xff]  }
  0x21   :  { %664 = vmatprep.subr.bf16.mxu1 %v1182_v35  ;;  %v857_v30 = vld [vmem:[%s1711_s4 + $0x8] sm:$0xff]  ;;  %v859_v32 = vld [vmem:[%s1711_s4 + $0x18] sm:$0xff] }
  0x22   :  { %832 = vperm.xlu0 %1127, %v818_v20   ;;  %837 = vperm.xlu1 %1128, %v819_v23  }
  0x23   :  { %565 = vmatpush2.bf16.msra.mxu0 %v1183_v37 }
  0x24   :  { %665 = vmatpush1.bf16.msra.mxu1 %v1180_v36  ;;  %566 = vmatprep.subr.bf16.mxu0 %v1184_v38 }
  0x25   :  { %666 = vmatprep.subr.bf16.mxu1 %v1188_v39 }
  0x26   :  { %862 = vperm.xlu0 %1127, %v856_v27   ;;  %867 = vperm.xlu1 %1128, %v857_v30  }
  0x27   :  { %567 = vmatpush2.bf16.msra.mxu0 %v1189_v41 }
  0x28   :  { %667 = vmatpush1.bf16.msra.mxu1 %v1186_v40  ;;  %568 = vmatprep.subr.bf16.mxu0 %v1190_v42 }
  0x29   :  { %668 = vmatprep.subr.bf16.mxu1 %v1194_v43 }
  0x2a   :  { %872 = vperm.xlu0 %1127, %v858_v31   ;;  %877 = vperm.xlu1 %1128, %v859_v32  }
  0x2b   :  { %569 = vmatpush2.bf16.msra.mxu0 %v1195_v45 }
  0x2c   :  { %669 = vmatpush1.bf16.msra.mxu1 %v1192_v44  ;;  %570 = vmatprep.subr.bf16.mxu0 %v1196_v46 }
  0x2d   :  { %670 = vmatprep.subr.bf16.mxu1 %v1200_v47 }
  0x2f   :  { %571 = vmatpush2.bf16.msra.mxu0 %v1201_v49 }
  0x30   :  { %671 = vmatpush2.bf16.msra.mxu1 %v1198_v48  ;;  %572 = vmatprep.subr.bf16.mxu0 %v1202_v50 }
  0x31   :  { %672 = vmatprep.subr.bf16.mxu1 %v1206_v52 }
  0x33   :  { %573 = vmatpush2.bf16.msra.mxu0 %v1207_v54 }
  0x34   :  { %673 = vmatpush2.bf16.msra.mxu1 %v1204_v53  ;;  %574 = vmatprep.subr.bf16.mxu0 %v1208_v56 }
  0x35   :  { %674 = vmatprep.subr.bf16.mxu1 %v1212_v57 }
  0x37   :  { %575 = vmatpush2.bf16.msra.mxu0 %v1213_v59 }
  0x38   :  { %675 = vmatpush2.bf16.msra.mxu1 %v1210_v58  ;;  %576 = vmatprep.subr.bf16.mxu0 %v1214_v60 }
  0x39   :  { %676 = vmatprep.subr.bf16.mxu1 %v1218_v61 }
  0x3b   :  { %577 = vmatpush2.bf16.msra.mxu0 %v1219_v2 }
  0x3c   :  { %677 = vmatpush2.bf16.msra.mxu1 %v1216_v0  ;;  %578 = vmatprep.subr.bf16.mxu0 %v1220_v3 }
  0x3d   :  { %678 = vmatprep.subr.bf16.mxu1 %v1224_v4 }
  0x3f   :  { %579 = vmatpush2.bf16.msra.mxu0 %v1225_v8 }
  0x40   :  { %679 = vmatpush2.bf16.msra.mxu1 %v1222_v7  ;;  %717 = vmatprep.subr.bf16.mxu0 %v1234_v10 }
  0x41   :  { %680 = vmatprep.subr.bf16.mxu1 %v1231_v9 }
  0x42   :  { %581 = vmatmul.mubr.bf16.vlgmr.msra.gmra.mxu0 %v1226_v11 }
  0x43   :  { %718 = vmatpush1.bf16.msra.mxu0 %v1232_v16  ;;  %590 = vmatprep.mubr.bf16.mxu0 %v1242_v19 }
  0x44   :  { %681 = vmatpush2.bf16.msra.mxu1 %v1229_v15  ;;  %719 = vmatprep.subr.bf16.mxu0 %v1241_v18 }
  0x45   :  { %682 = vmatprep.subr.bf16.mxu1 %v1238_v17 }
  0x47   :  { %720 = vmatpush1.bf16.msra.mxu0 %v1239_v22 }
  0x48   :  { %683 = vmatpush2.bf16.msra.mxu1 %v1236_v21  ;;  %721 = vmatprep.subr.bf16.mxu0 %v1250_v25 }
  0x49   :  { %684 = vmatprep.subr.bf16.mxu1 %v1247_v24 }
  0x4a   :  { %591 = vmatmul.mubr.bf16.gmra.mxu0 %v1244_v26 }
  0x4b   :  { %722 = vmatpush1.bf16.msra.mxu0 %v1248_v29  ;;  %739 = vmatprep.mubr.bf16.mxu0 %v1251_v1 }
  0x4c   :  { %685 = vmatpush2.bf16.msra.mxu1 %v1245_v28 }
  0x4f   :  { %687 = vmatmul.mubr.bf16.vlgmr.msra.gmra.mxu1 %v1226_v11 }
  0x50   :  { %696 = vmatprep.mubr.bf16.mxu1 %v1242_v19 }
  0x52   :  { %1092 = vmatmul.mubr.msk.bf16.vlgmr.msra.gmra.mxu0 %vm541_vm0, %v1332_v14 }
  0x53   :  { %749 = vmatprep.mubr.bf16.mxu0 %v1251_v1 }
  0x57   :  { %697 = vmatmul.mubr.bf16.gmra.mxu1 %v1244_v26 }
  0x5a   :  { %1093 = vmatmul.mubr.msk.bf16.gmra.mxu0 %vm541_vm0, %v1460_v55 }
  0x91   :  { %v1587_v33 = vpop.permute.xlu0 %113  ;;  %v1589_v34 = vpop.permute.xlu1 %123 }
  0x95   :  { %v1591_v36 = vpop.permute.xlu0 %118  ;;  %v1593_v38 = vpop.permute.xlu1 %128 }
  0x99   :  { %v1595_v40 = vpop.permute.xlu0 %822  ;;  %v1597_v14 = vpop.permute.xlu1 %827 }
  0x9d   :  { %v1599_v42 = vpop.permute.xlu0 %832  ;;  %v1602_v45 = vpop.permute.xlu1 %837 }
  0xa1   :  { %v1605_v51 = vpop.permute.xlu0 %862  ;;  %v1612_v63 = vpop.permute.xlu1 %867 }
  0xa5   :  { %v1624_v21 = vpop.permute.xlu0 %872 }
  0xcf   :  { %v635_v35 = vpop.f32.mrf.mxu1 }
  0xd1   :  { %v637_v37 = vpop.f32.mrf.mxu1 }
  0xd3   :  { %v639_v39 = vpop.f32.mrf.mxu1 }
  0xd5   :  { %v641_v1 = vpop.f32.mrf.mxu1 }
  0xd7   :  { %v645_v41 = vpop.f32.mrf.mxu1 }
  0xd9   :  { %v647_v47 = vpop.f32.mrf.mxu1 }
  0xdb   :  { %v649_v55 = vpop.f32.mrf.mxu1 }
  0xdd   :  { %v651_v5 = vpop.f32.mrf.mxu1 }
 0x102   :  { %v582_v43 = vpop.f32.mrf.mxu0 }
 0x103   :  { %v583_v44 = vadd.f32 %v582_v43, %v1587_v33 }
 0x104   :  { %v584_v46 = vpop.f32.mrf.mxu0 }
 0x105   :  { %v636_v48 = vadd.f32 %v635_v35, %v583_v44  ;;  %v585_v49 = vadd.f32 %v584_v46, %v1587_v33 }
 0x106   :  { %v586_v50 = vpop.f32.mrf.mxu0 }
 0x107   :  { %v840_v52 = vmul.f32 %v1595_v40, %v636_v48  ;;  %v638_v53 = vadd.f32 %v637_v37, %v585_v49  ;;  %v587_v54 = vadd.f32 %v586_v50, %v1591_v36 }
 0x108   :  { %v588_v56 = vpop.f32.mrf.mxu0 }
 0x109   :  { %v1110_v57 = vpack.c.bf16 %v638_v53, %v636_v48  ;;  %v841_v58 = vmul.f32 %v1595_v40, %v638_v53  ;;  %v640_v59 = vadd.f32 %v639_v39, %v587_v54  ;;  %v880_v60 = vadd.f32 %v1605_v51, %v840_v52 }
 0x10a   :  { %v589_v61 = vadd.f32 %v588_v56, %v1591_v36  ;;  %v592_v62 = vpop.f32.mrf.mxu0 }
 0x10b   :  { %808 = vst [vmem:[%s1712_s5] sm:$0xff] %v1110_v57  ;;  %v844_v0 = vmul.f32 %v1597_v14, %v640_v59  ;;  %v881_v2 = vadd.f32 %v1605_v51, %v841_v58  ;;  %vm896_vm1 = vcmp.ge.f32.partialorder %v880_v60, 0.0  ;;  %v912_v3 = vmul.f32 0.1, %v880_v60  ;;  %v1645_v57 = vpop.permute.xlu1 %877 }
 0x10c   :  { %v642_v4 = vadd.f32 %v641_v1, %v589_v61  ;;  %v593_v6 = vadd.f32 %v592_v62, %v1589_v34  ;;  %v594_v7 = vpop.f32.mrf.mxu0 }
 0x10d   :  { %vm897_vm2 = vcmp.ge.f32.partialorder %v881_v2, 0.0  ;;  %v913_v8 = vmul.f32 0.1, %v881_v2  ;;  %v928_v9 = vsel %vm896_vm1, %v880_v60, %v912_v3  ;;  %v884_v10 = vadd.f32 %v1612_v63, %v844_v0 }
 0x10e   :  { %v1112_v11 = vpack.c.bf16 %v642_v4, %v640_v59  ;;  %v845_v12 = vmul.f32 %v1597_v14, %v642_v4  ;;  %v646_v13 = vadd.f32 %v645_v41, %v593_v6  ;;  %v595_v15 = vadd.f32 %v594_v7, %v1589_v34  ;;  %v596_v16 = vpop.f32.mrf.mxu0 }
 0x10f   :  { %v688_v17 = vpop.f32.mrf.mxu1  ;;  %v929_v18 = vsel %vm897_vm2, %v881_v2, %v913_v8  ;;  %vm900_vm3 = vcmp.ge.f32.partialorder %v884_v10, 0.0  ;;  %v916_v19 = vmul.f32 0.1, %v884_v10  ;;  %v597_v20 = vadd.f32 %v596_v16, %v1593_v38 }
 0x110   :  { %v1118_v22 = vpack.c.bf16 %v929_v18, %v928_v9  ;;  %810 = vst [vmem:[%s1712_s5 + $0x10] sm:$0xff] %v1112_v11  ;;  %v848_v23 = vmul.f32 %v1599_v42, %v646_v13  ;;  %v885_v24 = vadd.f32 %v1612_v63, %v845_v12  ;;  %v648_v25 = vadd.f32 %v647_v47, %v595_v15  ;;  %v598_v26 = vpop.f32.mrf.mxu0 }
 0x111   :  { %v690_v27 = vpop.f32.mrf.mxu1  ;;  %v932_v28 = vsel %vm900_vm3, %v884_v10, %v916_v19  ;;  %v650_v29 = vadd.f32 %v649_v55, %v597_v20  ;;  %v689_v30 = vadd.f32 %v688_v17, %v1587_v33  ;;  %v599_v31 = vadd.f32 %v598_v26, %v1593_v38 }
 0x112   :  { %992 = vst [vmem:[%s1713_s6] sm:$0xff] %v1118_v22  ;;  %vm901_vm4 = vcmp.ge.f32.partialorder %v885_v24, 0.0  ;;  %v917_v32 = vmul.f32 0.1, %v885_v24  ;;  %v1114_v35 = vpack.c.bf16 %v648_v25, %v646_v13  ;;  %v849_v37 = vmul.f32 %v1599_v42, %v648_v25  ;;  %v741_v1 = vpop.f32.mrf.mxu0 }
 0x113   :  { %v692_v39 = vpop.f32.mrf.mxu1  ;;  %v852_v41 = vmul.f32 %v1602_v45, %v650_v29  ;;  %v888_v43 = vadd.f32 %v1624_v21, %v848_v23  ;;  %v652_v44 = vadd.f32 %v651_v5, %v599_v31  ;;  %v691_v46 = vadd.f32 %v690_v27, %v1587_v33 }
 0x114   :  { %v933_v47 = vsel %vm901_vm4, %v885_v24, %v917_v32  ;;  %812 = vst [vmem:[%s1712_s5 + $0x20] sm:$0xff] %v1114_v35  ;;  %v889_v48 = vadd.f32 %v1624_v21, %v849_v37  ;;  %v693_v49 = vadd.f32 %v692_v39, %v1591_v36  ;;  %v742_v50 = vadd.f32 %v741_v1, %v689_v30  ;;  %v743_v53 = vpop.f32.mrf.mxu0 }
 0x115   :  { %v694_v52 = vpop.f32.mrf.mxu1  ;;  %v1120_v54 = vpack.c.bf16 %v933_v47, %v932_v28  ;;  %vm904_vm5 = vcmp.ge.f32.partialorder %v888_v43, 0.0  ;;  %v920_v55 = vmul.f32 0.1, %v888_v43  ;;  %v1116_v56 = vpack.c.bf16 %v652_v44, %v650_v29 }
 0x116   :  { %vm905_vm6 = vcmp.ge.f32.partialorder %v889_v48, 0.0  ;;  %v921_v33 = vmul.f32 0.1, %v889_v48  ;;  %v853_v58 = vmul.f32 %v1602_v45, %v652_v44  ;;  %v892_v59 = vadd.f32 %v1645_v57, %v852_v41  ;;  %v745_v61 = vpop.f32.mrf.mxu0 }
 0x117   :  { %v698_v60 = vpop.f32.mrf.mxu1  ;;  %994 = vst [vmem:[%s1713_s6 + $0x10] sm:$0xff] %v1120_v54  ;;  %v936_v62 = vsel %vm904_vm5, %v888_v43, %v920_v55  ;;  %814 = vst [vmem:[%s1712_s5 + $0x30] sm:$0xff] %v1116_v56  ;;  %v842_v0 = vmul.f32 %v1595_v40, %v742_v50  ;;  %v695_v2 = vadd.f32 %v694_v52, %v1591_v36 }
 0x118   :  { %v744_v3 = vadd.f32 %v743_v53, %v691_v46  ;;  %v937_v4 = vsel %vm905_vm6, %v889_v48, %v921_v33  ;;  %v893_v5 = vadd.f32 %v1645_v57, %v853_v58  ;;  %vm908_vm7 = vcmp.ge.f32.partialorder %v892_v59, 0.0  ;;  %v747_v8 = vpop.f32.mrf.mxu0 }
 0x119   :  { %v924_v6 = vmul.f32 0.1, %v892_v59  ;;  %v700_v7 = vpop.f32.mrf.mxu1  ;;  %v1122_v9 = vpack.c.bf16 %v937_v4, %v936_v62  ;;  %v882_v10 = vadd.f32 %v1605_v51, %v842_v0  ;;  %v699_v16 = vadd.f32 %v698_v60, %v1589_v34 }
 0x11a   :  { %v1111_v11 = vpack.c.bf16 %v744_v3, %v742_v50  ;;  %v843_v12 = vmul.f32 %v1595_v40, %v744_v3  ;;  %vm909_vm8 = vcmp.ge.f32.partialorder %v893_v5, 0.0  ;;  %v925_v13 = vmul.f32 0.1, %v893_v5  ;;  %v751_v17 = vpop.f32.mrf.mxu0 }
 0x11b   :  { %v940_v15 = vsel %vm908_vm7, %v892_v59, %v924_v6  ;;  %v702_v36 = vpop.f32.mrf.mxu1  ;;  %996 = vst [vmem:[%s1713_s6 + $0x20] sm:$0xff] %v1122_v9  ;;  %vm898_vm9 = vcmp.ge.f32.partialorder %v882_v10, 0.0  ;;  %v914_v18 = vmul.f32 0.1, %v882_v10  ;;  %v746_v40 = vadd.f32 %v745_v61, %v693_v49 }
 0x11c   :  { %809 = vst [vmem:[%s1712_s5 + $0x8] sm:$0xff] %v1111_v11  ;;  %v883_v19 = vadd.f32 %v1605_v51, %v843_v12  ;;  %v941_v20 = vsel %vm909_vm8, %v893_v5, %v925_v13  ;;  %v701_v22 = vadd.f32 %v700_v7, %v1589_v34  ;;  %v748_v23 = vadd.f32 %v747_v8, %v695_v2  ;;  %v753_v26 = vpop.f32.mrf.mxu0 }
 0x11d   :  { %v703_v24 = vadd.f32 %v702_v36, %v1593_v38  ;;  %v704_v25 = vpop.f32.mrf.mxu1  ;;  %v1124_v27 = vpack.c.bf16 %v941_v20, %v940_v15  ;;  %v930_v28 = vsel %vm898_vm9, %v882_v10, %v914_v18  ;;  %v846_v30 = vmul.f32 %v1597_v14, %v746_v40 }
 0x11e   :  { %vm899_vm10 = vcmp.ge.f32.partialorder %v883_v19, 0.0  ;;  %v915_v29 = vmul.f32 0.1, %v883_v19  ;;  %v1113_v31 = vpack.c.bf16 %v748_v23, %v746_v40  ;;  %v847_v32 = vmul.f32 %v1597_v14, %v748_v23  ;;  %v755_v51 = vpop.f32.mrf.mxu0 }
 0x11f   :  { %v752_v35 = vadd.f32 %v751_v17, %v699_v16  ;;  %998 = vst [vmem:[%s1713_s6 + $0x30] sm:$0xff] %v1124_v27  ;;  %v705_v37 = vadd.f32 %v704_v25, %v1593_v38  ;;  %v754_v39 = vadd.f32 %v753_v26, %v701_v22  ;;  %v756_v1 = vadd.f32 %v755_v51, %v703_v24 }
 0x120   :  { %v931_v34 = vsel %vm899_vm10, %v883_v19, %v915_v29  ;;  %v886_v43 = vadd.f32 %v1612_v63, %v846_v30  ;;  %811 = vst [vmem:[%s1712_s5 + $0x18] sm:$0xff] %v1113_v31  ;;  %v887_v14 = vadd.f32 %v1612_v63, %v847_v32  ;;  %v757_v46 = vpop.f32.mrf.mxu0 }
 0x121   :  { %v1119_v41 = vpack.c.bf16 %v931_v34, %v930_v28  ;;  %v850_v44 = vmul.f32 %v1599_v42, %v752_v35  ;;  %v1115_v47 = vpack.c.bf16 %v754_v39, %v752_v35  ;;  %v851_v48 = vmul.f32 %v1599_v42, %v754_v39 }
 0x122   :  { %v854_v49 = vmul.f32 %v1602_v45, %v756_v1  ;;  %v758_v38 = vadd.f32 %v757_v46, %v705_v37  ;;  %vm902_vm11 = vcmp.ge.f32.partialorder %v886_v43, 0.0  ;;  %v918_v50 = vmul.f32 0.1, %v886_v43 }
 0x123   :  { %993 = vst [vmem:[%s1713_s6 + $0x8] sm:$0xff] %v1119_v41  ;;  %vm903_vm12 = vcmp.ge.f32.partialorder %v887_v14, 0.0  ;;  %v919_v52 = vmul.f32 0.1, %v887_v14  ;;  %v890_v53 = vadd.f32 %v1624_v21, %v850_v44  ;;  %813 = vst [vmem:[%s1712_s5 + $0x28] sm:$0xff] %v1115_v47  ;;  %v891_v63 = vadd.f32 %v1624_v21, %v851_v48 }
 0x124   :  { %v894_v42 = vadd.f32 %v1645_v57, %v854_v49  ;;  %v1117_v54 = vpack.c.bf16 %v758_v38, %v756_v1  ;;  %v934_v55 = vsel %vm902_vm11, %v886_v43, %v918_v50  ;;  %v855_v33 = vmul.f32 %v1602_v45, %v758_v38 }
 0x125   :  { %v935_v56 = vsel %vm903_vm12, %v887_v14, %v919_v52  ;;  %vm906_vm13 = vcmp.ge.f32.partialorder %v890_v53, 0.0  ;;  %v922_v59 = vmul.f32 0.1, %v890_v53  ;;  %vm907_vm14 = vcmp.ge.f32.partialorder %v891_v63, 0.0 }
 0x126   :  { %v1121_v58 = vpack.c.bf16 %v935_v56, %v934_v55  ;;  %815 = vst [vmem:[%s1712_s5 + $0x38] sm:$0xff] %v1117_v54  ;;  %v923_v60 = vmul.f32 0.1, %v891_v63  ;;  %v926_v61 = vmul.f32 0.1, %v894_v42  ;;  %v895_v62 = vadd.f32 %v1645_v57, %v855_v33 }
 0x127   :  { %vm910_vm15 = vcmp.ge.f32.partialorder %v894_v42, 0.0  ;;  %v938_v21 = vsel %vm906_vm13, %v890_v53, %v922_v59 }
 0x128   :  { %995 = vst [vmem:[%s1713_s6 + $0x18] sm:$0xff] %v1121_v58  ;;  %v939_v0 = vsel %vm907_vm14, %v891_v63, %v923_v60  ;;  %vm911_vm0 = vcmp.ge.f32.partialorder %v895_v62, 0.0  ;;  %v927_v45 = vmul.f32 0.1, %v895_v62  ;;  %v942_v3 = vsel %vm910_vm15, %v894_v42, %v926_v61 }
 0x129   :  { %v1123_v2 = vpack.c.bf16 %v939_v0, %v938_v21 }
 0x12a   :  { %v943_v4 = vsel %vm911_vm0, %v895_v62, %v927_v45 }
 0x12b   :  { %997 = vst [vmem:[%s1713_s6 + $0x28] sm:$0xff] %v1123_v2  ;;  %v1125_v5 = vpack.c.bf16 %v943_v4, %v942_v3 }
 0x12d   :  { %999 = vst [vmem:[%s1713_s6 + $0x38] sm:$0xff] %v1125_v5 }

// kernel: _lambda_.13
= control target key start
LH: loop header
LB: loop body
LE: loop exit
PB: predicated region body
PF: predicated region fallthrough
CT: control target
= control target key end

     0   :  { %v1509_v1 = vmov 0   ;;  %vm577_vm0 = vcmask 261120   ;;  %s2166_s1 = inlined_call_operand.vmem [shape: bf16[288,512], index: 1, kind: input, shape index: {}]   ;;  %s2167_s0 = inlined_call_operand.vmem [shape: bf16[64,288], index: 0, kind: input, shape index: {}]   ;;  %s2168_s2 = inlined_call_operand.vmem [shape: f32[64,1], index: 2, kind: input, shape index: {}]   ;;  %s2169_s3 = inlined_call_operand.vmem [shape: f32[64,1], index: 3, kind: input, shape index: {}]   ;;  %s2170_s4 = inlined_call_operand.vmem [shape: f32[64,1], index: 4, kind: input, shape index: {}]   ;;  %s2171_s5 = inlined_call_operand.vmem [shape: bf16[64,512], index: 5, kind: output, shape index: {}]  }
   0x1   :  { %v1385_v0 = vld [vmem:[%s2166_s1 + $0xe4] ss:$16 sps:$4 sm:$0xff]   ;;  %695 = vmatprep.mubr.bf16.mxu1 %v1509_v1  ;;  %1384 = vset.pattern.permute.xlu1 %v1509_v1  ;;  %v1389_v3 = vld [vmem:[%s2166_s1 + $0xe0] ss:$16 sps:$4 sm:$0xff]   ;;  %v1399_v10 = vld [vmem:[%s2166_s1 + $0xe8] ss:$16 sps:$4 sm:$0xff]  }
   0x2   :  { %v1387_v2 = vld [vmem:[%s2166_s1 + $0x224] ss:$16 sps:$4 sm:$0xff]   ;;  %1383 = vset.pattern.permute.xlu0 %v1509_v1  ;;  %590 = vmatprep.subr.bf16.mxu0 %v1385_v0  ;;  %v1390_v4 = vld [vmem:[%s2166_s1 + $0x220] ss:$16 sps:$4 sm:$0xff]   ;;  %v1401_v11 = vld [vmem:[%s2166_s1 + $0xec] ss:$16 sps:$4 sm:$0xff]  }
   0x3   :  { %675 = vmatprep.subr.bf16.mxu1 %v1387_v2  ;;  %v1391_v5 = vld [vmem:[%s2166_s1 + $0xc4] ss:$16 sps:$4 sm:$0xff]   ;;  %591 = vmatpush1.bf16.msra.mxu0 %v1389_v3  ;;  %v1395_v7 = vld [vmem:[%s2166_s1 + $0xc0] ss:$16 sps:$4 sm:$0xff]   ;;  %v1406_v15 = vld [vmem:[%s2166_s1 + $0xc8] ss:$16 sps:$4 sm:$0xff]  }
   0x4   :  { %676 = vmatpush1.bf16.msra.mxu1 %v1390_v4  ;;  %v1393_v6 = vld [vmem:[%s2166_s1 + $0x204] ss:$16 sps:$4 sm:$0xff]   ;;  %592 = vmatprep.subr.bf16.mxu0 %v1391_v5  ;;  %v1396_v8 = vld [vmem:[%s2166_s1 + $0x200] ss:$16 sps:$4 sm:$0xff]   ;;  %v1408_v16 = vld [vmem:[%s2166_s1 + $0xcc] ss:$16 sps:$4 sm:$0xff]  }
   0x5   :  { %677 = vmatprep.subr.bf16.mxu1 %v1393_v6  ;;  %v1397_v9 = vld [vmem:[%s2166_s1 + $0xa4] ss:$16 sps:$4 sm:$0xff]   ;;  %v1402_v12 = vld [vmem:[%s2166_s1 + $0xa0] ss:$16 sps:$4 sm:$0xff]   ;;  %v1414_v19 = vld [vmem:[%s2166_s1 + $0xac] ss:$16 sps:$4 sm:$0xff]  }
   0x6   :  { %v1582_v13 = vld [vmem:[%s2167_s0 + $0x8] ss:$12 sps:$4 sm:$0xff]   ;;  %v1409_v17 = vld [vmem:[%s2166_s1 + $0x80] ss:$16 sps:$4 sm:$0xff]   ;;  %v1420_v23 = vld [vmem:[%s2166_s1 + $0x8c] ss:$16 sps:$4 sm:$0xff]  }
   0x7   :  { %593 = vmatpush1.bf16.msra.mxu0 %v1395_v7  ;;  %v1404_v14 = vld [vmem:[%s2166_s1 + $0x84] ss:$16 sps:$4 sm:$0xff]   ;;  %v1412_v20 = vld [vmem:[%s2166_s1 + $0xa8] ss:$16 sps:$4 sm:$0xff]   ;;  %v1415_v21 = vld [vmem:[%s2166_s1 + $0x60] ss:$16 sps:$4 sm:$0xff]  }
   0x8   :  { %678 = vmatpush1.bf16.msra.mxu1 %v1396_v8  ;;  %594 = vmatprep.subr.bf16.mxu0 %v1397_v9  ;;  %v1410_v18 = vld [vmem:[%s2166_s1 + $0x64] ss:$16 sps:$4 sm:$0xff]   ;;  %v1418_v24 = vld [vmem:[%s2166_s1 + $0x88] ss:$16 sps:$4 sm:$0xff]   ;;  %v1421_v25 = vld [vmem:[%s2166_s1 + $0x40] ss:$16 sps:$4 sm:$0xff]  }
   0x9   :  { %736 = vmatprep.subr.bf16.mxu1 %v1401_v11  ;;  %v1416_v22 = vld [vmem:[%s2166_s1 + $0x44] ss:$16 sps:$4 sm:$0xff]   ;;  %v1426_v27 = vld [vmem:[%s2166_s1 + $0x6c] ss:$16 sps:$4 sm:$0xff]   ;;  %v1424_v28 = vld [vmem:[%s2166_s1 + $0x68] ss:$16 sps:$4 sm:$0xff]  }
   0xa   :  { %v1422_v26 = vld [vmem:[%s2166_s1 + $0x24] ss:$16 sps:$4 sm:$0xff]   ;;  %v1427_v29 = vld [vmem:[%s2166_s1 + $0x20] ss:$16 sps:$4 sm:$0xff]   ;;  %v1432_v31 = vld [vmem:[%s2166_s1 + $0x4c] ss:$16 sps:$4 sm:$0xff]  }
   0xb   :  { %1338 = vmatmul.mubr.msk.bf16.vlgmr.msra.gmra.mxu1 %vm577_vm0, %v1582_v13  ;;  %595 = vmatpush1.bf16.msra.mxu0 %v1402_v12  ;;  %v1428_v30 = vld [vmem:[%s2166_s1 + $0x4] ss:$16 sps:$4 sm:$0xff]   ;;  %v1430_v32 = vld [vmem:[%s2166_s1 + $0x48] ss:$16 sps:$4 sm:$0xff]   ;;  %v1433_v33 = vld [vmem:[%s2166_s1] ss:$16 sps:$4 sm:$0xff]  }
   0xc   :  { %737 = vmatpush1.bf16.msra.mxu1 %v1399_v10  ;;  %596 = vmatprep.subr.bf16.mxu0 %v1404_v14  ;;  %v1434_v34 = vld [vmem:[%s2166_s1 + $0x1e4] ss:$16 sps:$4 sm:$0xff]   ;;  %v1438_v35 = vld [vmem:[%s2166_s1 + $0x2c] ss:$16 sps:$4 sm:$0xff]   ;;  %v1436_v36 = vld [vmem:[%s2166_s1 + $0x28] ss:$16 sps:$4 sm:$0xff]  }
   0xd   :  { %738 = vmatprep.subr.bf16.mxu1 %v1408_v16  ;;  %705 = vmatprep.mubr.bf16.mxu1 %v1509_v1  ;;  %v1439_v37 = vld [vmem:[%s2166_s1 + $0x1e0] ss:$16 sps:$4 sm:$0xff]   ;;  %v1440_v38 = vld [vmem:[%s2166_s1 + $0x1c4] ss:$16 sps:$4 sm:$0xff]   ;;  %v1444_v39 = vld [vmem:[%s2166_s1 + $0xc] ss:$16 sps:$4 sm:$0xff]  }
   0xe   :  { %v1668_v40 = vld [vmem:[%s2167_s0 + $0x20] ss:$12 sps:$4 sm:$0xff]   ;;  %v1442_v41 = vld [vmem:[%s2166_s1 + $0x8] ss:$16 sps:$4 sm:$0xff]   ;;  %v1446_v43 = vld [vmem:[%s2166_s1 + $0x1a4] ss:$16 sps:$4 sm:$0xff]  }
   0xf   :  { %597 = vmatpush1.bf16.msra.mxu0 %v1409_v17  ;;  %v1445_v42 = vld [vmem:[%s2166_s1 + $0x1c0] ss:$16 sps:$4 sm:$0xff]   ;;  %v1450_v44 = vld [vmem:[%s2166_s1 + $0x1ec] ss:$16 sps:$4 sm:$0xff]   ;;  %v1448_v45 = vld [vmem:[%s2166_s1 + $0x1e8] ss:$16 sps:$4 sm:$0xff]  }
  0x10   :  { %739 = vmatpush1.bf16.msra.mxu1 %v1406_v15  ;;  %598 = vmatprep.subr.bf16.mxu0 %v1410_v18  ;;  %v1451_v46 = vld [vmem:[%s2166_s1 + $0x1a0] ss:$16 sps:$4 sm:$0xff]   ;;  %v1452_v47 = vld [vmem:[%s2166_s1 + $0x184] ss:$16 sps:$4 sm:$0xff]   ;;  %v1456_v48 = vld [vmem:[%s2166_s1 + $0x1cc] ss:$16 sps:$4 sm:$0xff]  }
  0x11   :  { %740 = vmatprep.subr.bf16.mxu1 %v1414_v19  ;;  %v1700_v49 = vld [vmem:[%s2167_s0 + $0x38] ss:$12 sps:$4 sm:$0xff]   ;;  %v1457_v51 = vld [vmem:[%s2166_s1 + $0x180] ss:$16 sps:$4 sm:$0xff]   ;;  %v1463_v53 = vld [vmem:[%s2166_s1 + $0x1ac] ss:$16 sps:$4 sm:$0xff]  }
  0x12   :  { %v1454_v50 = vld [vmem:[%s2166_s1 + $0x1c8] ss:$16 sps:$4 sm:$0xff]   ;;  %v1458_v52 = vld [vmem:[%s2166_s1 + $0x164] ss:$16 sps:$4 sm:$0xff]   ;;  %v1464_v56 = vld [vmem:[%s2166_s1 + $0x160] ss:$16 sps:$4 sm:$0xff]  }
  0x13   :  { %599 = vmatpush1.bf16.msra.mxu0 %v1415_v21  ;;  %1339 = vmatmul.mubr.msk.bf16.gmra.mxu1 %vm577_vm0, %v1668_v40  ;;  %v1461_v54 = vld [vmem:[%s2166_s1 + $0x1a8] ss:$16 sps:$4 sm:$0xff]   ;;  %v1486_v55 = vld [vmem:[%s2167_s0 + $0x4] ss:$12 sps:$4 sm:$0xff]   ;;  %v1469_v58 = vld [vmem:[%s2166_s1 + $0x18c] ss:$16 sps:$4 sm:$0xff]  }
  0x14   :  { %741 = vmatpush1.bf16.msra.mxu1 %v1412_v20  ;;  %600 = vmatprep.subr.bf16.mxu0 %v1416_v22  ;;  %v1465_v57 = vld [vmem:[%s2166_s1 + $0x144] ss:$16 sps:$4 sm:$0xff]   ;;  %v1735_v59 = vld [vmem:[%s2167_s0 + $0x50] ss:$12 sps:$4 sm:$0xff]   ;;  %v1467_v60 = vld [vmem:[%s2166_s1 + $0x188] ss:$16 sps:$4 sm:$0xff]  }
  0x15   :  { %742 = vmatprep.subr.bf16.mxu1 %v1420_v23  ;;  %715 = vmatprep.mubr.bf16.mxu1 %v1509_v1  ;;  %v1470_v61 = vld [vmem:[%s2166_s1 + $0x140] ss:$16 sps:$4 sm:$0xff]   ;;  %v1471_v62 = vld [vmem:[%s2166_s1 + $0x124] ss:$16 sps:$4 sm:$0xff]   ;;  %v1476_v63 = vld [vmem:[%s2166_s1 + $0x16c] ss:$16 sps:$4 sm:$0xff]  }
  0x16   :  { %622 = vmatprep.mubr.bf16.mxu0 %v1486_v55  ;;  %v1474_v0 = vld [vmem:[%s2166_s1 + $0x168] ss:$16 sps:$4 sm:$0xff]   ;;  %v1477_v2 = vld [vmem:[%s2166_s1 + $0x120] ss:$16 sps:$4 sm:$0xff]   ;;  %v1478_v3 = vld [vmem:[%s2166_s1 + $0x104] ss:$16 sps:$4 sm:$0xff]  }
  0x17   :  { %601 = vmatpush1.bf16.msra.mxu0 %v1421_v25  ;;  %v1482_v4 = vld [vmem:[%s2166_s1 + $0x14c] ss:$16 sps:$4 sm:$0xff]   ;;  %v111_v5 = vld [vmem:[%s2168_s2 + $0x10] sm:$0xff]  ;;  %v109_v6 = vld [vmem:[%s2168_s2] sm:$0xff] }
  0x18   :  { %743 = vmatpush1.bf16.msra.mxu1 %v1418_v24  ;;  %602 = vmatprep.subr.bf16.mxu0 %v1422_v26  ;;  %v112_v7 = vld [vmem:[%s2168_s2 + $0x18] sm:$0xff]  ;;  %v110_v8 = vld [vmem:[%s2168_s2 + $0x8] sm:$0xff]  ;;  %v1483_v10 = vld [vmem:[%s2166_s1 + $0x100] ss:$16 sps:$4 sm:$0xff]  }
  0x19   :  { %744 = vmatprep.subr.bf16.mxu1 %v1426_v27  ;;  %129 = vperm.xlu1 %1384, %v111_v5   ;;  %v1480_v9 = vld [vmem:[%s2166_s1 + $0x148] ss:$16 sps:$4 sm:$0xff]   ;;  %v1490_v11 = vld [vmem:[%s2166_s1 + $0x12c] ss:$16 sps:$4 sm:$0xff]   ;;  %v113_v16 = vld [vmem:[%s2168_s2 + $0x20] sm:$0xff] }
  0x1a   :  { %119 = vperm.xlu0 %1383, %v109_v6   ;;  %v1493_v12 = vld [vmem:[%s2166_s1 + $0x22c] ss:$16 sps:$4 sm:$0xff]   ;;  %v1488_v17 = vld [vmem:[%s2166_s1 + $0x128] ss:$16 sps:$4 sm:$0xff]   ;;  %v115_v25 = vld [vmem:[%s2168_s2 + $0x30] sm:$0xff] }
  0x1b   :  { %603 = vmatpush1.bf16.msra.mxu0 %v1427_v29  ;;  %1340 = vmatmul.mubr.msk.bf16.gmra.mxu1 %vm577_vm0, %v1700_v49  ;;  %v1484_v14 = vld [vmem:[%s2167_s0] ss:$12 sps:$4 sm:$0xff]   ;;  %v1491_v18 = vld [vmem:[%s2166_s1 + $0x228] ss:$16 sps:$4 sm:$0xff]  }
  0x1c   :  { %745 = vmatpush1.bf16.msra.mxu1 %v1424_v28  ;;  %604 = vmatprep.subr.bf16.mxu0 %v1428_v30  ;;  %v114_v15 = vld [vmem:[%s2168_s2 + $0x28] sm:$0xff]  ;;  %v116_v22 = vld [vmem:[%s2168_s2 + $0x38] sm:$0xff]  ;;  %v1500_v28 = vld [vmem:[%s2167_s0 + $0x34] ss:$12 sps:$4 sm:$0xff]  }
  0x1d   :  { %746 = vmatprep.subr.bf16.mxu1 %v1432_v31  ;;  %725 = vmatprep.mubr.bf16.mxu1 %v1509_v1  ;;  %v1496_v19 = vld [vmem:[%s2166_s1 + $0x10c] ss:$16 sps:$4 sm:$0xff]   ;;  %v1494_v23 = vld [vmem:[%s2166_s1 + $0x108] ss:$16 sps:$4 sm:$0xff]   ;;  %v882_v29 = vld [vmem:[%s2169_s3] sm:$0xff] }
  0x1e   :  { %134 = vperm.xlu1 %1384, %v112_v7   ;;  %124 = vperm.xlu0 %1383, %v110_v8   ;;  %v1497_v20 = vld [vmem:[%s2167_s0 + $0x1c] ss:$12 sps:$4 sm:$0xff]   ;;  %v1499_v26 = vld [vmem:[%s2167_s0 + $0x18] ss:$12 sps:$4 sm:$0xff]   ;;  %v884_v31 = vld [vmem:[%s2169_s3 + $0x10] sm:$0xff] }
  0x1f   :  { %605 = vmatpush1.bf16.msra.mxu0 %v1433_v33  ;;  %v1505_v21 = vld [vmem:[%s2166_s1 + $0x20c] ss:$16 sps:$4 sm:$0xff]   ;;  %v1503_v24 = vld [vmem:[%s2166_s1 + $0x208] ss:$16 sps:$4 sm:$0xff]  }
  0x20   :  { %747 = vmatpush1.bf16.msra.mxu1 %v1430_v32  ;;  %606 = vmatprep.subr.bf16.mxu0 %v1434_v34  ;;  %v883_v27 = vld [vmem:[%s2169_s3 + $0x8] sm:$0xff]  ;;  %v885_v30 = vld [vmem:[%s2169_s3 + $0x18] sm:$0xff] }
  0x21   :  { %748 = vmatprep.subr.bf16.mxu1 %v1438_v35  ;;  %v1502_v32 = vld [vmem:[%s2167_s0 + $0x30] ss:$12 sps:$4 sm:$0xff]   ;;  %v887_v33 = vld [vmem:[%s2169_s3 + $0x28] sm:$0xff]  ;;  %v886_v35 = vld [vmem:[%s2169_s3 + $0x20] sm:$0xff] }
  0x22   :  { %144 = vperm.xlu1 %1384, %v114_v15   ;;  %139 = vperm.xlu0 %1383, %v113_v16   ;;  %v1506_v34 = vld [vmem:[%s2167_s0 + $0x4c] ss:$12 sps:$4 sm:$0xff]  }
  0x23   :  { %607 = vmatpush2.bf16.msra.mxu0 %v1439_v37  ;;  %1341 = vmatmul.mubr.msk.bf16.gmra.mxu1 %vm577_vm0, %v1735_v59  ;;  %v888_v37 = vld [vmem:[%s2169_s3 + $0x30] sm:$0xff] }
  0x24   :  { %749 = vmatpush1.bf16.msra.mxu1 %v1436_v36  ;;  %608 = vmatprep.subr.bf16.mxu0 %v1440_v38  ;;  %v889_v36 = vld [vmem:[%s2169_s3 + $0x38] sm:$0xff]  ;;  %v1508_v38 = vld [vmem:[%s2167_s0 + $0x48] ss:$12 sps:$4 sm:$0xff]  }
  0x25   :  { %750 = vmatprep.subr.bf16.mxu1 %v1444_v39  ;;  %768 = vmatprep.mubr.bf16.mxu1 %v1486_v55  ;;  %v963_v39 = vld [vmem:[%s2170_s4 + $0x8] sm:$0xff] }
  0x26   :  { %154 = vperm.xlu1 %1384, %v116_v22   ;;  %149 = vperm.xlu0 %1383, %v115_v25  }
  0x27   :  { %609 = vmatpush2.bf16.msra.mxu0 %v1445_v42  ;;  %v965_v42 = vld [vmem:[%s2170_s4 + $0x18] sm:$0xff] }
  0x28   :  { %751 = vmatpush1.bf16.msra.mxu1 %v1442_v41  ;;  %610 = vmatprep.subr.bf16.mxu0 %v1446_v43  ;;  %v962_v41 = vld [vmem:[%s2170_s4] sm:$0xff]  ;;  %v964_v43 = vld [vmem:[%s2170_s4 + $0x10] sm:$0xff] }
  0x29   :  { %752 = vmatprep.subr.bf16.mxu1 %v1450_v44  ;;  %v967_v44 = vld [vmem:[%s2170_s4 + $0x28] sm:$0xff] }
  0x2a   :  { %897 = vperm.xlu1 %1384, %v883_v27   ;;  %892 = vperm.xlu0 %1383, %v882_v29  }
  0x2b   :  { %611 = vmatpush2.bf16.msra.mxu0 %v1451_v46  ;;  %v969_v46 = vld [vmem:[%s2170_s4 + $0x38] sm:$0xff] }
  0x2c   :  { %753 = vmatpush2.bf16.msra.mxu1 %v1448_v45  ;;  %612 = vmatprep.subr.bf16.mxu0 %v1452_v47  ;;  %v966_v45 = vld [vmem:[%s2170_s4 + $0x20] sm:$0xff]  ;;  %v968_v47 = vld [vmem:[%s2170_s4 + $0x30] sm:$0xff] }
  0x2d   :  { %754 = vmatprep.subr.bf16.mxu1 %v1456_v48 }
  0x2e   :  { %907 = vperm.xlu1 %1384, %v885_v30   ;;  %902 = vperm.xlu0 %1383, %v884_v31  }
  0x2f   :  { %613 = vmatpush2.bf16.msra.mxu0 %v1457_v51 }
  0x30   :  { %755 = vmatpush2.bf16.msra.mxu1 %v1454_v50  ;;  %614 = vmatprep.subr.bf16.mxu0 %v1458_v52 }
  0x31   :  { %756 = vmatprep.subr.bf16.mxu1 %v1463_v53 }
  0x32   :  { %917 = vperm.xlu1 %1384, %v887_v33   ;;  %912 = vperm.xlu0 %1383, %v886_v35  }
  0x33   :  { %615 = vmatpush2.bf16.msra.mxu0 %v1464_v56 }
  0x34   :  { %757 = vmatpush2.bf16.msra.mxu1 %v1461_v54  ;;  %616 = vmatprep.subr.bf16.mxu0 %v1465_v57 }
  0x35   :  { %758 = vmatprep.subr.bf16.mxu1 %v1469_v58 }
  0x36   :  { %927 = vperm.xlu1 %1384, %v889_v36   ;;  %922 = vperm.xlu0 %1383, %v888_v37  }
  0x37   :  { %617 = vmatpush2.bf16.msra.mxu0 %v1470_v61 }
  0x38   :  { %759 = vmatpush2.bf16.msra.mxu1 %v1467_v60  ;;  %618 = vmatprep.subr.bf16.mxu0 %v1471_v62 }
  0x39   :  { %760 = vmatprep.subr.bf16.mxu1 %v1476_v63 }
  0x3a   :  { %977 = vperm.xlu1 %1384, %v963_v39   ;;  %972 = vperm.xlu0 %1383, %v962_v41  }
  0x3b   :  { %619 = vmatpush2.bf16.msra.mxu0 %v1477_v2 }
  0x3c   :  { %761 = vmatpush2.bf16.msra.mxu1 %v1474_v0  ;;  %620 = vmatprep.subr.bf16.mxu0 %v1478_v3 }
  0x3d   :  { %762 = vmatprep.subr.bf16.mxu1 %v1482_v4 }
  0x3e   :  { %987 = vperm.xlu1 %1384, %v965_v42   ;;  %982 = vperm.xlu0 %1383, %v964_v43  }
  0x3f   :  { %621 = vmatpush2.bf16.msra.mxu0 %v1483_v10 }
  0x40   :  { %763 = vmatpush2.bf16.msra.mxu1 %v1480_v9  ;;  %821 = vmatprep.subr.bf16.mxu0 %v1493_v12 }
  0x41   :  { %764 = vmatprep.subr.bf16.mxu1 %v1490_v11 }
  0x42   :  { %623 = vmatmul.mubr.bf16.vlgmr.msra.gmra.mxu0 %v1484_v14  ;;  %997 = vperm.xlu1 %1384, %v967_v44  }
  0x43   :  { %822 = vmatpush1.bf16.msra.mxu0 %v1491_v18  ;;  %632 = vmatprep.mubr.bf16.mxu0 %v1497_v20 }
  0x44   :  { %765 = vmatpush2.bf16.msra.mxu1 %v1488_v17  ;;  %823 = vmatprep.subr.bf16.mxu0 %v1505_v21 }
  0x45   :  { %766 = vmatprep.subr.bf16.mxu1 %v1496_v19  ;;  %992 = vperm.xlu0 %1383, %v966_v45  }
  0x46   :  { %1007 = vperm.xlu1 %1384, %v969_v46  }
  0x47   :  { %824 = vmatpush1.bf16.msra.mxu0 %v1503_v24 }
  0x48   :  { %767 = vmatpush2.bf16.msra.mxu1 %v1494_v23 }
  0x49   :  { %1378 = vmatprep.subr.bf16.mxu1 %v1493_v12  ;;  %1002 = vperm.xlu0 %1383, %v968_v47  }
  0x4a   :  { %633 = vmatmul.mubr.bf16.gmra.mxu0 %v1499_v26 }
  0x4b   :  { %769 = vmatmul.mubr.bf16.vlgmr.msra.gmra.mxu1 %v1484_v14  ;;  %642 = vmatprep.mubr.bf16.mxu0 %v1500_v28 }
  0x4c   :  { %778 = vmatprep.mubr.bf16.mxu1 %v1497_v20  ;;  %1380 = vmatpush1.bf16.msra.mxu1 %v1491_v18 }
  0x4d   :  { %1379 = vmatprep.subr.bf16.mxu1 %v1505_v21 }
  0x50   :  { %1381 = vmatpush1.bf16.msra.mxu1 %v1503_v24 }
  0x52   :  { %643 = vmatmul.mubr.bf16.gmra.mxu0 %v1502_v32 }
  0x53   :  { %779 = vmatmul.mubr.bf16.gmra.mxu1 %v1499_v26  ;;  %652 = vmatprep.mubr.bf16.mxu0 %v1506_v34 }
  0x54   :  { %788 = vmatprep.mubr.bf16.mxu1 %v1500_v28 }
  0x5a   :  { %653 = vmatmul.mubr.bf16.gmra.mxu0 %v1508_v38 }
  0x5b   :  { %789 = vmatmul.mubr.bf16.gmra.mxu1 %v1502_v32  ;;  %841 = vmatprep.mubr.bf16.mxu0 %v1509_v1 }
  0x5c   :  { %798 = vmatprep.mubr.bf16.mxu1 %v1506_v34 }
  0x62   :  { %1342 = vmatmul.mubr.msk.bf16.vlgmr.msra.gmra.mxu0 %vm577_vm0, %v1582_v13 }
  0x63   :  { %799 = vmatmul.mubr.bf16.gmra.mxu1 %v1508_v38  ;;  %851 = vmatprep.mubr.bf16.mxu0 %v1509_v1 }
  0x64   :  { %871 = vmatprep.mubr.bf16.mxu1 %v1509_v1 }
  0x6a   :  { %1343 = vmatmul.mubr.msk.bf16.gmra.mxu0 %vm577_vm0, %v1668_v40 }
  0x6b   :  { %1345 = vmatmul.mubr.msk.bf16.vlgmr.msra.gmra.mxu1 %vm577_vm0, %v1735_v59  ;;  %861 = vmatprep.mubr.bf16.mxu0 %v1509_v1 }
  0x72   :  { %1344 = vmatmul.mubr.msk.bf16.gmra.mxu0 %vm577_vm0, %v1700_v49 }
  0x94   :  { %v1900_v51 = vpop.permute.xlu1 %129 }
  0x95   :  { %v1898_v48 = vpop.permute.xlu0 %119 }
  0x99   :  { %v1902_v52 = vpop.permute.xlu0 %124  ;;  %v1904_v54 = vpop.permute.xlu1 %134 }
  0x9d   :  { %v1906_v55 = vpop.permute.xlu0 %139  ;;  %v1908_v57 = vpop.permute.xlu1 %144 }
  0xa1   :  { %v1912_v49 = vpop.permute.xlu0 %149  ;;  %v1918_v60 = vpop.permute.xlu1 %154 }
  0xa5   :  { %v1922_v62 = vpop.permute.xlu0 %892  ;;  %v1928_v2 = vpop.permute.xlu1 %897 }
  0xa9   :  { %v1930_v3 = vpop.permute.xlu0 %902  ;;  %v1934_v5 = vpop.permute.xlu1 %907 }
  0xad   :  { %v1938_v7 = vpop.permute.xlu0 %912  ;;  %v1942_v9 = vpop.permute.xlu1 %917 }
  0xb1   :  { %v1944_v10 = vpop.permute.xlu0 %922  ;;  %v1949_v16 = vpop.permute.xlu1 %927 }
  0xb5   :  { %v1956_v24 = vpop.permute.xlu0 %972  ;;  %v1961_v32 = vpop.permute.xlu1 %977 }
  0xcb   :  { %v697_v13 = vpop.f32.mrf.mxu1 }
  0xcd   :  { %v699_v50 = vpop.f32.mrf.mxu1 }
  0xcf   :  { %v701_v53 = vpop.f32.mrf.mxu1 }
  0xd1   :  { %v703_v40 = vpop.f32.mrf.mxu1 }
  0xd3   :  { %v707_v56 = vpop.f32.mrf.mxu1 }
  0xd5   :  { %v1910_v1 = vpop.f32.mrf.mxu1 }
  0xd7   :  { %v1914_v58 = vpop.f32.mrf.mxu1 }
  0xd9   :  { %v1916_v59 = vpop.f32.mrf.mxu1 }
  0xdb   :  { %v1920_v61 = vpop.f32.mrf.mxu1 }
  0xdd   :  { %v1924_v63 = vpop.f32.mrf.mxu1 }
  0xdf   :  { %v1926_v0 = vpop.f32.mrf.mxu1 }
  0xe1   :  { %v1932_v4 = vpop.f32.mrf.mxu1 }
  0xe3   :  { %v1936_v6 = vpop.f32.mrf.mxu1 }
  0xe5   :  { %v1940_v8 = vpop.f32.mrf.mxu1 }
  0xe7   :  { %v1946_v12 = vpop.f32.mrf.mxu1 }
  0xe9   :  { %v1952_v20 = vpop.f32.mrf.mxu1 }
 0x102   :  { %v624_v11 = vpop.f32.mrf.mxu0 }
 0x103   :  { %v625_v14 = vadd.f32 %v624_v11, %v1898_v48 }
 0x104   :  { %v626_v15 = vpop.f32.mrf.mxu0 }
 0x105   :  { %v698_v17 = vadd.f32 %v697_v13, %v625_v14  ;;  %v627_v18 = vadd.f32 %v626_v15, %v1898_v48 }
 0x106   :  { %v628_v19 = vpop.f32.mrf.mxu0 }
 0x107   :  { %v930_v21 = vmul.f32 %v1922_v62, %v698_v17  ;;  %v700_v22 = vadd.f32 %v699_v50, %v627_v18  ;;  %v629_v23 = vadd.f32 %v628_v19, %v1902_v52 }
 0x108   :  { %v630_v25 = vpop.f32.mrf.mxu0 }
 0x109   :  { %v931_v26 = vmul.f32 %v1922_v62, %v700_v22  ;;  %v1010_v27 = vadd.f32 %v1956_v24, %v930_v21  ;;  %v702_v28 = vadd.f32 %v701_v53, %v629_v23  ;;  %v631_v29 = vadd.f32 %v630_v25, %v1902_v52  ;;  %v1973_v21 = vpop.permute.xlu0 %982 }
 0x10a   :  { %v634_v30 = vpop.f32.mrf.mxu0 }
 0x10b   :  { %v770_v31 = vpop.f32.mrf.mxu1  ;;  %v1011_v33 = vadd.f32 %v1956_v24, %v931_v26  ;;  %vm1042_vm1 = vcmp.ge.f32.partialorder %v1010_v27, 0.0  ;;  %v1074_v34 = vmul.f32 0.1, %v1010_v27  ;;  %v934_v35 = vmul.f32 %v1928_v2, %v702_v28 }
 0x10c   :  { %v704_v36 = vadd.f32 %v703_v40, %v631_v29  ;;  %v635_v37 = vadd.f32 %v634_v30, %v1900_v51  ;;  %v636_v38 = vpop.f32.mrf.mxu0 }
 0x10d   :  { %v772_v39 = vpop.f32.mrf.mxu1  ;;  %vm1043_vm2 = vcmp.ge.f32.partialorder %v1011_v33, 0.0  ;;  %v1075_v41 = vmul.f32 0.1, %v1011_v33  ;;  %v1014_v42 = vadd.f32 %v1961_v32, %v934_v35  ;;  %v1106_v43 = vsel %vm1042_vm1, %v1010_v27, %v1074_v34 }
 0x10e   :  { %v935_v44 = vmul.f32 %v1928_v2, %v704_v36  ;;  %v708_v45 = vadd.f32 %v707_v56, %v635_v37  ;;  %v637_v46 = vadd.f32 %v636_v38, %v1900_v51  ;;  %v638_v47 = vpop.f32.mrf.mxu0  ;;  %v1976_v56 = vadd.f32 %v770_v31, %v1898_v48 }
 0x10f   :  { %v774_v13 = vpop.f32.mrf.mxu1  ;;  %v1107_v50 = vsel %vm1043_vm2, %v1011_v33, %v1075_v41  ;;  %vm1046_vm3 = vcmp.ge.f32.partialorder %v1014_v42, 0.0  ;;  %v1078_v53 = vmul.f32 0.1, %v1014_v42  ;;  %v639_v40 = vadd.f32 %v638_v47, %v1904_v54 }
 0x110   :  { %v1362_v11 = vpack.c.bf16 %v1107_v50, %v1106_v43  ;;  %v1015_v14 = vadd.f32 %v1961_v32, %v935_v44  ;;  %v938_v15 = vmul.f32 %v1930_v3, %v708_v45  ;;  %v710_v17 = vadd.f32 %v1910_v1, %v637_v46  ;;  %v640_v18 = vpop.f32.mrf.mxu0 }
 0x111   :  { %v776_v19 = vpop.f32.mrf.mxu1  ;;  %v1979_v22 = vadd.f32 %v772_v39, %v1898_v48  ;;  %v712_v23 = vadd.f32 %v1914_v58, %v639_v40  ;;  %v641_v25 = vadd.f32 %v640_v18, %v1904_v54  ;;  %v1110_v30 = vsel %vm1046_vm3, %v1014_v42, %v1078_v53  ;;  %v1989_v48 = vpop.permute.xlu1 %987 }
 0x112   :  { %1234 = vst [vmem:[%s2171_s5] sm:$0xff] %v1362_v11  ;;  %vm1047_vm4 = vcmp.ge.f32.partialorder %v1015_v14, 0.0  ;;  %v1079_v1 = vmul.f32 0.1, %v1015_v14  ;;  %v1018_v26 = vadd.f32 %v1973_v21, %v938_v15  ;;  %v939_v27 = vmul.f32 %v1930_v3, %v710_v17  ;;  %v644_v28 = vpop.f32.mrf.mxu0  ;;  %v2012_v18 = vpop.permute.xlu0 %992 }
 0x113   :  { %v780_v29 = vpop.f32.mrf.mxu1  ;;  %v942_v58 = vmul.f32 %v1934_v5, %v712_v23  ;;  %v714_v31 = vadd.f32 %v1916_v59, %v641_v25  ;;  %v645_v33 = vadd.f32 %v644_v28, %v1906_v55  ;;  %v1999_v59 = vadd.f32 %v774_v13, %v1902_v52 }
 0x114   :  { %v1111_v34 = vsel %vm1047_vm4, %v1015_v14, %v1079_v1  ;;  %vm1050_vm5 = vcmp.ge.f32.partialorder %v1018_v26, 0.0  ;;  %v1082_v35 = vmul.f32 0.1, %v1018_v26  ;;  %v1019_v36 = vadd.f32 %v1973_v21, %v939_v27  ;;  %v646_v37 = vpop.f32.mrf.mxu0 }
 0x115   :  { %v782_v38 = vpop.f32.mrf.mxu1  ;;  %v1364_v39 = vpack.c.bf16 %v1111_v34, %v1110_v30  ;;  %v1022_v41 = vadd.f32 %v1989_v48, %v942_v58  ;;  %v943_v42 = vmul.f32 %v1934_v5, %v714_v31  ;;  %v718_v43 = vadd.f32 %v1920_v61, %v645_v33 }
 0x116   :  { %vm1051_vm6 = vcmp.ge.f32.partialorder %v1019_v36, 0.0  ;;  %v1083_v44 = vmul.f32 0.1, %v1019_v36  ;;  %v2002_v45 = vadd.f32 %v776_v19, %v1902_v52  ;;  %v648_v46 = vpop.f32.mrf.mxu0  ;;  %v1114_v50 = vsel %vm1050_vm5, %v1018_v26, %v1082_v35 }
 0x117   :  { %v784_v47 = vpop.f32.mrf.mxu1  ;;  %1236 = vst [vmem:[%s2171_s5 + $0x10] sm:$0xff] %v1364_v39  ;;  %v1086_v53 = vmul.f32 0.1, %v1022_v41  ;;  %v1023_v40 = vadd.f32 %v1989_v48, %v943_v42  ;;  %v946_v61 = vmul.f32 %v1938_v7, %v718_v43  ;;  %vm1054_vm7 = vcmp.ge.f32.partialorder %v1022_v41, 0.0 }
 0x118   :  { %v1115_v11 = vsel %vm1051_vm6, %v1019_v36, %v1083_v44  ;;  %v647_v13 = vadd.f32 %v646_v37, %v1906_v55  ;;  %v649_v52 = vadd.f32 %v648_v46, %v1908_v57  ;;  %v650_v14 = vpop.f32.mrf.mxu0  ;;  %v2015_v23 = vadd.f32 %v780_v29, %v1900_v51  ;;  %v2033_v37 = vpop.permute.xlu1 %997 }
 0x119   :  { %v786_v15 = vpop.f32.mrf.mxu1  ;;  %v1366_v17 = vpack.c.bf16 %v1115_v11, %v1114_v50  ;;  %vm1055_vm8 = vcmp.ge.f32.partialorder %v1023_v40, 0.0  ;;  %v1087_v19 = vmul.f32 0.1, %v1023_v40  ;;  %v1026_v25 = vadd.f32 %v2012_v18, %v946_v61 }
 0x11a   :  { %v720_v1 = vadd.f32 %v1924_v63, %v647_v13  ;;  %v2020_v26 = vadd.f32 %v782_v38, %v1900_v51  ;;  %v722_v27 = vadd.f32 %v1926_v0, %v649_v52  ;;  %v654_v28 = vpop.f32.mrf.mxu0  ;;  %v1118_v58 = vsel %vm1054_vm7, %v1022_v41, %v1086_v53  ;;  %v2049_v53 = vpop.permute.xlu0 %1002 }
 0x11b   :  { %v790_v30 = vpop.f32.mrf.mxu1  ;;  %1238 = vst [vmem:[%s2171_s5 + $0x20] sm:$0xff] %v1366_v17  ;;  %v1119_v31 = vsel %vm1055_vm8, %v1023_v40, %v1087_v19  ;;  %v651_v29 = vadd.f32 %v650_v14, %v1908_v57  ;;  %v655_v33 = vadd.f32 %v654_v28, %v1912_v49  ;;  %v1090_v63 = vmul.f32 0.1, %v1026_v25 }
 0x11c   :  { %v1368_v34 = vpack.c.bf16 %v1119_v31, %v1118_v58  ;;  %v947_v51 = vmul.f32 %v1938_v7, %v720_v1  ;;  %v2031_v35 = vadd.f32 %v784_v47, %v1904_v54  ;;  %v656_v0 = vpop.f32.mrf.mxu0  ;;  %vm1058_vm9 = vcmp.ge.f32.partialorder %v1026_v25, 0.0 }
 0x11d   :  { %v792_v36 = vpop.f32.mrf.mxu1  ;;  %v950_v38 = vmul.f32 %v1942_v9, %v722_v27  ;;  %v724_v39 = vadd.f32 %v1932_v4, %v651_v29  ;;  %v728_v41 = vadd.f32 %v1936_v6, %v655_v33  ;;  %v2043_v43 = vadd.f32 %v786_v15, %v1904_v54 }
 0x11e   :  { %1240 = vst [vmem:[%s2171_s5 + $0x30] sm:$0xff] %v1368_v34  ;;  %v1027_v42 = vadd.f32 %v2012_v18, %v947_v51  ;;  %v2046_v44 = vadd.f32 %v790_v30, %v1906_v55  ;;  %v657_v46 = vadd.f32 %v656_v0, %v1912_v49  ;;  %v658_v47 = vpop.f32.mrf.mxu0  ;;  %v1122_v54 = vsel %vm1058_vm9, %v1026_v25, %v1090_v63 }
 0x11f   :  { %v794_v50 = vpop.f32.mrf.mxu1  ;;  %v1030_v4 = vadd.f32 %v2033_v37, %v950_v38  ;;  %v951_v6 = vmul.f32 %v1942_v9, %v724_v39  ;;  %v954_v40 = vmul.f32 %v1944_v10, %v728_v41  ;;  %v659_v61 = vadd.f32 %v658_v47, %v1918_v60  ;;  %v2069_v38 = vpop.permute.xlu1 %1007 }
 0x120   :  { %vm1059_vm10 = vcmp.ge.f32.partialorder %v1027_v42, 0.0  ;;  %v1091_v11 = vmul.f32 0.1, %v1027_v42  ;;  %v730_v13 = vadd.f32 %v1940_v8, %v657_v46  ;;  %v660_v52 = vpop.f32.mrf.mxu0  ;;  %v2065_v29 = vadd.f32 %v792_v36, %v1906_v55 }
 0x121   :  { %v2057_v14 = vpop.f32.mrf.mxu1  ;;  %vm1062_vm11 = vcmp.ge.f32.partialorder %v1030_v4, 0.0  ;;  %v1094_v15 = vmul.f32 0.1, %v1030_v4  ;;  %v1031_v17 = vadd.f32 %v2033_v37, %v951_v6  ;;  %v1034_v19 = vadd.f32 %v2049_v53, %v954_v40 }
 0x122   :  { %v1123_v1 = vsel %vm1059_vm10, %v1027_v42, %v1091_v11  ;;  %v955_v27 = vmul.f32 %v1944_v10, %v730_v13  ;;  %v732_v28 = vadd.f32 %v1946_v12, %v659_v61  ;;  %v661_v25 = vadd.f32 %v660_v52, %v1918_v60  ;;  %v843_v58 = vpop.f32.mrf.mxu0 }
 0x123   :  { %v800_v30 = vpop.f32.mrf.mxu1  ;;  %v1370_v31 = vpack.c.bf16 %v1123_v1, %v1122_v54  ;;  %vm1063_vm12 = vcmp.ge.f32.partialorder %v1031_v17, 0.0  ;;  %v1095_v8 = vmul.f32 0.1, %v1031_v17  ;;  %vm1066_vm13 = vcmp.ge.f32.partialorder %v1034_v19, 0.0 }
 0x124   :  { %v1098_v33 = vmul.f32 0.1, %v1034_v19  ;;  %v1035_v34 = vadd.f32 %v2049_v53, %v955_v27  ;;  %v958_v63 = vmul.f32 %v1949_v16, %v732_v28  ;;  %v845_v0 = vpop.f32.mrf.mxu0  ;;  %v1126_v12 = vsel %vm1062_vm11, %v1030_v4, %v1094_v15 }
 0x125   :  { %v802_v51 = vpop.f32.mrf.mxu1  ;;  %1242 = vst [vmem:[%s2171_s5 + $0x40] sm:$0xff] %v1370_v31  ;;  %v1127_v39 = vsel %vm1063_vm12, %v1031_v17, %v1095_v8  ;;  %v2076_v55 = vadd.f32 %v794_v50, %v1908_v57  ;;  %v734_v36 = vadd.f32 %v1952_v20, %v661_v25  ;;  %v801_v46 = vadd.f32 %v800_v30, %v1912_v49 }
 0x126   :  { %v1372_v41 = vpack.c.bf16 %v1127_v39, %v1126_v12  ;;  %vm1067_vm14 = vcmp.ge.f32.partialorder %v1035_v34, 0.0  ;;  %v1099_v42 = vmul.f32 0.1, %v1035_v34  ;;  %v847_v6 = vpop.f32.mrf.mxu0  ;;  %v1130_v40 = vsel %vm1066_vm13, %v1034_v19, %v1098_v33 }
 0x127   :  { %v804_v47 = vpop.f32.mrf.mxu1  ;;  %v1038_v61 = vadd.f32 %v2069_v38, %v958_v63  ;;  %v959_v54 = vmul.f32 %v1949_v16, %v734_v36  ;;  %v844_v4 = vadd.f32 %v843_v58, %v1976_v56  ;;  %v803_v50 = vadd.f32 %v802_v51, %v1912_v49 }
 0x128   :  { %1244 = vst [vmem:[%s2171_s5 + $0x50] sm:$0xff] %v1372_v41  ;;  %v1131_v20 = vsel %vm1067_vm14, %v1035_v34, %v1099_v42  ;;  %v846_v11 = vadd.f32 %v845_v0, %v1979_v22  ;;  %v848_v13 = vadd.f32 %v847_v6, %v1999_v59  ;;  %v849_v15 = vpop.f32.mrf.mxu0  ;;  %v805_v28 = vadd.f32 %v804_v47, %v1918_v60 }
 0x129   :  { %v806_v52 = vpop.f32.mrf.mxu1  ;;  %v1374_v17 = vpack.c.bf16 %v1131_v20, %v1130_v40  ;;  %vm1070_vm15 = vcmp.ge.f32.partialorder %v1038_v61, 0.0  ;;  %v1102_v19 = vmul.f32 0.1, %v1038_v61  ;;  %v1039_v1 = vadd.f32 %v2069_v38, %v959_v54 }
 0x12a   :  { %v932_v56 = vmul.f32 %v1922_v62, %v844_v4  ;;  %v933_v27 = vmul.f32 %v1922_v62, %v846_v11  ;;  %v936_v25 = vmul.f32 %v1928_v2, %v848_v13  ;;  %v853_v49 = vpop.f32.mrf.mxu0  ;;  %v850_v58 = vadd.f32 %v849_v15, %v2002_v45 }
 0x12b   :  { %v873_v30 = vpop.f32.mrf.mxu1  ;;  %1246 = vst [vmem:[%s2171_s5 + $0x60] sm:$0xff] %v1374_v17  ;;  %v1134_v22 = vsel %vm1070_vm15, %v1038_v61, %v1102_v19  ;;  %vm1071_vm0 = vcmp.ge.f32.partialorder %v1039_v1, 0.0  ;;  %v1103_v59 = vmul.f32 0.1, %v1039_v1  ;;  %v854_v33 = vadd.f32 %v853_v49, %v2015_v23 }
 0x12c   :  { %v1012_v31 = vadd.f32 %v1956_v24, %v932_v56  ;;  %v1013_v8 = vadd.f32 %v1956_v24, %v933_v27  ;;  %v1016_v62 = vadd.f32 %v1961_v32, %v936_v25  ;;  %v855_v34 = vpop.f32.mrf.mxu0  ;;  %v937_v0 = vmul.f32 %v1928_v2, %v850_v58 }
 0x12d   :  { %v875_v63 = vpop.f32.mrf.mxu1  ;;  %v1135_v51 = vsel %vm1071_vm0, %v1039_v1, %v1103_v59  ;;  %v874_v12 = vadd.f32 %v873_v30, %v801_v46  ;;  %v856_v39 = vadd.f32 %v855_v34, %v2020_v26  ;;  %v940_v2 = vmul.f32 %v1930_v3, %v854_v33 }
 0x12e   :  { %v1376_v36 = vpack.c.bf16 %v1135_v51, %v1134_v22  ;;  %vm1044_vm1 = vcmp.ge.f32.partialorder %v1012_v31, 0.0  ;;  %v1076_v41 = vmul.f32 0.1, %v1012_v31  ;;  %vm1045_vm2 = vcmp.ge.f32.partialorder %v1013_v8, 0.0  ;;  %v857_v45 = vpop.f32.mrf.mxu0 }
 0x12f   :  { %v1077_v42 = vmul.f32 0.1, %v1013_v8  ;;  %vm1048_vm3 = vcmp.ge.f32.partialorder %v1016_v62, 0.0  ;;  %v1080_v24 = vmul.f32 0.1, %v1016_v62  ;;  %v1017_v47 = vadd.f32 %v1961_v32, %v937_v0  ;;  %v877_v6 = vpop.f32.mrf.mxu1 }
 0x130   :  { %1248 = vst [vmem:[%s2171_s5 + $0x70] sm:$0xff] %v1376_v36  ;;  %v1108_v23 = vsel %vm1044_vm1, %v1012_v31, %v1076_v41  ;;  %v956_v46 = vmul.f32 %v1944_v10, %v874_v12  ;;  %v941_v26 = vmul.f32 %v1930_v3, %v856_v39  ;;  %v859_v40 = vpop.f32.mrf.mxu0  ;;  %v1020_v32 = vadd.f32 %v1973_v21, %v940_v2 }
 0x131   :  { %v1109_v61 = vsel %vm1045_vm2, %v1013_v8, %v1077_v42  ;;  %v1112_v54 = vsel %vm1048_vm3, %v1016_v62, %v1080_v24  ;;  %vm1049_vm4 = vcmp.ge.f32.partialorder %v1017_v47, 0.0  ;;  %v1081_v4 = vmul.f32 0.1, %v1017_v47  ;;  %v879_v49 = vpop.f32.mrf.mxu1 }
 0x132   :  { %v1363_v20 = vpack.c.bf16 %v1109_v61, %v1108_v23  ;;  %v1036_v11 = vadd.f32 %v2049_v53, %v956_v46  ;;  %v1021_v13 = vadd.f32 %v1973_v21, %v941_v26  ;;  %v863_v15 = vpop.f32.mrf.mxu0  ;;  %v876_v19 = vadd.f32 %v875_v63, %v803_v50 }
 0x133   :  { %v1113_v17 = vsel %vm1049_vm4, %v1017_v47, %v1081_v4  ;;  %v858_v1 = vadd.f32 %v857_v45, %v2031_v35  ;;  %v878_v56 = vadd.f32 %v877_v6, %v805_v28  ;;  %v807_v3 = vadd.f32 %v806_v52, %v1918_v60 }
 0x134   :  { %1235 = vst [vmem:[%s2171_s5 + $0x8] sm:$0xff] %v1363_v20  ;;  %v1365_v27 = vpack.c.bf16 %v1113_v17, %v1112_v54  ;;  %vm1052_vm5 = vcmp.ge.f32.partialorder %v1020_v32, 0.0  ;;  %v1084_v25 = vmul.f32 0.1, %v1020_v32  ;;  %v865_v30 = vpop.f32.mrf.mxu0  ;;  %vm1068_vm6 = vcmp.ge.f32.partialorder %v1036_v11, 0.0 }
 0x135   :  { %vm1053_vm7 = vcmp.ge.f32.partialorder %v1021_v13, 0.0  ;;  %v1085_v21 = vmul.f32 0.1, %v1021_v13  ;;  %v957_v22 = vmul.f32 %v1944_v10, %v876_v19  ;;  %v1100_v35 = vmul.f32 0.1, %v1036_v11 }
 0x136   :  { %1237 = vst [vmem:[%s2171_s5 + $0x18] sm:$0xff] %v1365_v27  ;;  %v944_v50 = vmul.f32 %v1934_v5, %v858_v1  ;;  %v960_v28 = vmul.f32 %v1949_v16, %v878_v56  ;;  %v860_v60 = vadd.f32 %v859_v40, %v2043_v43  ;;  %v1116_v52 = vsel %vm1052_vm5, %v1020_v32, %v1084_v25  ;;  %v867_v8 = vpop.f32.mrf.mxu0 }
 0x137   :  { %v1117_v59 = vsel %vm1053_vm7, %v1021_v13, %v1085_v21  ;;  %v1037_v58 = vadd.f32 %v2049_v53, %v957_v22  ;;  %v880_v31 = vadd.f32 %v879_v49, %v807_v3  ;;  %v864_v0 = vadd.f32 %v863_v15, %v2046_v44 }
 0x138   :  { %v1367_v62 = vpack.c.bf16 %v1117_v59, %v1116_v52  ;;  %v1024_v10 = vadd.f32 %v1989_v48, %v944_v50  ;;  %v1040_v33 = vadd.f32 %v2069_v38, %v960_v28  ;;  %v945_v34 = vmul.f32 %v1934_v5, %v860_v60  ;;  %v869_v45 = vpop.f32.mrf.mxu0 }
 0x139   :  { %vm1069_vm8 = vcmp.ge.f32.partialorder %v1037_v58, 0.0  ;;  %v1101_v63 = vmul.f32 0.1, %v1037_v58  ;;  %v961_v51 = vmul.f32 %v1949_v16, %v880_v31  ;;  %v797_v43 = vadd.f32 %v2057_v14, %v1908_v57 }
 0x13a   :  { %v1132_v53 = vsel %vm1068_vm6, %v1036_v11, %v1100_v35  ;;  %1239 = vst [vmem:[%s2171_s5 + $0x28] sm:$0xff] %v1367_v62  ;;  %v1088_v12 = vmul.f32 0.1, %v1024_v10  ;;  %v1104_v39 = vmul.f32 0.1, %v1040_v33  ;;  %v1025_v5 = vadd.f32 %v1989_v48, %v945_v34 }
 0x13b   :  { %v1133_v36 = vsel %vm1069_vm8, %v1037_v58, %v1101_v63  ;;  %v1041_v41 = vadd.f32 %v2069_v38, %v961_v51  ;;  %v948_v16 = vmul.f32 %v1938_v7, %v864_v0  ;;  %vm1056_vm9 = vcmp.ge.f32.partialorder %v1024_v10, 0.0 }
 0x13c   :  { %v1375_v44 = vpack.c.bf16 %v1133_v36, %v1132_v53  ;;  %vm1072_vm10 = vcmp.ge.f32.partialorder %v1040_v33, 0.0  ;;  %v866_v57 = vadd.f32 %v865_v30, %v2065_v29  ;;  %vm1057_vm11 = vcmp.ge.f32.partialorder %v1025_v5, 0.0 }
 0x13d   :  { %v1089_v14 = vmul.f32 0.1, %v1025_v5  ;;  %vm1073_vm12 = vcmp.ge.f32.partialorder %v1041_v41, 0.0  ;;  %v1105_v42 = vmul.f32 0.1, %v1041_v41  ;;  %v1028_v48 = vadd.f32 %v2012_v18, %v948_v16 }
 0x13e   :  { %1247 = vst [vmem:[%s2171_s5 + $0x68] sm:$0xff] %v1375_v44  ;;  %v949_v38 = vmul.f32 %v1938_v7, %v866_v57  ;;  %v868_v24 = vadd.f32 %v867_v8, %v2076_v55  ;;  %v870_v47 = vadd.f32 %v869_v45, %v797_v43  ;;  %v1120_v23 = vsel %vm1056_vm9, %v1024_v10, %v1088_v12 }
 0x13f   :  { %v1136_v2 = vsel %vm1072_vm10, %v1040_v33, %v1104_v39  ;;  %v1121_v46 = vsel %vm1057_vm11, %v1025_v5, %v1089_v14  ;;  %v1137_v26 = vsel %vm1073_vm12, %v1041_v41, %v1105_v42  ;;  %v1092_v40 = vmul.f32 0.1, %v1028_v48 }
 0x140   :  { %v1369_v29 = vpack.c.bf16 %v1121_v46, %v1120_v23  ;;  %v1377_v6 = vpack.c.bf16 %v1137_v26, %v1136_v2  ;;  %vm1060_vm13 = vcmp.ge.f32.partialorder %v1028_v48, 0.0  ;;  %v1029_v61 = vadd.f32 %v2012_v18, %v949_v38 }
 0x141   :  { %v952_v54 = vmul.f32 %v1942_v9, %v868_v24  ;;  %v953_v4 = vmul.f32 %v1942_v9, %v870_v47  ;;  %v1124_v32 = vsel %vm1060_vm13, %v1028_v48, %v1092_v40 }
 0x142   :  { %1241 = vst [vmem:[%s2171_s5 + $0x38] sm:$0xff] %v1369_v29  ;;  %1249 = vst [vmem:[%s2171_s5 + $0x78] sm:$0xff] %v1377_v6  ;;  %vm1061_vm14 = vcmp.ge.f32.partialorder %v1029_v61, 0.0  ;;  %v1093_v7 = vmul.f32 0.1, %v1029_v61 }
 0x143   :  { %v1032_v55 = vadd.f32 %v2033_v37, %v952_v54  ;;  %v1033_v20 = vadd.f32 %v2033_v37, %v953_v4 }
 0x144   :  { %v1125_v18 = vsel %vm1061_vm14, %v1029_v61, %v1093_v7 }
 0x145   :  { %vm1064_vm15 = vcmp.ge.f32.partialorder %v1032_v55, 0.0  ;;  %v1096_v11 = vmul.f32 0.1, %v1032_v55  ;;  %vm1065_vm0 = vcmp.ge.f32.partialorder %v1033_v20, 0.0  ;;  %v1371_v9 = vpack.c.bf16 %v1125_v18, %v1124_v32 }
 0x146   :  { %v1097_v13 = vmul.f32 0.1, %v1033_v20 }
 0x147   :  { %1243 = vst [vmem:[%s2171_s5 + $0x48] sm:$0xff] %v1371_v9  ;;  %v1128_v15 = vsel %vm1064_vm15, %v1032_v55, %v1096_v11 }
 0x148   :  { %v1129_v17 = vsel %vm1065_vm0, %v1033_v20, %v1097_v13 }
 0x149   :  { %v1373_v19 = vpack.c.bf16 %v1129_v17, %v1128_v15 }
 0x14b   :  { %1245 = vst [vmem:[%s2171_s5 + $0x58] sm:$0xff] %v1373_v19 }

// kernel: _lambda_.14
= control target key start
LH: loop header
LB: loop body
LE: loop exit
PB: predicated region body
PF: predicated region fallthrough
CT: control target
= control target key end

     0   :  { %v1300_v2 = vmov 0   ;;  %vm500_vm0 = vcmask 785408   ;;  %s1657_s0 = inlined_call_operand.vmem [shape: bf16[64,608], index: 0, kind: input, shape index: {}]   ;;  %s1658_s1 = inlined_call_operand.vmem [shape: bf16[608,128], index: 1, kind: input, shape index: {}]   ;;  %s1659_s2 = inlined_call_operand.vmem [shape: f32[64,1], index: 2, kind: input, shape index: {}]   ;;  %s1660_s3 = inlined_call_operand.vmem [shape: f32[64,1], index: 3, kind: input, shape index: {}]   ;;  %s1661_s4 = inlined_call_operand.vmem [shape: f32[64,1], index: 4, kind: input, shape index: {}]   ;;  %s1662_s5 = inlined_call_operand.hbm [shape: bf16[64,128], index: 5, kind: output, shape index: {0}]   ;;  %s1663_s6 = inlined_call_operand.vmem [shape: bf16[64,128], index: 6, kind: output, shape index: {1}]  }
   0x1   :  { %v1212_v0 = vld [vmem:[%s1658_s1 + $0x78] sm:$0xff]   ;;  %1211 = vset.pattern.permute.xlu1 %v1300_v2  ;;  %1210 = vset.pattern.permute.xlu0 %v1300_v2  ;;  %v1216_v5 = vld [vmem:[%s1658_s1 + $0x70] sm:$0xff]   ;;  %v1220_v9 = vld [vmem:[%s1658_s1 + $0x68] sm:$0xff]  }
   0x2   :  { %v1213_v1 = vld [vmem:[%s1658_s1 + $0xf8] sm:$0xff]   ;;  %1084 = vmatprep.subr.bf16.mxu0 %v1212_v0  ;;  %v1217_v6 = vld [vmem:[%s1658_s1 + $0xf0] sm:$0xff]   ;;  %v1221_v10 = vld [vmem:[%s1658_s1 + $0xe8] sm:$0xff]  }
   0x3   :  { %v1214_v3 = vld [vmem:[%s1658_s1 + $0x38] sm:$0xff]   ;;  %1124 = vmatprep.subr.bf16.mxu1 %v1213_v1  ;;  %v1218_v7 = vld [vmem:[%s1658_s1 + $0x30] sm:$0xff]   ;;  %v1222_v11 = vld [vmem:[%s1658_s1 + $0x28] sm:$0xff]  }
   0x4   :  { %v1215_v4 = vld [vmem:[%s1658_s1 + $0xb8] sm:$0xff]   ;;  %1085 = vmatpush3.bf16.msra.mxu0 %v1214_v3  ;;  %v1219_v8 = vld [vmem:[%s1658_s1 + $0xb0] sm:$0xff]   ;;  %v1223_v12 = vld [vmem:[%s1658_s1 + $0xa8] sm:$0xff]  }
   0x5   :  { %1125 = vmatpush3.bf16.msra.mxu1 %v1215_v4  ;;  %1086 = vmatprep.subr.bf16.mxu0 %v1216_v5  ;;  %v1224_v13 = vld [vmem:[%s1658_s1 + $0x60] sm:$0xff]   ;;  %v1228_v17 = vld [vmem:[%s1658_s1 + $0x58] sm:$0xff]   ;;  %v1232_v21 = vld [vmem:[%s1658_s1 + $0x50] sm:$0xff]  }
   0x6   :  { %1126 = vmatprep.subr.bf16.mxu1 %v1217_v6  ;;  %v1225_v14 = vld [vmem:[%s1658_s1 + $0xe0] sm:$0xff]   ;;  %v1229_v18 = vld [vmem:[%s1658_s1 + $0xd8] sm:$0xff]   ;;  %v1233_v22 = vld [vmem:[%s1658_s1 + $0xd0] sm:$0xff]  }
   0x7   :  { %v1226_v15 = vld [vmem:[%s1658_s1 + $0x20] sm:$0xff]   ;;  %v1230_v19 = vld [vmem:[%s1658_s1 + $0x18] sm:$0xff]   ;;  %v1234_v23 = vld [vmem:[%s1658_s1 + $0x10] sm:$0xff]  }
   0x8   :  { %1087 = vmatpush3.bf16.msra.mxu0 %v1218_v7  ;;  %v1227_v16 = vld [vmem:[%s1658_s1 + $0xa0] sm:$0xff]   ;;  %v1231_v20 = vld [vmem:[%s1658_s1 + $0x98] sm:$0xff]   ;;  %v1235_v24 = vld [vmem:[%s1658_s1 + $0x90] sm:$0xff]  }
   0x9   :  { %1127 = vmatpush3.bf16.msra.mxu1 %v1219_v8  ;;  %1088 = vmatprep.subr.bf16.mxu0 %v1220_v9  ;;  %v1236_v25 = vld [vmem:[%s1658_s1 + $0x48] sm:$0xff]   ;;  %v1240_v29 = vld [vmem:[%s1658_s1 + $0x40] sm:$0xff]   ;;  %v1258_v43 = vld [vmem:[%s1658_s1 + $0x118] sm:$0xff]  }
   0xa   :  { %1128 = vmatprep.subr.bf16.mxu1 %v1221_v10  ;;  %v1237_v26 = vld [vmem:[%s1658_s1 + $0xc8] sm:$0xff]   ;;  %v1241_v30 = vld [vmem:[%s1658_s1 + $0xc0] sm:$0xff]   ;;  %v1261_v45 = vld [vmem:[%s1657_s0 + $0x5c] ss:$20 sps:$4 sm:$0xff]  }
   0xb   :  { %v1238_v27 = vld [vmem:[%s1658_s1 + $0x8] sm:$0xff]   ;;  %v1242_v31 = vld [vmem:[%s1658_s1] sm:$0xff]   ;;  %v1265_v46 = vld [vmem:[%s1658_s1 + $0x110] sm:$0xff]  }
   0xc   :  { %1089 = vmatpush3.bf16.msra.mxu0 %v1222_v11  ;;  %v1239_v28 = vld [vmem:[%s1658_s1 + $0x88] sm:$0xff]   ;;  %v1243_v32 = vld [vmem:[%s1658_s1 + $0x80] sm:$0xff]   ;;  %v126_v48 = vld [vmem:[%s1659_s2 + $0x10] sm:$0xff] }
   0xd   :  { %1129 = vmatpush3.bf16.msra.mxu1 %v1223_v12  ;;  %1090 = vmatprep.subr.bf16.mxu0 %v1224_v13  ;;  %v1244_v33 = vld [vmem:[%s1657_s0] ss:$20 sps:$4 sm:$0xff]   ;;  %v1246_v34 = vld [vmem:[%s1657_s0 + $0x4] ss:$20 sps:$4 sm:$0xff]   ;;  %v1247_v35 = vld [vmem:[%s1657_s0 + $0x8] ss:$20 sps:$4 sm:$0xff]  }
   0xe   :  { %1130 = vmatprep.subr.bf16.mxu1 %v1225_v14  ;;  %v1249_v36 = vld [vmem:[%s1657_s0 + $0xc] ss:$20 sps:$4 sm:$0xff]   ;;  %545 = vmatprep.mubr.bf16.mxu0 %v1246_v34  ;;  %v1254_v40 = vld [vmem:[%s1657_s0 + $0x34] ss:$20 sps:$4 sm:$0xff]   ;;  %v1257_v42 = vld [vmem:[%s1657_s0 + $0x30] ss:$20 sps:$4 sm:$0xff]  }
   0xf   :  { %v1250_v37 = vld [vmem:[%s1658_s1 + $0x128] sm:$0xff]   ;;  %610 = vmatprep.mubr.bf16.mxu1 %v1249_v36  ;;  %v1251_v38 = vld [vmem:[%s1658_s1 + $0x120] sm:$0xff]   ;;  %144 = vperm.xlu1 %1211, %v126_v48   ;;  %v1267_v52 = vld [vmem:[%s1657_s0 + $0x7c] ss:$20 sps:$4 sm:$0xff]  }
  0x10   :  { %1091 = vmatpush3.bf16.msra.mxu0 %v1226_v15  ;;  %v1252_v39 = vld [vmem:[%s1657_s0 + $0x2c] ss:$20 sps:$4 sm:$0xff]   ;;  %v1256_v41 = vld [vmem:[%s1657_s0 + $0x28] ss:$20 sps:$4 sm:$0xff]   ;;  %v1263_v50 = vld [vmem:[%s1657_s0 + $0x50] ss:$20 sps:$4 sm:$0xff]  }
  0x11   :  { %1131 = vmatpush3.bf16.msra.mxu1 %v1227_v16  ;;  %1092 = vmatprep.subr.bf16.mxu0 %v1228_v17  ;;  %v1259_v44 = vld [vmem:[%s1657_s0 + $0x54] ss:$20 sps:$4 sm:$0xff]   ;;  %v124_v49 = vld [vmem:[%s1659_s2] sm:$0xff]  ;;  %v1264_v51 = vld [vmem:[%s1657_s0 + $0x58] ss:$20 sps:$4 sm:$0xff]  }
  0x12   :  { %1132 = vmatprep.subr.bf16.mxu1 %v1229_v18  ;;  %v1266_v47 = vld [vmem:[%s1658_s1 + $0x108] sm:$0xff]   ;;  %134 = vperm.xlu0 %1210, %v124_v49   ;;  %v1269_v53 = vld [vmem:[%s1657_s0 + $0x84] ss:$20 sps:$4 sm:$0xff]   ;;  %v1272_v58 = vld [vmem:[%s1657_s0 + $0x80] ss:$20 sps:$4 sm:$0xff]  }
  0x13   :  { %v1273_v54 = vld [vmem:[%s1658_s1 + $0x100] sm:$0xff]   ;;  %v127_v55 = vld [vmem:[%s1659_s2 + $0x18] sm:$0xff]  ;;  %v125_v56 = vld [vmem:[%s1659_s2 + $0x8] sm:$0xff] }
  0x14   :  { %1093 = vmatpush3.bf16.msra.mxu0 %v1230_v19  ;;  %v1271_v57 = vld [vmem:[%s1657_s0 + $0x78] ss:$20 sps:$4 sm:$0xff]   ;;  %149 = vperm.xlu1 %1211, %v127_v55   ;;  %v1274_v59 = vld [vmem:[%s1657_s0 + $0x10] ss:$20 sps:$4 sm:$0xff]   ;;  %v1275_v61 = vld [vmem:[%s1657_s0 + $0x60] ss:$20 sps:$4 sm:$0xff]  }
  0x15   :  { %1133 = vmatpush3.bf16.msra.mxu1 %v1231_v20  ;;  %1094 = vmatprep.subr.bf16.mxu0 %v1232_v21  ;;  %v129_v60 = vld [vmem:[%s1659_s2 + $0x28] sm:$0xff]  ;;  %v128_v62 = vld [vmem:[%s1659_s2 + $0x20] sm:$0xff] }
  0x16   :  { %1134 = vmatprep.subr.bf16.mxu1 %v1233_v22  ;;  %139 = vperm.xlu0 %1210, %v125_v56  }
  0x18   :  { %1095 = vmatpush3.bf16.msra.mxu0 %v1234_v23  ;;  %159 = vperm.xlu1 %1211, %v129_v60  }
  0x19   :  { %1135 = vmatpush3.bf16.msra.mxu1 %v1235_v24  ;;  %1096 = vmatprep.subr.bf16.mxu0 %v1236_v25 }
  0x1a   :  { %1136 = vmatprep.subr.bf16.mxu1 %v1237_v26 }
  0x1c   :  { %1097 = vmatpush3.bf16.msra.mxu0 %v1238_v27 }
  0x1d   :  { %1137 = vmatpush3.bf16.msra.mxu1 %v1239_v28  ;;  %1098 = vmatprep.subr.bf16.mxu0 %v1240_v29 }
  0x1e   :  { %1138 = vmatprep.subr.bf16.mxu1 %v1241_v30 }
  0x20   :  { %1099 = vmatpush3.bf16.msra.mxu0 %v1242_v31 }
  0x21   :  { %1139 = vmatpush3.bf16.msra.mxu1 %v1243_v32  ;;  %1174 = vmatprep.subr.bf16.mxu0 %v1250_v37 }
  0x22   :  { %1194 = vmatprep.subr.bf16.mxu1 %v1250_v37 }
  0x23   :  { %546 = vmatmul.mubr.bf16.vlgmr.msra.gmra.mxu0 %v1244_v33 }
  0x24   :  { %611 = vmatmul.mubr.bf16.vlgmr.msra.gmra.mxu1 %v1247_v35  ;;  %1175 = vmatpush3.bf16.msra.mxu0 %v1250_v37 }
  0x25   :  { %1200 = vmatpush3.bf16.msra.mxu1 %v1250_v37  ;;  %1176 = vmatprep.subr.bf16.mxu0 %v1251_v38 }
  0x26   :  { %1195 = vmatprep.subr.bf16.mxu1 %v1251_v38  ;;  %553 = vmatprep.mubr.bf16.mxu0 %v1252_v39 }
  0x27   :  { %618 = vmatprep.mubr.bf16.mxu1 %v1254_v40 }
  0x28   :  { %1177 = vmatpush3.bf16.msra.mxu0 %v1251_v38 }
  0x29   :  { %1201 = vmatpush3.bf16.msra.mxu1 %v1251_v38  ;;  %1178 = vmatprep.subr.bf16.mxu0 %v1258_v43 }
  0x2a   :  { %1196 = vmatprep.subr.bf16.mxu1 %v1258_v43 }
  0x2b   :  { %554 = vmatmul.mubr.bf16.gmra.mxu0 %v1256_v41 }
  0x2c   :  { %619 = vmatmul.mubr.bf16.gmra.mxu1 %v1257_v42  ;;  %561 = vmatprep.mubr.bf16.mxu0 %v1259_v44 }
  0x2d   :  { %1179 = vmatpush3.bf16.msra.mxu0 %v1258_v43  ;;  %626 = vmatprep.mubr.bf16.mxu1 %v1261_v45 }
  0x2e   :  { %1202 = vmatpush3.bf16.msra.mxu1 %v1258_v43  ;;  %1180 = vmatprep.subr.bf16.mxu0 %v1265_v46 }
  0x2f   :  { %1197 = vmatprep.subr.bf16.mxu1 %v1265_v46 }
  0x31   :  { %1181 = vmatpush3.bf16.msra.mxu0 %v1265_v46 }
  0x32   :  { %1203 = vmatpush3.bf16.msra.mxu1 %v1265_v46  ;;  %1182 = vmatprep.subr.bf16.mxu0 %v1266_v47 }
  0x33   :  { %562 = vmatmul.mubr.bf16.gmra.mxu0 %v1263_v50  ;;  %1198 = vmatprep.subr.bf16.mxu1 %v1266_v47 }
  0x34   :  { %627 = vmatmul.mubr.bf16.gmra.mxu1 %v1264_v51  ;;  %569 = vmatprep.mubr.bf16.mxu0 %v1267_v52 }
  0x35   :  { %634 = vmatprep.mubr.bf16.mxu1 %v1269_v53  ;;  %1183 = vmatpush3.bf16.msra.mxu0 %v1266_v47 }
  0x36   :  { %1204 = vmatpush3.bf16.msra.mxu1 %v1266_v47  ;;  %1184 = vmatprep.subr.bf16.mxu0 %v1273_v54 }
  0x37   :  { %1199 = vmatprep.subr.bf16.mxu1 %v1273_v54 }
  0x39   :  { %1185 = vmatpush3.bf16.msra.mxu0 %v1273_v54 }
  0x3a   :  { %1205 = vmatpush3.bf16.msra.mxu1 %v1273_v54 }
  0x3b   :  { %570 = vmatmul.mubr.bf16.gmra.mxu0 %v1271_v57 }
  0x3c   :  { %12 = vsyncpa [#allocation3], 0  ;;  %635 = vmatmul.mubr.bf16.gmra.mxu1 %v1272_v58  ;;  %1186 = vmatprep.mubr.msk.bf16.mxu0 %vm500_vm0, %v1274_v59  ;;  %v131_v63 = vld [vmem:[%s1659_s2 + $0x38] sm:$0xff]  ;;  %v130_v0 = vld [vmem:[%s1659_s2 + $0x30] sm:$0xff] }
  0x3d   :  { %1190 = vmatprep.mubr.msk.bf16.mxu1 %vm500_vm0, %v1275_v61  ;;  %154 = vperm.xlu0 %1210, %v128_v62   ;;  %v1276_v1 = vld [vmem:[%s1657_s0 + $0x38] ss:$20 sps:$4 sm:$0xff]   ;;  %v1277_v2 = vld [vmem:[%s1657_s0 + $0x88] ss:$20 sps:$4 sm:$0xff]   ;;  %v748_v4 = vld [vmem:[%s1660_s3] sm:$0xff] }
  0x3e   :  { %169 = vperm.xlu1 %1211, %v131_v63   ;;  %v749_v3 = vld [vmem:[%s1660_s3 + $0x8] sm:$0xff]  ;;  %v751_v5 = vld [vmem:[%s1660_s3 + $0x18] sm:$0xff]  ;;  %v750_v6 = vld [vmem:[%s1660_s3 + $0x10] sm:$0xff] }
  0x3f   :  { %v753_v7 = vld [vmem:[%s1660_s3 + $0x28] sm:$0xff]  ;;  %v752_v8 = vld [vmem:[%s1660_s3 + $0x20] sm:$0xff]  ;;  %v755_v9 = vld [vmem:[%s1660_s3 + $0x38] sm:$0xff] }
  0x40   :  { %v754_v10 = vld [vmem:[%s1660_s3 + $0x30] sm:$0xff]  ;;  %v805_v11 = vld [vmem:[%s1661_s4 + $0x8] sm:$0xff]  ;;  %v804_v12 = vld [vmem:[%s1661_s4] sm:$0xff] }
  0x41   :  { %164 = vperm.xlu0 %1210, %v130_v0   ;;  %v807_v13 = vld [vmem:[%s1661_s4 + $0x18] sm:$0xff]  ;;  %v806_v14 = vld [vmem:[%s1661_s4 + $0x10] sm:$0xff]  ;;  %v809_v15 = vld [vmem:[%s1661_s4 + $0x28] sm:$0xff] }
  0x42   :  { %763 = vperm.xlu1 %1211, %v749_v3   ;;  %v808_v16 = vld [vmem:[%s1661_s4 + $0x20] sm:$0xff]  ;;  %v811_v17 = vld [vmem:[%s1661_s4 + $0x38] sm:$0xff]  ;;  %v810_v18 = vld [vmem:[%s1661_s4 + $0x30] sm:$0xff]  ;;  %s1301_s4 = smov [#allocation2]  }
  0x43   :  { %1187 = vmatmul.mubr.msk.bf16.vlgmr.msra.gmra.mxu0 %vm500_vm0, %v1276_v1  ;;  %s929_s2 = sshll.u32 %s1301_s4, 4  ;;  %s1628_s2 = int_to_ptr.vmem [resolvable:$true] %s929_s2 }
  0x44   :  { %1191 = vmatmul.mubr.msk.bf16.vlgmr.msra.gmra.mxu1 %vm500_vm0, %v1277_v2  ;;  %s1278_s12 = scalar_lea.vmem %s1628_s2, 512  ;;  %p1283_p1 = scmp.lt.s32.totalorder %s1628_s2, %s1628_s2 }
  0x45   :  { %758 = vperm.xlu0 %1210, %v748_v4   ;;  %p1279_p0 = scmp.ne.s32.totalorder %s1628_s2, %s1278_s12  ;;  %p1284_p2 = scmp.lt.s32.totalorder %s1278_s12, %s1278_s12 }
  0x46   :  { %773 = vperm.xlu1 %1211, %v751_v5  }
  0x47   :  { %p1285_p3 = por %p1284_p2, %p1283_p1 }
  0x49   :  { %768 = vperm.xlu0 %1210, %v750_v6   ;;  %p1286_p4 = pnand %p1285_p3, %p1279_p0 }
  0x4a   :  { %783 = vperm.xlu1 %1211, %v753_v7  }
  0x4d   :  { %778 = vperm.xlu0 %1210, %v752_v8  }
  0x4e   :  { %793 = vperm.xlu1 %1211, %v755_v9  }
  0x51   :  { %788 = vperm.xlu0 %1210, %v754_v10  }
  0x52   :  { %819 = vperm.xlu1 %1211, %v805_v11  }
  0x55   :  { %814 = vperm.xlu0 %1210, %v804_v12  }
  0x56   :  { %829 = vperm.xlu1 %1211, %v807_v13  }
  0x59   :  { %824 = vperm.xlu0 %1210, %v806_v14  }
  0x5a   :  { %839 = vperm.xlu1 %1211, %v809_v15  }
  0x5d   :  { %834 = vperm.xlu0 %1210, %v808_v16  }
  0x5e   :  { %849 = vperm.xlu1 %1211, %v811_v17  }
  0x61   :  { %844 = vperm.xlu0 %1210, %v810_v18  }
  0x8a   :  { %v145_v20 = vpop.permute.xlu1 %144 }
  0x8d   :  { %v135_v19 = vpop.permute.xlu0 %134 }
  0x8f   :  { %v150_v22 = vpop.permute.xlu1 %149 }
  0x91   :  { %v1589_v21 = vpop.permute.xlu0 %139 }
  0x93   :  { %v1591_v24 = vpop.permute.xlu1 %159 }
  0xb8   :  { %v155_v23 = vpop.permute.xlu0 %154 }
  0xb9   :  { %v1593_v26 = vpop.permute.xlu1 %169 }
  0xbc   :  { %v165_v25 = vpop.permute.xlu0 %164 }
  0xbd   :  { %v1597_v29 = vpop.permute.xlu1 %763 }
  0xc0   :  { %v1595_v27 = vpop.permute.xlu0 %758 }
  0xc1   :  { %v1603_v37 = vpop.permute.xlu1 %773 }
  0xc4   :  { %v1599_v31 = vpop.permute.xlu0 %768 }
  0xc5   :  { %v1609_v45 = vpop.permute.xlu1 %783 }
  0xc8   :  { %v1607_v39 = vpop.permute.xlu0 %778 }
  0xc9   :  { %v1611_v53 = vpop.permute.xlu1 %793 }
  0xcc   :  { %v789_v47 = vpop.permute.xlu0 %788 }
  0xcd   :  { %v1615_v63 = vpop.permute.xlu1 %819 }
  0xd0   :  { %v1613_v55 = vpop.permute.xlu0 %814 }
  0xd1   :  { %v830_v17 = vpop.permute.xlu1 %829 }
  0xd4   :  { %v825_v1 = vpop.permute.xlu0 %824 }
  0xe3   :  { %v1100_v28 = vpop.f32.mrf.mxu0 }
  0xe4   :  { %v1140_v30 = vpop.f32.mrf.mxu1 }
  0xe5   :  { %v1101_v32 = vpop.f32.mrf.mxu0 }
  0xe6   :  { %v1141_v33 = vpop.f32.mrf.mxu1  ;;  %v1102_v61 = vadd.f32 %v1101_v32, %v1100_v28 }
  0xe7   :  { %v1103_v34 = vpop.f32.mrf.mxu0  ;;  %v1142_v14 = vadd.f32 %v1141_v33, %v1140_v30 }
  0xe8   :  { %v1601_v35 = vpop.f32.mrf.mxu1  ;;  %v548_v8 = vadd.f32 %v1102_v61, %v135_v19 }
  0xe9   :  { %v1104_v36 = vpop.f32.mrf.mxu0 }
  0xea   :  { %v1605_v38 = vpop.f32.mrf.mxu1  ;;  %v613_v19 = vadd.f32 %v1142_v14, %v548_v8 }
  0xeb   :  { %v1106_v40 = vpop.f32.mrf.mxu0 }
  0xec   :  { %v1146_v41 = vpop.f32.mrf.mxu1 }
  0xed   :  { %v1107_v42 = vpop.f32.mrf.mxu0 }
  0xee   :  { %v1147_v43 = vpop.f32.mrf.mxu1  ;;  %v1108_v59 = vadd.f32 %v1107_v42, %v1106_v40 }
  0xef   :  { %v1109_v44 = vpop.f32.mrf.mxu0  ;;  %v1148_v10 = vadd.f32 %v1147_v43, %v1146_v41 }
  0xf0   :  { %v1149_v46 = vpop.f32.mrf.mxu1  ;;  %v556_v4 = vadd.f32 %v1108_v59, %v145_v20  ;;  %v1105_v20 = vadd.f32 %v1104_v36, %v1103_v34 }
  0xf1   :  { %v1110_v48 = vpop.f32.mrf.mxu0 }
  0xf2   :  { %v1150_v49 = vpop.f32.mrf.mxu1  ;;  %v1111_v5 = vadd.f32 %v1110_v48, %v1109_v44  ;;  %v621_v40 = vadd.f32 %v1148_v10, %v556_v4 }
  0xf3   :  { %v1112_v50 = vpop.f32.mrf.mxu0  ;;  %v1151_v44 = vadd.f32 %v1150_v49, %v1149_v46  ;;  %v551_v49 = vadd.f32 %v1105_v20, %v1589_v21 }
  0xf4   :  { %v1152_v51 = vpop.f32.mrf.mxu1  ;;  %v559_v18 = vadd.f32 %v1111_v5, %v150_v22 }
  0xf5   :  { %v1113_v52 = vpop.f32.mrf.mxu0 }
  0xf6   :  { %v1153_v54 = vpop.f32.mrf.mxu1  ;;  %v1114_v2 = vadd.f32 %v1113_v52, %v1112_v50  ;;  %v835_v50 = vpop.permute.xlu0 %834 }
  0xf7   :  { %v1115_v56 = vpop.f32.mrf.mxu0  ;;  %v1154_v48 = vadd.f32 %v1153_v54, %v1152_v51 }
  0xf8   :  { %v1155_v57 = vpop.f32.mrf.mxu1  ;;  %v564_v15 = vadd.f32 %v1114_v2, %v155_v23  ;;  %v624_v2 = vadd.f32 %v1151_v44, %v559_v18 }
  0xf9   :  { %v1116_v58 = vpop.f32.mrf.mxu0 }
  0xfa   :  { %v1156_v60 = vpop.f32.mrf.mxu1  ;;  %v1117_v59 = vadd.f32 %v1116_v58, %v1115_v56  ;;  %v629_v61 = vadd.f32 %v1154_v48, %v564_v15  ;;  %v840_v56 = vpop.permute.xlu1 %839 }
  0xfb   :  { %v1118_v62 = vpop.f32.mrf.mxu0  ;;  %v845_v58 = vpop.permute.xlu0 %844 }
  0xfc   :  { %v1158_v0 = vpop.f32.mrf.mxu1  ;;  %v567_v51 = vadd.f32 %v1117_v59, %v1591_v24 }
  0xfd   :  { %v1119_v3 = vpop.f32.mrf.mxu0 }
  0xfe   :  { %v1120_v6 = vadd.f32 %v1119_v3, %v1118_v62  ;;  %v1159_v7 = vpop.f32.mrf.mxu1 }
  0xff   :  { %v1121_v9 = vpop.f32.mrf.mxu0  ;;  %v1160_v12 = vadd.f32 %v1159_v7, %v1158_v0  ;;  %v1157_v7 = vadd.f32 %v1156_v60, %v1155_v57 }
 0x100   :  { %v572_v11 = vadd.f32 %v1120_v6, %v165_v25  ;;  %v1161_v13 = vpop.f32.mrf.mxu1 }
 0x101   :  { %v1122_v16 = vpop.f32.mrf.mxu0 }
 0x102   :  { %v1123_v28 = vadd.f32 %v1122_v16, %v1121_v9  ;;  %v1162_v32 = vpop.f32.mrf.mxu1  ;;  %v637_v42 = vadd.f32 %v1160_v12, %v572_v11 }
 0x103   :  { %v1188_v52 = vpop.f32.mrf.mxu0  ;;  %v1163_v41 = vadd.f32 %v1162_v32, %v1161_v13  ;;  %v632_v13 = vadd.f32 %v1157_v7, %v567_v51 }
 0x104   :  { %v575_v25 = vadd.f32 %v1123_v28, %v1593_v26  ;;  %v686_v43 = vadd.f32 %v1188_v52, %v621_v40  ;;  %v1192_v30 = vpop.f32.mrf.mxu1 }
 0x105   :  { %v702_v23 = vadd.f32 %v1192_v30, %v637_v42  ;;  %v677_v33 = vpop.f32.mrf.mxu0 }
 0x106   :  { %v798_v22 = vmul.f32 %v1599_v31, %v686_v43  ;;  %v678_v62 = vadd.f32 %v677_v33, %v613_v19  ;;  %v693_v0 = vpop.f32.mrf.mxu1  ;;  %v640_v3 = vadd.f32 %v1163_v41, %v575_v25  ;;  %v1145_v31 = vadd.f32 %v1605_v38, %v1601_v35 }
 0x107   :  { %v802_v34 = vmul.f32 %v789_v47, %v702_v23  ;;  %v694_v36 = vadd.f32 %v693_v0, %v629_v61  ;;  %v1189_v46 = vpop.f32.mrf.mxu0 }
 0x108   :  { %v689_v26 = vadd.f32 %v1189_v46, %v624_v2  ;;  %v1193_v54 = vpop.f32.mrf.mxu1  ;;  %v854_v4 = vadd.f32 %v825_v1, %v798_v22  ;;  %v796_v5 = vmul.f32 %v1595_v27, %v678_v62  ;;  %v616_v12 = vadd.f32 %v1145_v31, %v551_v49 }
 0x109   :  { %v705_v6 = vadd.f32 %v1193_v54, %v640_v3  ;;  %v858_v8 = vadd.f32 %v845_v58, %v802_v34  ;;  %v800_v9 = vmul.f32 %v1607_v39, %v694_v36  ;;  %v680_v10 = vpop.f32.mrf.mxu0 }
 0x10a   :  { %v1046_v47 = vpack.c.bf16 %v689_v26, %v686_v43  ;;  %v799_v21 = vmul.f32 %v1603_v37, %v689_v26  ;;  %v696_v24 = vpop.f32.mrf.mxu1  ;;  %vm862_vm1 = vcmp.ge.f32.partialorder %v854_v4, 0.0  ;;  %v870_v27 = vmul.f32 0.1, %v854_v4  ;;  %v850_v37 = vpop.permute.xlu1 %849 }
 0x10b   :  { %v1056_v11 = vpack.c.bf16 %v705_v6, %v702_v23  ;;  %v852_v1 = vadd.f32 %v1613_v55, %v796_v5  ;;  %vm866_vm2 = vcmp.ge.f32.partialorder %v858_v8, 0.0  ;;  %v803_v38 = vmul.f32 %v1611_v53, %v705_v6 }
 0x10c   :  { %1078 = vst [vmem:[#allocation2 + $0x8] sm:$0xff] %v1046_v47   ;;  %v855_v35 = vadd.f32 %v830_v17, %v799_v21  ;;  %v681_v39 = vadd.f32 %v680_v10, %v616_v12  ;;  %v697_v57 = vadd.f32 %v696_v24, %v632_v13  ;;  %v874_v60 = vmul.f32 0.1, %v858_v8 }
 0x10d   :  { %1080 = vst [vmem:[#allocation2 + $0x18] sm:$0xff] %v1056_v11   ;;  %v856_v14 = vadd.f32 %v835_v50, %v800_v9  ;;  %v859_v16 = vadd.f32 %v850_v37, %v803_v38  ;;  %v878_v17 = vsel %vm862_vm1, %v854_v4, %v870_v27  ;;  %v868_v53 = vmul.f32 0.1, %v852_v1 }
 0x10e   :  { %vm863_vm3 = vcmp.ge.f32.partialorder %v855_v35, 0.0  ;;  %v871_v15 = vmul.f32 0.1, %v855_v35  ;;  %v1041_v18 = vpack.c.bf16 %v681_v39, %v678_v62  ;;  %v797_v28 = vmul.f32 %v1597_v29, %v681_v39 }
 0x10f   :  { %v1051_v55 = vpack.c.bf16 %v697_v57, %v694_v36  ;;  %v801_v40 = vmul.f32 %v1609_v45, %v697_v57  ;;  %vm867_vm4 = vcmp.ge.f32.partialorder %v859_v16, 0.0  ;;  %v875_v50 = vmul.f32 0.1, %v859_v16 }
 0x110   :  { %v879_v32 = vsel %vm863_vm3, %v855_v35, %v871_v15  ;;  %1042 = vst [vmem:[#allocation2] sm:$0xff] %v1041_v18   ;;  %v853_v20 = vadd.f32 %v1615_v63, %v797_v28  ;;  %v882_v44 = vsel %vm866_vm2, %v858_v8, %v874_v60  ;;  %vm860_vm5 = vcmp.ge.f32.partialorder %v852_v1, 0.0 }
 0x111   :  { %v1066_v42 = vpack.c.bf16 %v879_v32, %v878_v17  ;;  %1079 = vst [vmem:[#allocation2 + $0x10] sm:$0xff] %v1051_v55   ;;  %v872_v29 = vmul.f32 0.1, %v856_v14  ;;  %v857_v48 = vadd.f32 %v840_v56, %v801_v40 }
 0x112   :  { %1289 = shalt.err (!%p1286_p4)
}
 0x113   :  { %s1302_s0 = smov 64   ;;  %s1303_s13 = smov 4   ;;  %vm864_vm6 = vcmp.ge.f32.partialorder %v856_v14, 0.0  ;;  %1081 = vst [vmem:[%s1663_s6 + $0x8] sm:$0xff] %v1066_v42   ;;  %v883_v45 = vsel %vm867_vm4, %v859_v16, %v875_v50  ;;  %vm861_vm7 = vcmp.ge.f32.partialorder %v853_v20, 0.0  ;;  %vm865_vm8 = vcmp.ge.f32.partialorder %v857_v48, 0.0 }
 0x114   :  { %935 = dma.vmem_to_hbm [thread:$0]  %s1628_s2, 512, %s1662_s5, [#allocation3], %s1302_s0, %s1302_s0, %s1303_s13   ;;  %v869_v63 = vmul.f32 0.1, %v853_v20  ;;  %v1076_v52 = vpack.c.bf16 %v883_v45, %v882_v44  ;;  %v873_v19 = vmul.f32 0.1, %v857_v48  ;;  %v876_v59 = vsel %vm860_vm5, %v852_v1, %v868_v53 }
 0x115   :  { %v880_v41 = vsel %vm864_vm6, %v856_v14, %v872_v29 }
 0x116   :  { %v877_v25 = vsel %vm861_vm7, %v853_v20, %v869_v63  ;;  %1083 = vst [vmem:[%s1663_s6 + $0x18] sm:$0xff] %v1076_v52   ;;  %v881_v30 = vsel %vm865_vm8, %v857_v48, %v873_v19 }
 0x117   :  { %v1061_v43 = vpack.c.bf16 %v877_v25, %v876_v59  ;;  %v1071_v23 = vpack.c.bf16 %v881_v30, %v880_v41 }
 0x119   :  { %1062 = vst [vmem:[%s1663_s6] sm:$0xff] %v1061_v43   ;;  %1082 = vst [vmem:[%s1663_s6 + $0x10] sm:$0xff] %v1071_v23  }
 0x11a   :  { %1298 = dma.done.wait [#allocation3], 512  }
 0x11b   :  { %1299 = vsyncadd [#allocation3], 4294966784 }
 0x11c   :  { %943 = vsyncpa [#allocation3], 1 }

// kernel: _lambda_.15
= control target key start
LH: loop header
LB: loop body
LE: loop exit
PB: predicated region body
PF: predicated region fallthrough
CT: control target
= control target key end

     0   :  { %vm142_vm0 = vcmask 517120   ;;  %vm904_vm1 = vcmask 523264   ;;  %vm833_vm2 = vcmask 1041409   ;;  %vm835_vm3 = vcmask 1042434   ;;  %s1987_s0 = inlined_call_operand.vmem [shape: bf16[64,2,64], index: 0, kind: input, shape index: {}]   ;;  %s1988_s1 = inlined_call_operand.vmem [shape: f32[128,64], index: 1, kind: input, shape index: {}]   ;;  %s1989_s2 = inlined_call_operand.vmem [shape: f32[128,1], index: 2, kind: input, shape index: {}]   ;;  %s1990_s3 = inlined_call_operand.vmem [shape: f32[128,2], index: 3, kind: output, shape index: {}]  }
   0x1   :  { %v72_v0 = vld [vmem:[%s1987_s0 + $0x3a] sm:$0x1]  ;;  %v70_v1 = vld [vmem:[%s1987_s0 + $0x38] sm:$0x1]  ;;  %v71_v2 = vld [vmem:[%s1987_s0 + $0x39] sm:$0x1] }
   0x2   :  { %v136_v3 = vunpack.c.l.bf16 %v72_v0  ;;  %v134_v4 = vunpack.c.l.bf16 %v70_v1  ;;  %v135_v5 = vunpack.c.l.bf16 %v71_v2  ;;  %v62_v6 = vld [vmem:[%s1987_s0 + $0x30] sm:$0x1]  ;;  %v63_v8 = vld [vmem:[%s1987_s0 + $0x31] sm:$0x1]  ;;  %v73_v9 = vld [vmem:[%s1987_s0 + $0x3b] sm:$0x1] }
   0x3   :  { %v126_v7 = vunpack.c.l.bf16 %v62_v6  ;;  %v127_v14 = vunpack.c.l.bf16 %v63_v8  ;;  %v137_v15 = vunpack.c.l.bf16 %v73_v9  ;;  %v64_v16 = vld [vmem:[%s1987_s0 + $0x32] sm:$0x1]  ;;  %v74_v17 = vld [vmem:[%s1987_s0 + $0x3c] sm:$0x1]  ;;  %v55_v18 = vld [vmem:[%s1987_s0 + $0x29] sm:$0x1] }
   0x4   :  { %v317_v10 = vsel %vm142_vm0, %v136_v3, 0.0  ;;  %v311_v11 = vsel %vm142_vm0, %v134_v4, 0.0  ;;  %v314_v12 = vsel %vm142_vm0, %v135_v5, 0.0  ;;  %v54_v19 = vld [vmem:[%s1987_s0 + $0x28] sm:$0x1]  ;;  %v128_v24 = vunpack.c.l.bf16 %v64_v16 }
   0x5   :  { %318 = vadd.xlane.f32.xlu1 %v317_v10  ;;  %312 = vadd.xlane.f32.xlu0 %v311_v11  ;;  %v287_v13 = vsel %vm142_vm0, %v126_v7, 0.0  ;;  %v75_v20 = vld [vmem:[%s1987_s0 + $0x3d] sm:$0x1]  ;;  %v65_v21 = vld [vmem:[%s1987_s0 + $0x33] sm:$0x1]  ;;  %v290_v22 = vsel %vm142_vm0, %v127_v14, 0.0  ;;  %v138_v25 = vunpack.c.l.bf16 %v74_v17  ;;  %v119_v28 = vunpack.c.l.bf16 %v55_v18 }
   0x6   :  { %v320_v23 = vsel %vm142_vm0, %v137_v15, 0.0  ;;  %v66_v26 = vld [vmem:[%s1987_s0 + $0x34] sm:$0x1]  ;;  %v56_v27 = vld [vmem:[%s1987_s0 + $0x2a] sm:$0x1]  ;;  %v118_v29 = vunpack.c.l.bf16 %v54_v19  ;;  %v139_v32 = vunpack.c.l.bf16 %v75_v20  ;;  %v129_v33 = vunpack.c.l.bf16 %v65_v21 }
   0x7   :  { %v76_v30 = vld [vmem:[%s1987_s0 + $0x3e] sm:$0x1]  ;;  %v46_v31 = vld [vmem:[%s1987_s0 + $0x20] sm:$0x1]  ;;  %v130_v34 = vunpack.c.l.bf16 %v66_v26  ;;  %v120_v35 = vunpack.c.l.bf16 %v56_v27  ;;  %v293_v36 = vsel %vm142_vm0, %v128_v24, 0.0  ;;  %v323_v37 = vsel %vm142_vm0, %v138_v25, 0.0 }
   0x8   :  { %v140_v38 = vunpack.c.l.bf16 %v76_v30  ;;  %v110_v39 = vunpack.c.l.bf16 %v46_v31  ;;  %v1298_v40 = vld [vmem:[%s1987_s0 + $0x21] sm:$0x1]  ;;  %v1303_v41 = vld [vmem:[%s1987_s0 + $0x2b] sm:$0x1]  ;;  %v266_v42 = vsel %vm142_vm0, %v119_v28, 0.0  ;;  %v263_v43 = vsel %vm142_vm0, %v118_v29, 0.0 }
   0x9   :  { %315 = vadd.xlane.f32.xlu0 %v314_v12  ;;  %288 = vadd.xlane.f32.xlu1 %v287_v13  ;;  %v326_v44 = vsel %vm142_vm0, %v139_v32, 0.0  ;;  %v296_v45 = vsel %vm142_vm0, %v129_v33, 0.0  ;;  %v1312_v46 = vld [vmem:[%s1987_s0 + $0x35] sm:$0x1]  ;;  %v1317_v47 = vld [vmem:[%s1987_s0 + $0x3f] sm:$0x1]  ;;  %v111_v50 = vunpack.c.l.bf16 %v1298_v40  ;;  %v121_v51 = vunpack.c.l.bf16 %v1303_v41 }
   0xa   :  { %v1320_v48 = vsel %vm142_vm0, %v130_v34, 0.0  ;;  %v1323_v49 = vsel %vm142_vm0, %v120_v35, 0.0  ;;  %v31_v52 = vld [vmem:[%s1987_s0 + $0x11] sm:$0x1]  ;;  %v41_v53 = vld [vmem:[%s1987_s0 + $0x1b] sm:$0x1]  ;;  %v131_v60 = vunpack.c.l.bf16 %v1312_v46  ;;  %v141_v61 = vunpack.c.l.bf16 %v1317_v47 }
   0xb   :  { %v1334_v54 = vsel %vm142_vm0, %v140_v38, 0.0  ;;  %v1337_v55 = vsel %vm142_vm0, %v110_v39, 0.0  ;;  %v95_v56 = vunpack.c.l.bf16 %v31_v52  ;;  %v105_v57 = vunpack.c.l.bf16 %v41_v53  ;;  %v51_v58 = vld [vmem:[%s1987_s0 + $0x25] sm:$0x1]  ;;  %v61_v59 = vld [vmem:[%s1987_s0 + $0x2f] sm:$0x1] }
   0xc   :  { %v115_v62 = vunpack.c.l.bf16 %v51_v58  ;;  %v125_v63 = vunpack.c.l.bf16 %v61_v59  ;;  %v32_v0 = vld [vmem:[%s1987_s0 + $0x12] sm:$0x1]  ;;  %v42_v1 = vld [vmem:[%s1987_s0 + $0x1c] sm:$0x1]  ;;  %v52_v6 = vld [vmem:[%s1987_s0 + $0x26] sm:$0x1] }
   0xd   :  { %291 = vadd.xlane.f32.xlu0 %v290_v22  ;;  %321 = vadd.xlane.f32.xlu1 %v320_v23  ;;  %v1354_v2 = vsel %vm142_vm0, %v95_v56, 0.0  ;;  %v1357_v3 = vsel %vm142_vm0, %v105_v57, 0.0  ;;  %v96_v4 = vunpack.c.l.bf16 %v32_v0  ;;  %v106_v5 = vunpack.c.l.bf16 %v42_v1  ;;  %v22_v7 = vld [vmem:[%s1987_s0 + $0x8] sm:$0x1]  ;;  %v23_v12 = vld [vmem:[%s1987_s0 + $0x9] sm:$0x1] }
   0xe   :  { %v1366_v8 = vsel %vm142_vm0, %v115_v62, 0.0  ;;  %v1369_v9 = vsel %vm142_vm0, %v125_v63, 0.0  ;;  %v116_v10 = vunpack.c.l.bf16 %v52_v6  ;;  %v86_v11 = vunpack.c.l.bf16 %v22_v7  ;;  %v33_v13 = vld [vmem:[%s1987_s0 + $0x13] sm:$0x1]  ;;  %v43_v18 = vld [vmem:[%s1987_s0 + $0x1d] sm:$0x1] }
   0xf   :  { %v1378_v14 = vsel %vm142_vm0, %v96_v4, 0.0  ;;  %v1381_v15 = vsel %vm142_vm0, %v106_v5, 0.0  ;;  %v87_v16 = vunpack.c.l.bf16 %v23_v12  ;;  %v97_v17 = vunpack.c.l.bf16 %v33_v13  ;;  %v53_v19 = vld [vmem:[%s1987_s0 + $0x27] sm:$0x1]  ;;  %v24_v24 = vld [vmem:[%s1987_s0 + $0xa] sm:$0x1] }
  0x10   :  { %v1390_v20 = vsel %vm142_vm0, %v116_v10, 0.0  ;;  %v1393_v21 = vsel %vm142_vm0, %v86_v11, 0.0  ;;  %v107_v22 = vunpack.c.l.bf16 %v43_v18  ;;  %v117_v23 = vunpack.c.l.bf16 %v53_v19  ;;  %v34_v25 = vld [vmem:[%s1987_s0 + $0x14] sm:$0x1]  ;;  %v44_v30 = vld [vmem:[%s1987_s0 + $0x1e] sm:$0x1] }
  0x11   :  { %294 = vadd.xlane.f32.xlu0 %v293_v36  ;;  %324 = vadd.xlane.f32.xlu1 %v323_v37  ;;  %v1402_v26 = vsel %vm142_vm0, %v87_v16, 0.0  ;;  %v1405_v27 = vsel %vm142_vm0, %v97_v17, 0.0  ;;  %v88_v28 = vunpack.c.l.bf16 %v24_v24  ;;  %v98_v29 = vunpack.c.l.bf16 %v34_v25  ;;  %v14_v31 = vld [vmem:[%s1987_s0] sm:$0x1]  ;;  %v15_v36 = vld [vmem:[%s1987_s0 + $0x1] sm:$0x1] }
  0x12   :  { %v1414_v32 = vsel %vm142_vm0, %v107_v22, 0.0  ;;  %v1417_v33 = vsel %vm142_vm0, %v117_v23, 0.0  ;;  %v108_v34 = vunpack.c.l.bf16 %v44_v30  ;;  %v78_v35 = vunpack.c.l.bf16 %v14_v31  ;;  %v25_v37 = vld [vmem:[%s1987_s0 + $0xb] sm:$0x1]  ;;  %v16_v58 = vld [vmem:[%s1987_s0 + $0x2] sm:$0x1] }
  0x13   :  { %v1426_v38 = vsel %vm142_vm0, %v88_v28, 0.0  ;;  %v1429_v39 = vsel %vm142_vm0, %v98_v29, 0.0  ;;  %v26_v59 = vld [vmem:[%s1987_s0 + $0xc] sm:$0x1]  ;;  %v80_v0 = vunpack.c.l.bf16 %v16_v58  ;;  %v36_v4 = vld [vmem:[%s1987_s0 + $0x16] sm:$0x1] }
  0x14   :  { %v1438_v52 = vsel %vm142_vm0, %v108_v34, 0.0  ;;  %v1441_v53 = vsel %vm142_vm0, %v78_v35, 0.0  ;;  %v90_v1 = vunpack.c.l.bf16 %v26_v59  ;;  %v17_v5 = vld [vmem:[%s1987_s0 + $0x3] sm:$0x1]  ;;  %v100_v10 = vunpack.c.l.bf16 %v36_v4  ;;  %v27_v12 = vld [vmem:[%s1987_s0 + $0xd] sm:$0x1] }
  0x15   :  { %267 = vadd.xlane.f32.xlu1 %v266_v42  ;;  %264 = vadd.xlane.f32.xlu0 %v263_v43  ;;  %v79_v42 = vunpack.c.l.bf16 %v15_v36  ;;  %v89_v43 = vunpack.c.l.bf16 %v25_v37  ;;  %v81_v11 = vunpack.c.l.bf16 %v17_v5  ;;  %v37_v13 = vld [vmem:[%s1987_s0 + $0x17] sm:$0x1]  ;;  %v91_v16 = vunpack.c.l.bf16 %v27_v12  ;;  %v18_v18 = vld [vmem:[%s1987_s0 + $0x4] sm:$0x1]  ;;  %v28_v19 = vld [vmem:[%s1987_s0 + $0xe] sm:$0x1] }
  0x16   :  { %v101_v17 = vunpack.c.l.bf16 %v37_v13  ;;  %v1488_v22 = vsel %vm142_vm0, %v100_v10, 0.0  ;;  %v82_v24 = vunpack.c.l.bf16 %v18_v18  ;;  %v92_v25 = vunpack.c.l.bf16 %v28_v19  ;;  %v19_v28 = vld [vmem:[%s1987_s0 + $0x5] sm:$0x1]  ;;  %v29_v29 = vld [vmem:[%s1987_s0 + $0xf] sm:$0x1] }
  0x17   :  { %v1450_v62 = vsel %vm142_vm0, %v79_v42, 0.0  ;;  %v1453_v63 = vsel %vm142_vm0, %v89_v43, 0.0  ;;  %v1491_v23 = vsel %vm142_vm0, %v81_v11, 0.0  ;;  %v1500_v30 = vsel %vm142_vm0, %v91_v16, 0.0  ;;  %v20_v36 = vld [vmem:[%s1987_s0 + $0x6] sm:$0x1] }
  0x18   :  { %v1503_v31 = vsel %vm142_vm0, %v101_v17, 0.0  ;;  %v83_v34 = vunpack.c.l.bf16 %v19_v28  ;;  %v93_v35 = vunpack.c.l.bf16 %v29_v29  ;;  %v21_v37 = vld [vmem:[%s1987_s0 + $0x7] sm:$0x1]  ;;  %v1514_v42 = vsel %vm142_vm0, %v82_v24, 0.0  ;;  %v48_v58 = vld [vmem:[%s1987_s0 + $0x22] sm:$0x1] }
  0x19   :  { %327 = vadd.xlane.f32.xlu1 %v326_v44  ;;  %297 = vadd.xlane.f32.xlu0 %v296_v45  ;;  %v35_v44 = vld [vmem:[%s1987_s0 + $0x15] sm:$0x1]  ;;  %v45_v45 = vld [vmem:[%s1987_s0 + $0x1f] sm:$0x1]  ;;  %v1517_v43 = vsel %vm142_vm0, %v92_v25, 0.0  ;;  %v332_v59 = vsel %vm142_vm0, %v141_v61, 0.0 }
  0x1a   :  { %v99_v56 = vunpack.c.l.bf16 %v35_v44  ;;  %v109_v57 = vunpack.c.l.bf16 %v45_v45  ;;  %v84_v44 = vunpack.c.l.bf16 %v20_v36  ;;  %v85_v45 = vunpack.c.l.bf16 %v21_v37  ;;  %v58_v40 = vld [vmem:[%s1987_s0 + $0x2c] sm:$0x1]  ;;  %v68_v4 = vld [vmem:[%s1987_s0 + $0x36] sm:$0x1]  ;;  %v38_v5 = vld [vmem:[%s1987_s0 + $0x18] sm:$0x1] }
  0x1b   :  { %v132_v10 = vunpack.c.l.bf16 %v68_v4  ;;  %v102_v47 = vunpack.c.l.bf16 %v38_v5  ;;  %v39_v61 = vld [vmem:[%s1987_s0 + $0x19] sm:$0x1]  ;;  %v49_v11 = vld [vmem:[%s1987_s0 + $0x23] sm:$0x1]  ;;  %v59_v18 = vld [vmem:[%s1987_s0 + $0x2d] sm:$0x1] }
  0x1c   :  { %v1464_v6 = vsel %vm142_vm0, %v99_v56, 0.0  ;;  %v1467_v7 = vsel %vm142_vm0, %v109_v57, 0.0  ;;  %v242_v56 = vsel %vm142_vm0, %v111_v50, 0.0  ;;  %v272_v57 = vsel %vm142_vm0, %v121_v51, 0.0  ;;  %v69_v19 = vld [vmem:[%s1987_s0 + $0x37] sm:$0x1] }
  0x1d   :  { %300 = vadd.xlane.f32.xlu1 %v1320_v48  ;;  %270 = vadd.xlane.f32.xlu0 %v1323_v49  ;;  %v1476_v48 = vsel %vm142_vm0, %v80_v0, 0.0  ;;  %v1479_v49 = vsel %vm142_vm0, %v90_v1, 0.0  ;;  %v1538_v50 = vsel %vm142_vm0, %v84_v44, 0.0  ;;  %v1541_v41 = vsel %vm142_vm0, %v85_v45, 0.0 }
  0x1e   :  { %v302_v51 = vsel %vm142_vm0, %v131_v60, 0.0  ;;  %v112_v0 = vunpack.c.l.bf16 %v48_v58  ;;  %v122_v1 = vunpack.c.l.bf16 %v58_v40  ;;  %v305_v12 = vsel %vm142_vm0, %v132_v10, 0.0 }
  0x1f   :  { %v215_v13 = vsel %vm142_vm0, %v102_v47, 0.0  ;;  %v103_v16 = vunpack.c.l.bf16 %v39_v61  ;;  %v113_v17 = vunpack.c.l.bf16 %v49_v11  ;;  %v123_v28 = vunpack.c.l.bf16 %v59_v18  ;;  %v428_v47 = vld [vmem:[%s1989_s2 + $0x68] sm:$0xff] }
  0x20   :  { %v245_v46 = vsel %vm142_vm0, %v112_v0, 0.0  ;;  %v275_v60 = vsel %vm142_vm0, %v122_v1, 0.0  ;;  %v133_v29 = vunpack.c.l.bf16 %v69_v19  ;;  %v423_v19 = vld [vmem:[%s1989_s2 + $0x40] sm:$0xff]  ;;  %vm837_vm4 = vcmask 1043459  }
  0x21   :  { %330 = vadd.xlane.f32.xlu0 %v1334_v54  ;;  %240 = vadd.xlane.f32.xlu1 %v1337_v55  ;;  %v1526_v54 = vsel %vm142_vm0, %v83_v34, 0.0  ;;  %v1529_v55 = vsel %vm142_vm0, %v93_v35, 0.0  ;;  %v218_v24 = vsel %vm142_vm0, %v103_v16, 0.0  ;;  %v248_v25 = vsel %vm142_vm0, %v113_v17, 0.0  ;;  %v40_v34 = vld [vmem:[%s1987_s0 + $0x1a] sm:$0x1] }
  0x22   :  { %v50_v35 = vld [vmem:[%s1987_s0 + $0x24] sm:$0x1]  ;;  %v278_v36 = vsel %vm142_vm0, %v123_v28, 0.0  ;;  %v308_v37 = vsel %vm142_vm0, %v133_v29, 0.0  ;;  %v104_v44 = vunpack.c.l.bf16 %v40_v34  ;;  %v430_v28 = vld [vmem:[%s1989_s2 + $0x78] sm:$0xff]  ;;  %vm839_vm5 = vcmask 1044484  }
  0x23   :  { %v114_v45 = vunpack.c.l.bf16 %v50_v35  ;;  %vm841_vm6 = vcmask 1045509   ;;  %vm843_vm7 = vcmask 1046534   ;;  %vm845_vm8 = vcmask 1047559  }
  0x24   :  { %v221_v58 = vsel %vm142_vm0, %v104_v44, 0.0  ;;  %vm1098_vm9 = vcmask 15360  }
  0x25   :  { %243 = vadd.xlane.f32.xlu0 %v242_v56  ;;  %273 = vadd.xlane.f32.xlu1 %v272_v57  ;;  %v60_v56 = vld [vmem:[%s1987_s0 + $0x2e] sm:$0x1]  ;;  %v30_v57 = vld [vmem:[%s1987_s0 + $0x10] sm:$0x1]  ;;  %v251_v40 = vsel %vm142_vm0, %v114_v45, 0.0 }
  0x29   :  { %303 = vadd.xlane.f32.xlu0 %v302_v51  ;;  %333 = vadd.xlane.f32.xlu1 %v332_v59  ;;  %v124_v51 = vunpack.c.l.bf16 %v60_v56  ;;  %v94_v59 = vunpack.c.l.bf16 %v30_v57  ;;  %v425_v56 = vld [vmem:[%s1989_s2 + $0x50] sm:$0xff] }
  0x2b   :  { %v281_v0 = vsel %vm142_vm0, %v124_v51, 0.0  ;;  %v191_v1 = vsel %vm142_vm0, %v94_v59, 0.0 }
  0x2d   :  { %246 = vadd.xlane.f32.xlu0 %v245_v46  ;;  %276 = vadd.xlane.f32.xlu1 %v275_v60  ;;  %v422_v46 = vld [vmem:[%s1989_s2 + $0x38] sm:$0xff] }
  0x31   :  { %306 = vadd.xlane.f32.xlu0 %v305_v12  ;;  %216 = vadd.xlane.f32.xlu1 %v215_v13 }
  0x35   :  { %219 = vadd.xlane.f32.xlu0 %v218_v24  ;;  %249 = vadd.xlane.f32.xlu1 %v248_v25 }
  0x39   :  { %279 = vadd.xlane.f32.xlu0 %v278_v36  ;;  %309 = vadd.xlane.f32.xlu1 %v308_v37 }
  0x3d   :  { %222 = vadd.xlane.f32.xlu0 %v221_v58  ;;  %252 = vadd.xlane.f32.xlu1 %v251_v40 }
  0x41   :  { %282 = vadd.xlane.f32.xlu0 %v281_v0  ;;  %192 = vadd.xlane.f32.xlu1 %v191_v1 }
  0x45   :  { %195 = vadd.xlane.f32.xlu0 %v1354_v2  ;;  %225 = vadd.xlane.f32.xlu1 %v1357_v3 }
  0x49   :  { %255 = vadd.xlane.f32.xlu0 %v1366_v8  ;;  %285 = vadd.xlane.f32.xlu1 %v1369_v9  ;;  %v399_v8 = vld [vmem:[%s1988_s1] sm:$0xff] }
  0x4a   :  { %v407_v9 = vld [vmem:[%s1988_s1 + $0x40] sm:$0xff]  ;;  %1175 = vmatprep.mubr.msk.f32.mxu0 %vm904_vm1, %v399_v8 }
  0x4b   :  { %1187 = vmatprep.mubr.msk.f32.mxu1 %vm904_vm1, %v407_v9  ;;  %v427_v8 = vld [vmem:[%s1989_s2 + $0x60] sm:$0xff] }
  0x4d   :  { %198 = vadd.xlane.f32.xlu0 %v1378_v14  ;;  %228 = vadd.xlane.f32.xlu1 %v1381_v15 }
  0x51   :  { %258 = vadd.xlane.f32.xlu0 %v1390_v20  ;;  %168 = vadd.xlane.f32.xlu1 %v1393_v21  ;;  %v1218_v20 = vmov 0   ;;  %v416_v21 = vld [vmem:[%s1989_s2 + $0x8] sm:$0xff] }
  0x52   :  { %1217 = vset.pattern.permute.xlu1 %v1218_v20  ;;  %1216 = vset.pattern.permute.xlu0 %v1218_v20 }
  0x55   :  { %171 = vadd.xlane.f32.xlu0 %v1402_v26  ;;  %201 = vadd.xlane.f32.xlu1 %v1405_v27 }
  0x59   :  { %231 = vadd.xlane.f32.xlu0 %v1414_v32  ;;  %261 = vadd.xlane.f32.xlu1 %v1417_v33  ;;  %v417_v32 = vld [vmem:[%s1989_s2 + $0x10] sm:$0xff] }
  0x5d   :  { %174 = vadd.xlane.f32.xlu0 %v1426_v38  ;;  %204 = vadd.xlane.f32.xlu1 %v1429_v39  ;;  %v418_v39 = vld [vmem:[%s1989_s2 + $0x18] sm:$0xff] }
  0x61   :  { %234 = vadd.xlane.f32.xlu0 %v1438_v52  ;;  %144 = vadd.xlane.f32.xlu1 %v1441_v53 }
  0x65   :  { %147 = vadd.xlane.f32.xlu0 %v1450_v62  ;;  %177 = vadd.xlane.f32.xlu1 %v1453_v63  ;;  %v419_v62 = vld [vmem:[%s1989_s2 + $0x20] sm:$0xff]  ;;  %v575_v63 = vlaneseq }
  0x69   :  { %207 = vadd.xlane.f32.xlu0 %v1464_v6  ;;  %237 = vadd.xlane.f32.xlu1 %v1467_v7  ;;  %v415_v6 = vld [vmem:[%s1989_s2] sm:$0xff] }
  0x6d   :  { %150 = vadd.xlane.f32.xlu0 %v1476_v48  ;;  %180 = vadd.xlane.f32.xlu1 %v1479_v49  ;;  %v420_v49 = vld [vmem:[%s1989_s2 + $0x28] sm:$0xff] }
  0x71   :  { %210 = vadd.xlane.f32.xlu0 %v1488_v22  ;;  %153 = vadd.xlane.f32.xlu1 %v1491_v23  ;;  %v424_v22 = vld [vmem:[%s1989_s2 + $0x48] sm:$0xff]  ;;  %v576_v23 = vand.u32 127, %v575_v63 }
  0x75   :  { %183 = vadd.xlane.f32.xlu0 %v1500_v30  ;;  %213 = vadd.xlane.f32.xlu1 %v1503_v31  ;;  %v578_v30 = vshrl.u32 %v575_v63, 7 }
  0x79   :  { %156 = vadd.xlane.f32.xlu0 %v1514_v42  ;;  %186 = vadd.xlane.f32.xlu1 %v1517_v43  ;;  %v421_v43 = vld [vmem:[%s1989_s2 + $0x30] sm:$0xff] }
  0x7d   :  { %159 = vadd.xlane.f32.xlu0 %v1526_v54  ;;  %189 = vadd.xlane.f32.xlu1 %v1529_v55  ;;  %v426_v55 = vld [vmem:[%s1989_s2 + $0x58] sm:$0xff] }
  0x81   :  { %162 = vadd.xlane.f32.xlu0 %v1538_v50  ;;  %165 = vadd.xlane.f32.xlu1 %v1541_v41  ;;  %v1674_v50 = vsub.s32 %v576_v23, %v578_v30 }
  0x8e   :  { %v319_v2 = vpop.xlane.xlu1 %318  ;;  %v313_v3 = vpop.xlane.xlu0 %312 }
  0x8f   :  { %v391_v41 = vmul.f32 0.015625, %v313_v3  ;;  %v393_v61 = vmul.f32 0.015625, %v319_v2 }
  0x91   :  { %v804_v12 = vrot.slane %v391_v41, %v1674_v50  ;;  %v812_v29 = vrot.slane %v393_v61, %v1674_v50 }
  0x92   :  { %v316_v14 = vpop.xlane.xlu0 %315  ;;  %v1629_v15 = vpop.xlane.xlu1 %288  ;;  %438 = vperm.xlu1 %1217, %v416_v21  }
  0x93   :  { %v392_v54 = vmul.f32 0.015625, %v316_v14 }
  0x95   :  { %v808_v60 = vrot.slane %v392_v54, %v1674_v50 }
  0x96   :  { %v1636_v26 = vpop.xlane.xlu0 %291  ;;  %v322_v27 = vpop.xlane.xlu1 %321  ;;  %443 = vperm.xlu1 %1217, %v417_v32  }
  0x97   :  { %433 = vperm.xlu0 %1216, %v415_v6   ;;  %v394_v10 = vmul.f32 0.015625, %v322_v27  ;;  %v889_v24 = vsel %vm833_vm2, %v808_v60, %v804_v12  ;;  %v384_v9 = vmul.f32 0.015625, %v1636_v26  ;;  %v383_v27 = vmul.f32 0.015625, %v1629_v15 }
  0x98   :  { %v890_v36 = vsel %vm835_vm3, %v812_v29, %v889_v24 }
  0x99   :  { %v816_v25 = vrot.slane %v394_v10, %v1674_v50  ;;  %v776_v26 = vrot.slane %v384_v9, %v1674_v50  ;;  %v772_v15 = vrot.slane %v383_v27, %v1674_v50 }
  0x9a   :  { %v1641_v33 = vpop.xlane.xlu0 %294  ;;  %v325_v38 = vpop.xlane.xlu1 %324  ;;  %448 = vperm.xlu1 %1217, %v418_v39  }
  0x9b   :  { %478 = vperm.xlu0 %1216, %v424_v22   ;;  %v395_v11 = vmul.f32 0.015625, %v325_v38  ;;  %v891_v57 = vsel %vm837_vm4, %v816_v25, %v890_v36  ;;  %v385_v14 = vmul.f32 0.015625, %v1641_v33  ;;  %v429_v38 = vld [vmem:[%s1989_s2 + $0x70] sm:$0xff]  ;;  %v882_v22 = vsel %vm833_vm2, %v776_v26, %v772_v15 }
  0x9d   :  { %v820_v34 = vrot.slane %v395_v11, %v1674_v50  ;;  %v780_v63 = vrot.slane %v385_v14, %v1674_v50 }
  0x9e   :  { %v1646_v52 = vpop.xlane.xlu1 %267  ;;  %v1648_v53 = vpop.xlane.xlu0 %264  ;;  %453 = vperm.xlu1 %1217, %v419_v62  }
  0x9f   :  { %488 = vperm.xlu0 %1216, %v426_v55   ;;  %v892_v40 = vsel %vm839_vm5, %v820_v34, %v891_v57  ;;  %v883_v30 = vsel %vm835_vm3, %v780_v63, %v882_v22  ;;  %v376_v12 = vmul.f32 0.015625, %v1646_v52 }
  0xa1   :  { %v744_v29 = vrot.slane %v376_v12, %v1674_v50 }
  0xa2   :  { %v328_v7 = vpop.xlane.xlu1 %327  ;;  %v1656_v48 = vpop.xlane.xlu0 %297  ;;  %458 = vperm.xlu1 %1217, %v420_v49  }
  0xa3   :  { %v396_v13 = vmul.f32 0.015625, %v328_v7  ;;  %498 = vperm.xlu0 %1216, %v428_v47   ;;  %v386_v32 = vmul.f32 0.015625, %v1656_v48 }
  0xa5   :  { %v824_v35 = vrot.slane %v396_v13, %v1674_v50  ;;  %v784_v48 = vrot.slane %v386_v32, %v1674_v50  ;;  %v375_v13 = vmul.f32 0.015625, %v1648_v53 }
  0xa6   :  { %v1664_v31 = vpop.xlane.xlu1 %300  ;;  %v1666_v42 = vpop.xlane.xlu0 %270  ;;  %463 = vperm.xlu1 %1217, %v421_v43  }
  0xa7   :  { %508 = vperm.xlu0 %1216, %v430_v28   ;;  %v893_v51 = vsel %vm841_vm6, %v824_v35, %v892_v40  ;;  %v387_v39 = vmul.f32 0.015625, %v1664_v31  ;;  %v884_v55 = vsel %vm837_vm4, %v784_v48, %v883_v30  ;;  %v740_v34 = vrot.slane %v375_v13, %v1674_v50 }
  0xa9   :  { %v788_v49 = vrot.slane %v387_v39, %v1674_v50 }
  0xaa   :  { %v331_v4 = vpop.xlane.xlu0 %330  ;;  %v1676_v5 = vpop.xlane.xlu1 %240  ;;  %468 = vperm.xlu1 %1217, %v422_v46  }
  0xab   :  { %v397_v16 = vmul.f32 0.015625, %v331_v4  ;;  %v885_v4 = vsel %vm839_vm5, %v788_v49, %v884_v55  ;;  %v367_v26 = vmul.f32 0.015625, %v1676_v5 }
  0xad   :  { %v828_v37 = vrot.slane %v397_v16, %v1674_v50  ;;  %v377_v16 = vmul.f32 0.015625, %v1666_v42 }
  0xae   :  { %v1686_v17 = vpop.xlane.xlu0 %243  ;;  %v1688_v18 = vpop.xlane.xlu1 %273  ;;  %473 = vperm.xlu1 %1217, %v423_v19  }
  0xaf   :  { %v894_v2 = vsel %vm843_vm7, %v828_v37, %v893_v51  ;;  %v378_v25 = vmul.f32 0.015625, %v1688_v18  ;;  %v748_v36 = vrot.slane %v377_v16, %v1674_v50  ;;  %v368_v27 = vmul.f32 0.015625, %v1686_v17 }
  0xb2   :  { %v304_v44 = vpop.xlane.xlu0 %303  ;;  %v334_v45 = vpop.xlane.xlu1 %333  ;;  %483 = vperm.xlu1 %1217, %v425_v56  }
  0xb3   :  { %v398_v58 = vmul.f32 0.015625, %v334_v45  ;;  %v388_v62 = vmul.f32 0.015625, %v304_v44  ;;  %v752_v44 = vrot.slane %v378_v25, %v1674_v50  ;;  %v875_v45 = vsel %vm833_vm2, %v744_v29, %v740_v34 }
  0xb4   :  { %v876_v56 = vsel %vm835_vm3, %v748_v36, %v875_v45 }
  0xb5   :  { %v832_v59 = vrot.slane %v398_v58, %v1674_v50  ;;  %v792_v23 = vrot.slane %v388_v62, %v1674_v50  ;;  %v877_v51 = vsel %vm837_vm4, %v752_v44, %v876_v56 }
  0xb6   :  { %v1710_v0 = vpop.xlane.xlu0 %246  ;;  %v277_v1 = vpop.xlane.xlu1 %276  ;;  %493 = vperm.xlu1 %1217, %v427_v8  }
  0xb7   :  { %v895_v3 = vsel %vm845_vm8, %v832_v59, %v894_v2  ;;  %v886_v46 = vsel %vm841_vm6, %v792_v23, %v885_v4  ;;  %v379_v28 = vmul.f32 0.015625, %v277_v1  ;;  %v369_v32 = vmul.f32 0.015625, %v1710_v0 }
  0xb8   :  { %1159 = vmatprep.subr.mxu0 %v895_v3  ;;  %1199 = vmatprep.subr.mxu1 %v895_v3  ;;  %v708_v23 = vrot.slane %v367_v26, %v1674_v50 }
  0xb9   :  { %1160 = vmatpush3.msra.mxu0 %v895_v3  ;;  %1207 = vmatpush3.msra.mxu1 %v895_v3  ;;  %v756_v42 = vrot.slane %v379_v28, %v1674_v50  ;;  %v716_v48 = vrot.slane %v369_v32, %v1674_v50 }
  0xba   :  { %v307_v20 = vpop.xlane.xlu0 %306  ;;  %v1719_v21 = vpop.xlane.xlu1 %216  ;;  %503 = vperm.xlu1 %1217, %v429_v38  }
  0xbb   :  { %v389_v33 = vmul.f32 0.015625, %v307_v20  ;;  %v878_v1 = vsel %vm839_vm5, %v756_v42, %v877_v51  ;;  %v359_v29 = vmul.f32 0.015625, %v1719_v21 }
  0xbd   :  { %v796_v31 = vrot.slane %v389_v33, %v1674_v50  ;;  %v712_v33 = vrot.slane %v368_v27, %v1674_v50 }
  0xbe   :  { %v1729_v6 = vpop.xlane.xlu0 %219  ;;  %v1731_v7 = vpop.xlane.xlu1 %249 }
  0xbf   :  { %v887_v61 = vsel %vm843_vm7, %v796_v31, %v886_v46  ;;  %v370_v62 = vmul.f32 0.015625, %v1731_v7  ;;  %v868_v5 = vsel %vm833_vm2, %v712_v33, %v708_v23  ;;  %v360_v16 = vmul.f32 0.015625, %v1729_v6 }
  0xc0   :  { %v869_v31 = vsel %vm835_vm3, %v716_v48, %v868_v5  ;;  %v676_v6 = vrot.slane %v359_v29, %v1674_v50 }
  0xc1   :  { %v720_v0 = vrot.slane %v370_v62, %v1674_v50  ;;  %v680_v36 = vrot.slane %v360_v16, %v1674_v50 }
  0xc2   :  { %v280_v43 = vpop.xlane.xlu0 %279  ;;  %v310_v54 = vpop.xlane.xlu1 %309 }
  0xc3   :  { %v390_v41 = vmul.f32 0.015625, %v310_v54  ;;  %v380_v35 = vmul.f32 0.015625, %v280_v43 }
  0xc5   :  { %v800_v60 = vrot.slane %v390_v41, %v1674_v50  ;;  %v760_v18 = vrot.slane %v380_v35, %v1674_v50  ;;  %v870_v41 = vsel %vm837_vm4, %v720_v0, %v869_v31 }
  0xc6   :  { %v1744_v10 = vpop.xlane.xlu0 %222  ;;  %v253_v47 = vpop.xlane.xlu1 %252 }
  0xc7   :  { %v888_v11 = vsel %vm845_vm8, %v800_v60, %v887_v61  ;;  %v879_v2 = vsel %vm841_vm6, %v760_v18, %v878_v1  ;;  %v371_v63 = vmul.f32 0.015625, %v253_v47 }
  0xc8   :  { %1161 = vmatprep.subr.mxu0 %v888_v11  ;;  %1200 = vmatprep.subr.mxu1 %v888_v11 }
  0xc9   :  { %1162 = vmatpush3.msra.mxu0 %v888_v11  ;;  %1208 = vmatpush3.msra.mxu1 %v888_v11  ;;  %v724_v30 = vrot.slane %v371_v63, %v1674_v50 }
  0xca   :  { %v283_v19 = vpop.xlane.xlu0 %282  ;;  %v1751_v24 = vpop.xlane.xlu1 %192 }
  0xcb   :  { %v381_v52 = vmul.f32 0.015625, %v283_v19  ;;  %v871_v46 = vsel %vm839_vm5, %v724_v30, %v870_v41  ;;  %v361_v19 = vmul.f32 0.015625, %v1744_v10  ;;  %v351_v26 = vmul.f32 0.015625, %v1751_v24 }
  0xcd   :  { %v764_v57 = vrot.slane %v381_v52, %v1674_v50  ;;  %v684_v44 = vrot.slane %v361_v19, %v1674_v50  ;;  %v644_v23 = vrot.slane %v351_v26, %v1674_v50 }
  0xce   :  { %v1757_v37 = vpop.xlane.xlu0 %195  ;;  %v226_v53 = vpop.xlane.xlu1 %225 }
  0xcf   :  { %v880_v14 = vsel %vm843_vm7, %v764_v57, %v879_v2  ;;  %v362_v34 = vmul.f32 0.015625, %v226_v53  ;;  %v861_v57 = vsel %vm833_vm2, %v680_v36, %v676_v6 }
  0xd0   :  { %v862_v53 = vsel %vm835_vm3, %v684_v44, %v861_v57 }
  0xd1   :  { %v688_v56 = vrot.slane %v362_v34, %v1674_v50 }
  0xd2   :  { %v256_v58 = vpop.xlane.xlu0 %255  ;;  %v286_v40 = vpop.xlane.xlu1 %285 }
  0xd3   :  { %v382_v59 = vmul.f32 0.015625, %v286_v40  ;;  %v372_v15 = vmul.f32 0.015625, %v256_v58 }
  0xd5   :  { %v768_v3 = vrot.slane %v382_v59, %v1674_v50  ;;  %v728_v7 = vrot.slane %v372_v15, %v1674_v50  ;;  %v863_v59 = vsel %vm837_vm4, %v688_v56, %v862_v53 }
  0xd6   :  { %v1769_v8 = vpop.xlane.xlu0 %198  ;;  %v229_v9 = vpop.xlane.xlu1 %228 }
  0xd7   :  { %v881_v20 = vsel %vm845_vm8, %v768_v3, %v880_v14  ;;  %v872_v60 = vsel %vm841_vm6, %v728_v7, %v871_v46  ;;  %v363_v35 = vmul.f32 0.015625, %v229_v9  ;;  %v352_v3 = vmul.f32 0.015625, %v1757_v37 }
  0xd8   :  { %1163 = vmatprep.subr.mxu0 %v881_v20  ;;  %1201 = vmatprep.subr.mxu1 %v881_v20 }
  0xd9   :  { %1164 = vmatpush3.msra.mxu0 %v881_v20  ;;  %1209 = vmatpush3.msra.mxu1 %v881_v20  ;;  %v692_v10 = vrot.slane %v363_v35, %v1674_v50  ;;  %v353_v20 = vmul.f32 0.015625, %v1769_v8  ;;  %v648_v37 = vrot.slane %v352_v3, %v1674_v50 }
  0xda   :  { %v259_v38 = vpop.xlane.xlu0 %258  ;;  %v1775_v39 = vpop.xlane.xlu1 %168 }
  0xdb   :  { %v373_v49 = vmul.f32 0.015625, %v259_v38  ;;  %v864_v2 = vsel %vm839_vm5, %v692_v10, %v863_v59  ;;  %v652_v48 = vrot.slane %v353_v20, %v1674_v50  ;;  %v854_v30 = vsel %vm833_vm2, %v648_v37, %v644_v23 }
  0xdd   :  { %v732_v43 = vrot.slane %v373_v49, %v1674_v50  ;;  %v855_v31 = vsel %vm835_vm3, %v652_v48, %v854_v30 }
  0xde   :  { %v1781_v22 = vpop.xlane.xlu0 %171  ;;  %v202_v17 = vpop.xlane.xlu1 %201 }
  0xdf   :  { %v873_v12 = vsel %vm843_vm7, %v732_v43, %v872_v60  ;;  %v354_v62 = vmul.f32 0.015625, %v202_v17  ;;  %v344_v5 = vmul.f32 0.015625, %v1781_v22  ;;  %v343_v43 = vmul.f32 0.015625, %v1775_v39 }
  0xe1   :  { %v656_v0 = vrot.slane %v354_v62, %v1674_v50  ;;  %v616_v22 = vrot.slane %v344_v5, %v1674_v50  ;;  %v612_v39 = vrot.slane %v343_v43, %v1674_v50  ;;  %v409_v43 = vld [vmem:[%s1988_s1 + $0x50] sm:$0xff] }
  0xe2   :  { %v232_v54 = vpop.xlane.xlu0 %231  ;;  %v262_v55 = vpop.xlane.xlu1 %261 }
  0xe3   :  { %v374_v4 = vmul.f32 0.015625, %v262_v55  ;;  %v364_v52 = vmul.f32 0.015625, %v232_v54  ;;  %v856_v46 = vsel %vm837_vm4, %v656_v0, %v855_v31  ;;  %v847_v10 = vsel %vm833_vm2, %v616_v22, %v612_v39  ;;  %v408_v31 = vld [vmem:[%s1988_s1 + $0x48] sm:$0xff]  ;;  %v414_v22 = vld [vmem:[%s1988_s1 + $0x78] sm:$0xff] }
  0xe5   :  { %v736_v47 = vrot.slane %v374_v4, %v1674_v50  ;;  %v696_v21 = vrot.slane %v364_v52, %v1674_v50 }
  0xe6   :  { %v175_v61 = vpop.xlane.xlu0 %174  ;;  %v205_v11 = vpop.xlane.xlu1 %204 }
  0xe7   :  { %v874_v13 = vsel %vm845_vm8, %v736_v47, %v873_v12  ;;  %v865_v9 = vsel %vm841_vm6, %v696_v21, %v864_v2  ;;  %v355_v33 = vmul.f32 0.015625, %v205_v11  ;;  %v345_v54 = vmul.f32 0.015625, %v175_v61 }
  0xe8   :  { %1165 = vmatprep.subr.mxu0 %v874_v13  ;;  %1202 = vmatprep.subr.mxu1 %v874_v13 }
  0xe9   :  { %1166 = vmatpush3.msra.mxu0 %v874_v13  ;;  %1210 = vmatpush3.msra.mxu1 %v874_v13  ;;  %v660_v17 = vrot.slane %v355_v33, %v1674_v50  ;;  %v620_v61 = vrot.slane %v345_v54, %v1674_v50  ;;  %v402_v54 = vld [vmem:[%s1988_s1 + $0x18] sm:$0xff] }
  0xea   :  { %v235_v25 = vpop.xlane.xlu0 %234  ;;  %v1798_v28 = vpop.xlane.xlu1 %144 }
  0xeb   :  { %v365_v42 = vmul.f32 0.015625, %v235_v25  ;;  %v857_v11 = vsel %vm839_vm5, %v660_v17, %v856_v46  ;;  %v848_v21 = vsel %vm835_vm3, %v620_v61, %v847_v10  ;;  %v404_v46 = vld [vmem:[%s1988_s1 + $0x28] sm:$0xff] }
  0xed   :  { %v700_v58 = vrot.slane %v365_v42, %v1674_v50 }
  0xee   :  { %v148_v45 = vpop.xlane.xlu0 %147  ;;  %v178_v18 = vpop.xlane.xlu1 %177 }
  0xef   :  { %v866_v38 = vsel %vm843_vm7, %v700_v58, %v865_v9  ;;  %v346_v60 = vmul.f32 0.015625, %v178_v18  ;;  %v336_v25 = vmul.f32 0.015625, %v148_v45  ;;  %v335_v18 = vmul.f32 0.015625, %v1798_v28 }
  0xf1   :  { %v624_v36 = vrot.slane %v346_v60, %v1674_v50  ;;  %v584_v53 = vrot.slane %v336_v25, %v1674_v50  ;;  %v580_v3 = vrot.slane %v335_v18, %v1674_v50  ;;  %v412_v60 = vld [vmem:[%s1988_s1 + $0x68] sm:$0xff] }
  0xf2   :  { %v208_v40 = vpop.xlane.xlu0 %207  ;;  %v238_v51 = vpop.xlane.xlu1 %237 }
  0xf3   :  { %v366_v1 = vmul.f32 0.015625, %v238_v51  ;;  %v356_v15 = vmul.f32 0.015625, %v208_v40  ;;  %v849_v51 = vsel %vm837_vm4, %v624_v36, %v848_v21 }
  0xf5   :  { %v704_v14 = vrot.slane %v366_v1, %v1674_v50  ;;  %v664_v7 = vrot.slane %v356_v15, %v1674_v50 }
  0xf6   :  { %v151_v27 = vpop.xlane.xlu0 %150  ;;  %v181_v32 = vpop.xlane.xlu1 %180 }
  0xf7   :  { %v867_v63 = vsel %vm845_vm8, %v704_v14, %v866_v38  ;;  %v347_v12 = vmul.f32 0.015625, %v181_v32  ;;  %v858_v13 = vsel %vm841_vm6, %v664_v7, %v857_v11  ;;  %v337_v52 = vmul.f32 0.015625, %v151_v27  ;;  %v400_v7 = vld [vmem:[%s1988_s1 + $0x8] sm:$0xff]  ;;  %v413_v11 = vld [vmem:[%s1988_s1 + $0x70] sm:$0xff] }
  0xf8   :  { %1167 = vmatprep.subr.mxu0 %v867_v63  ;;  %1203 = vmatprep.subr.mxu1 %v867_v63  ;;  %v834_v38 = vsel %vm833_vm2, %v584_v53, %v580_v3 }
  0xf9   :  { %1168 = vmatpush3.msra.mxu0 %v867_v63  ;;  %1211 = vmatpush3.msra.mxu1 %v867_v63  ;;  %v628_v6 = vrot.slane %v347_v12, %v1674_v50  ;;  %v588_v59 = vrot.slane %v337_v52, %v1674_v50  ;;  %v406_v12 = vld [vmem:[%s1988_s1 + $0x38] sm:$0xff] }
  0xfa   :  { %v211_v8 = vpop.xlane.xlu0 %210  ;;  %v154_v49 = vpop.xlane.xlu1 %153 }
  0xfb   :  { %v357_v24 = vmul.f32 0.015625, %v211_v8  ;;  %v338_v56 = vmul.f32 0.015625, %v154_v49  ;;  %v850_v9 = vsel %vm839_vm5, %v628_v6, %v849_v51  ;;  %v836_v37 = vsel %vm835_vm3, %v588_v59, %v834_v38 }
  0xfd   :  { %v668_v55 = vrot.slane %v357_v24, %v1674_v50  ;;  %v592_v14 = vrot.slane %v338_v56, %v1674_v50 }
  0xfe   :  { %v184_v41 = vpop.xlane.xlu0 %183  ;;  %v214_v4 = vpop.xlane.xlu1 %213 }
  0xff   :  { %v358_v47 = vmul.f32 0.015625, %v214_v4  ;;  %v348_v16 = vmul.f32 0.015625, %v184_v41  ;;  %v859_v35 = vsel %vm843_vm7, %v668_v55, %v858_v13  ;;  %v838_v49 = vsel %vm837_vm4, %v592_v14, %v836_v37  ;;  %v410_v55 = vld [vmem:[%s1988_s1 + $0x58] sm:$0xff]  ;;  %v403_v41 = vld [vmem:[%s1988_s1 + $0x20] sm:$0xff] }
 0x100   :  { %v411_v4 = vld [vmem:[%s1988_s1 + $0x60] sm:$0xff] }
 0x101   :  { %v672_v19 = vrot.slane %v358_v47, %v1674_v50  ;;  %v632_v45 = vrot.slane %v348_v16, %v1674_v50  ;;  %v405_v47 = vld [vmem:[%s1988_s1 + $0x30] sm:$0xff] }
 0x102   :  { %v157_v29 = vpop.xlane.xlu0 %156  ;;  %v187_v34 = vpop.xlane.xlu1 %186 }
 0x103   :  { %v349_v44 = vmul.f32 0.015625, %v187_v34  ;;  %v860_v42 = vsel %vm845_vm8, %v672_v19, %v859_v35  ;;  %v339_v57 = vmul.f32 0.015625, %v157_v29  ;;  %v851_v20 = vsel %vm841_vm6, %v632_v45, %v850_v9 }
 0x104   :  { %1169 = vmatprep.subr.mxu0 %v860_v42  ;;  %1204 = vmatprep.subr.mxu1 %v860_v42 }
 0x105   :  { %1170 = vmatpush3.msra.mxu0 %v860_v42  ;;  %1212 = vmatpush3.msra.mxu1 %v860_v42  ;;  %v636_v58 = vrot.slane %v349_v44, %v1674_v50  ;;  %v596_v27 = vrot.slane %v339_v57, %v1674_v50 }
 0x106   :  { %v160_v40 = vpop.xlane.xlu0 %159  ;;  %v190_v28 = vpop.xlane.xlu1 %189 }
 0x107   :  { %v340_v1 = vmul.f32 0.015625, %v160_v40  ;;  %v350_v2 = vmul.f32 0.015625, %v190_v28  ;;  %v852_v33 = vsel %vm843_vm7, %v636_v58, %v851_v20  ;;  %v840_v23 = vsel %vm839_vm5, %v596_v27, %v838_v49 }
 0x109   :  { %v640_v32 = vrot.slane %v350_v2, %v1674_v50  ;;  %v600_v26 = vrot.slane %v340_v1, %v1674_v50 }
 0x10a   :  { %v163_v62 = vpop.xlane.xlu0 %162  ;;  %v166_v63 = vpop.xlane.xlu1 %165 }
 0x10b   :  { %v341_v15 = vmul.f32 0.015625, %v163_v62  ;;  %v342_v48 = vmul.f32 0.015625, %v166_v63  ;;  %v853_v8 = vsel %vm845_vm8, %v640_v32, %v852_v33  ;;  %v842_v17 = vsel %vm841_vm6, %v600_v26, %v840_v23 }
 0x10c   :  { %1171 = vmatprep.subr.mxu0 %v853_v8  ;;  %1205 = vmatprep.subr.mxu1 %v853_v8 }
 0x10d   :  { %v604_v0 = vrot.slane %v341_v15, %v1674_v50  ;;  %v608_v24 = vrot.slane %v342_v48, %v1674_v50  ;;  %1172 = vmatpush3.msra.mxu0 %v853_v8  ;;  %1213 = vmatpush3.msra.mxu1 %v853_v8  ;;  %v401_v50 = vld [vmem:[%s1988_s1 + $0x10] sm:$0xff] }
 0x10e   :  { %v439_v13 = vpop.permute.xlu1 %438 }
 0x10f   :  { %v844_v30 = vsel %vm843_vm7, %v604_v0, %v842_v17 }
 0x110   :  { %v846_v5 = vsel %vm845_vm8, %v608_v24, %v844_v30 }
 0x111   :  { %1173 = vmatprep.subr.mxu0 %v846_v5  ;;  %1206 = vmatprep.subr.mxu1 %v846_v5 }
 0x112   :  { %1174 = vmatpush3.msra.mxu0 %v846_v5  ;;  %1214 = vmatpush3.msra.mxu1 %v846_v5  ;;  %v444_v16 = vpop.permute.xlu1 %443  ;;  %v434_v29 = vpop.permute.xlu0 %433 }
 0x113   :  { %1176 = vmatmul.mubr.msk.f32.vlgmr.msra.gmra.mxu0 %vm904_vm1, %v400_v7  ;;  %1188 = vmatmul.mubr.msk.f32.vlgmr.msra.gmra.mxu1 %vm904_vm1, %v408_v31 }
 0x114   :  { %1178 = vmatprep.mubr.msk.f32.mxu0 %vm904_vm1, %v401_v50  ;;  %1190 = vmatprep.mubr.msk.f32.mxu1 %vm904_vm1, %v409_v43 }
 0x116   :  { %v449_v19 = vpop.permute.xlu1 %448  ;;  %v479_v35 = vpop.permute.xlu0 %478 }
 0x117   :  { %1179 = vmatmul.mubr.msk.f32.gmra.mxu0 %vm904_vm1, %v402_v54  ;;  %1191 = vmatmul.mubr.msk.f32.gmra.mxu1 %vm904_vm1, %v410_v55 }
 0x118   :  { %1181 = vmatprep.mubr.msk.f32.mxu0 %vm904_vm1, %v403_v41  ;;  %1193 = vmatprep.mubr.msk.f32.mxu1 %vm904_vm1, %v411_v4 }
 0x11a   :  { %v454_v39 = vpop.permute.xlu1 %453  ;;  %v489_v52 = vpop.permute.xlu0 %488 }
 0x11b   :  { %1182 = vmatmul.mubr.msk.f32.gmra.mxu0 %vm904_vm1, %v404_v46  ;;  %1194 = vmatmul.mubr.msk.f32.gmra.mxu1 %vm904_vm1, %v412_v60 }
 0x11c   :  { %1184 = vmatprep.mubr.msk.f32.mxu0 %vm904_vm1, %v405_v47  ;;  %1196 = vmatprep.mubr.msk.f32.mxu1 %vm904_vm1, %v413_v11 }
 0x11e   :  { %v459_v61 = vpop.permute.xlu1 %458  ;;  %v499_v40 = vpop.permute.xlu0 %498 }
 0x11f   :  { %1185 = vmatmul.mubr.msk.f32.gmra.mxu0 %vm904_vm1, %v406_v12  ;;  %1197 = vmatmul.mubr.msk.f32.gmra.mxu1 %vm904_vm1, %v414_v22 }
 0x122   :  { %v464_v25 = vpop.permute.xlu1 %463  ;;  %v509_v62 = vpop.permute.xlu0 %508 }
 0x126   :  { %v469_v34 = vpop.permute.xlu1 %468 }
 0x12a   :  { %v474_v36 = vpop.permute.xlu1 %473 }
 0x12e   :  { %v484_v18 = vpop.permute.xlu1 %483 }
 0x132   :  { %v494_v2 = vpop.permute.xlu1 %493 }
 0x136   :  { %v504_v48 = vpop.permute.xlu1 %503 }
 0x1d3   :  { %v1177_v44 = vpop.f32.mrf.mxu0  ;;  %v1189_v42 = vpop.f32.mrf.mxu1 }
 0x1d4   :  { %v1025_v6 = vadd.f32 %v1177_v44, %v439_v13  ;;  %v1065_v56 = vadd.f32 %v1189_v42, %v479_v35 }
 0x1d5   :  { %v1019_v10 = vpop.f32.mrf.mxu0  ;;  %v1059_v45 = vpop.f32.mrf.mxu1 }
 0x1d6   :  { %1100 = vst.msk [vmem:[%s1990_s3 + $0x8] sm:$0xff] %vm1098_vm9, %v1025_v6  ;;  %1108 = vst.msk [vmem:[%s1990_s3 + $0x48] sm:$0xff] %vm1098_vm9, %v1065_v56  ;;  %v1020_v57 = vadd.f32 %v1019_v10, %v434_v29  ;;  %v1060_v21 = vadd.f32 %v1059_v45, %v474_v36 }
 0x1d7   :  { %v1180_v53 = vpop.f32.mrf.mxu0  ;;  %v1192_v58 = vpop.f32.mrf.mxu1 }
 0x1d8   :  { %1099 = vst.msk [vmem:[%s1990_s3] sm:$0xff] %vm1098_vm9, %v1020_v57  ;;  %1107 = vst.msk [vmem:[%s1990_s3 + $0x40] sm:$0xff] %vm1098_vm9, %v1060_v21  ;;  %v1035_v28 = vadd.f32 %v1180_v53, %v449_v19  ;;  %v1075_v51 = vadd.f32 %v1192_v58, %v489_v52 }
 0x1d9   :  { %v1029_v59 = vpop.f32.mrf.mxu0  ;;  %v1069_v1 = vpop.f32.mrf.mxu1 }
 0x1da   :  { %1102 = vst.msk [vmem:[%s1990_s3 + $0x18] sm:$0xff] %vm1098_vm9, %v1035_v28  ;;  %1110 = vst.msk [vmem:[%s1990_s3 + $0x58] sm:$0xff] %vm1098_vm9, %v1075_v51  ;;  %v1030_v3 = vadd.f32 %v1029_v59, %v444_v16  ;;  %v1070_v9 = vadd.f32 %v1069_v1, %v484_v18 }
 0x1db   :  { %v1183_v14 = vpop.f32.mrf.mxu0  ;;  %v1195_v20 = vpop.f32.mrf.mxu1 }
 0x1dc   :  { %1101 = vst.msk [vmem:[%s1990_s3 + $0x10] sm:$0xff] %vm1098_vm9, %v1030_v3  ;;  %1109 = vst.msk [vmem:[%s1990_s3 + $0x50] sm:$0xff] %vm1098_vm9, %v1070_v9  ;;  %v1045_v27 = vadd.f32 %v1183_v14, %v459_v61  ;;  %v1085_v32 = vadd.f32 %v1195_v20, %v499_v40 }
 0x1dd   :  { %v1039_v38 = vpop.f32.mrf.mxu0  ;;  %v1079_v26 = vpop.f32.mrf.mxu1 }
 0x1de   :  { %1104 = vst.msk [vmem:[%s1990_s3 + $0x28] sm:$0xff] %vm1098_vm9, %v1045_v27  ;;  %1112 = vst.msk [vmem:[%s1990_s3 + $0x68] sm:$0xff] %vm1098_vm9, %v1085_v32  ;;  %v1040_v63 = vadd.f32 %v1039_v38, %v454_v39  ;;  %v1080_v33 = vadd.f32 %v1079_v26, %v494_v2 }
 0x1df   :  { %v1186_v37 = vpop.f32.mrf.mxu0  ;;  %v1198_v15 = vpop.f32.mrf.mxu1 }
 0x1e0   :  { %1103 = vst.msk [vmem:[%s1990_s3 + $0x20] sm:$0xff] %vm1098_vm9, %v1040_v63  ;;  %1111 = vst.msk [vmem:[%s1990_s3 + $0x60] sm:$0xff] %vm1098_vm9, %v1080_v33  ;;  %v1055_v8 = vadd.f32 %v1186_v37, %v469_v34  ;;  %v1095_v49 = vadd.f32 %v1198_v15, %v509_v62 }
 0x1e1   :  { %v1049_v23 = vpop.f32.mrf.mxu0  ;;  %v1089_v0 = vpop.f32.mrf.mxu1 }
 0x1e2   :  { %1106 = vst.msk [vmem:[%s1990_s3 + $0x38] sm:$0xff] %vm1098_vm9, %v1055_v8  ;;  %1114 = vst.msk [vmem:[%s1990_s3 + $0x78] sm:$0xff] %vm1098_vm9, %v1095_v49  ;;  %v1050_v24 = vadd.f32 %v1049_v23, %v464_v25  ;;  %v1090_v17 = vadd.f32 %v1089_v0, %v504_v48 }
 0x1e4   :  { %1105 = vst.msk [vmem:[%s1990_s3 + $0x30] sm:$0xff] %vm1098_vm9, %v1050_v24  ;;  %1113 = vst.msk [vmem:[%s1990_s3 + $0x70] sm:$0xff] %vm1098_vm9, %v1090_v17 }

</bundles_post_ra>
